<compile_context>
chip_gen: v5e
topology: v5e:2x2
jax: 0.10.0
libtpu: 0.0.40
codegen_flags: <defaults>
</compile_context>

<pallas_src>
import functools
import math

import jax
import jax.numpy as jnp
from jax.experimental import pallas as pl
from jax.experimental.pallas import tpu as pltpu

LN_EPS = 1e-5


def _layernorm(x, gamma, beta):
    # x: (T, D); gamma/beta: (1, D). Matches nn.LayerNorm(D) (biased variance).
    mean = jnp.mean(x, axis=-1, keepdims=True)
    var = jnp.mean(jnp.square(x - mean), axis=-1, keepdims=True)
    inv = jax.lax.rsqrt(var + LN_EPS)
    return (x - mean) * inv * gamma + beta


def transformer_block_kernel(
    xq_ref,                                   # (1, TQ, D) f32  query tile of x
    xkv_ref,                                  # (1, S,  D) f32  full sequence (for K/V)
    wq_ref, bq_ref, wk_ref, bk_ref, wv_ref, bv_ref,   # attention params (W bf16, b f32)
    g1_ref, be1_ref,                          # norm1 (f32)
    w1_ref, b1_ref, w2_ref, b2_ref,           # feed-forward (W bf16, b f32)
    g2_ref, be2_ref,                          # norm2 (f32)
    o_ref,                                    # (1, TQ, D) f32
    k_scratch, v_scratch,                     # (S, D) bf16 VMEM, persist across qt axis
    *, hidden_chunk,
):
    qt = pl.program_id(1)

    # ---- K/V projections: computed once per batch (qt == 0), cached in VMEM ----
    @pl.when(qt == 0)
    def _():
        xkv_bf = xkv_ref[0].astype(jnp.bfloat16)              # (S, D) bf16
        k = jnp.dot(xkv_bf, wk_ref[...],
                    preferred_element_type=jnp.float32) + bk_ref[...]
        v = jnp.dot(xkv_bf, wv_ref[...],
                    preferred_element_type=jnp.float32) + bv_ref[...]
        k_scratch[...] = k.astype(jnp.bfloat16)
        v_scratch[...] = v.astype(jnp.bfloat16)

    x_q = xq_ref[0]                                            # (TQ, D) f32
    xq_bf = x_q.astype(jnp.bfloat16)
    tq, d = x_q.shape
    inv_sqrt_d = 1.0 / math.sqrt(d)

    # ---- single-head attention for this query tile ----
    q = jnp.dot(xq_bf, wq_ref[...],
                preferred_element_type=jnp.float32) + bq_ref[...]
    # Fold the 1/sqrt(D) scale into q (TQ*D muls instead of TQ*S divides).
    q = q * inv_sqrt_d

    # Contract on the last dim of both q and k: no k.T transpose materialized.
    scores = jax.lax.dot_general(
        q.astype(jnp.bfloat16), k_scratch[...],
        dimension_numbers=(((1,), (1,)), ((), ())),
        preferred_element_type=jnp.float32)                    # (TQ, S) f32

    # Max-stabilized softmax in f32; approximate reciprocal on the EUP.
    scores = scores - jnp.max(scores, axis=-1, keepdims=True)
    p = jnp.exp(scores)
    attn = p * pl.reciprocal(jnp.sum(p, axis=-1, keepdims=True), approx=True)
    attended = jnp.dot(attn.astype(jnp.bfloat16), v_scratch[...],
                       preferred_element_type=jnp.float32)     # (TQ, D) f32

    # ---- residual + norm1 (f32) ----
    h = _layernorm(x_q + attended, g1_ref[...], be1_ref[...])
    h_bf = h.astype(jnp.bfloat16)

    # ---- feed-forward: Linear(D->H) -> ReLU -> Linear(H->D), chunked over H ----
    hdim = w1_ref.shape[-1]
    acc = jnp.zeros((tq, d), jnp.float32)
    for off in range(0, hdim, hidden_chunk):                   # static, fully unrolled
        w1c = w1_ref[:, off:off + hidden_chunk]                # (D, HC) bf16
        b1c = b1_ref[:, off:off + hidden_chunk]                # (1, HC) f32
        z = jnp.dot(h_bf, w1c, preferred_element_type=jnp.float32) + b1c
        z = jnp.maximum(z, 0.0).astype(jnp.bfloat16)
        w2c = w2_ref[off:off + hidden_chunk, :]                # (HC, D) bf16
        acc = acc + jnp.dot(z, w2c, preferred_element_type=jnp.float32)
    ff = acc + b2_ref[...]

    # ---- residual + norm2 (f32) ----
    out = _layernorm(h + ff, g2_ref[...], be2_ref[...])
    o_ref[0] = out.astype(o_ref.dtype)


def transformer_block(x, params, *, q_tile=128, hidden_chunk=256):
    """x: (B, S, D) float32. params: dict of f32 weights (see init_params)."""
    B, S, D = x.shape
    H = params["w1"].shape[1]

    # Query-tile size: multiple of 8 sublanes (or the full sequence).
    tq = min(q_tile, S)
    if S % tq != 0 or tq % 8 != 0:
        tq = S
    # H-chunk for the FFN (lane-aligned); fall back to the full H if it doesn't divide.
    hc = hidden_chunk
    if hc is None or H % hc != 0 or hc % 128 != 0:
        hc = H

    # Weights go to the MXU in bf16 (halves their VMEM/HBM footprint); biases
    # and LayerNorm affine params stay f32 (added to / used by f32 math).
    bf = lambda a: a.astype(jnp.bfloat16)
    wq, wk, wv = bf(params["wq"]), bf(params["wk"]), bf(params["wv"])
    w1, w2 = bf(params["w1"]), bf(params["w2"])

    def const_spec(shape):
        n = len(shape)
        # Constant index map across the grid -> single-buffer (no pipelining win
        # from double-buffering a block that never changes).
        return pl.BlockSpec(shape, lambda b, qt, _n=n: (0,) * _n,
                            pipeline_mode=pl.Buffered(1))

    in_specs = [
        pl.BlockSpec((1, tq, D), lambda b, qt: (b, qt, 0)),   # x, query tile
        pl.BlockSpec((1, S, D), lambda b, qt: (b, 0, 0)),     # x, full seq (K/V)
        const_spec((D, D)), const_spec((1, D)),               # wq, bq
        const_spec((D, D)), const_spec((1, D)),               # wk, bk
        const_spec((D, D)), const_spec((1, D)),               # wv, bv
        const_spec((1, D)), const_spec((1, D)),               # gamma1, beta1
        const_spec((D, H)), const_spec((1, H)),               # w1, b1
        const_spec((H, D)), const_spec((1, D)),               # w2, b2
        const_spec((1, D)), const_spec((1, D)),               # gamma2, beta2
    ]

    # Explicit scoped-VMEM budget: weights (bf16, single-buffered) + pipelined
    # activation tiles + K/V scratch + in-kernel intermediates, ~25% headroom.
    weight_bytes = (3 * D * D + 2 * D * H) * 2
    small_bytes = (5 * D + H + 4 * D) * 4
    act_bytes = 2 * (tq * D + S * D + tq * D) * 4              # double-buffered x/out tiles
    kv_scratch_bytes = 2 * S * D * 2                           # bf16 K and V caches
    interm_bytes = (2 * S * D + 2 * tq * S + tq * hc + 6 * tq * D) * 4
    vmem_limit = int(1.25 * (weight_bytes + small_bytes + act_bytes
                             + kv_scratch_bytes + interm_bytes))
    vmem_limit = min(max(vmem_limit, 32 * 1024 * 1024), 96 * 1024 * 1024)

    n_tiles = S // tq
    # K/V projections counted once per batch; everything else per query tile.
    flops = (2 * B * (2 * S * D * D)
             + 2 * B * n_tiles * (tq * D * D + 2 * tq * S * D + 2 * tq * D * H))
    transcendentals = B * n_tiles * (tq * S + 3 * tq)          # exp + rsqrt/recip
    bytes_accessed = (B * S * D * 4                            # x (query tiles)
                      + B * S * D * 4                          # x (full seq, once per b)
                      + B * S * D * 4                          # out
                      + weight_bytes + small_bytes)

    kernel = functools.partial(transformer_block_kernel, hidden_chunk=hc)

    return pl.pallas_call(
        kernel,
        out_shape=jax.ShapeDtypeStruct((B, S, D), x.dtype),
        grid_spec=pltpu.PrefetchScalarGridSpec(
            num_scalar_prefetch=0,
            grid=(B, n_tiles),
            in_specs=in_specs,
            out_specs=pl.BlockSpec((1, tq, D), lambda b, qt: (b, qt, 0)),
            scratch_shapes=[pltpu.VMEM((S, D), jnp.bfloat16),   # K cache
                            pltpu.VMEM((S, D), jnp.bfloat16)],  # V cache
        ),
        compiler_params=pltpu.CompilerParams(
            # qt axis carries the K/V scratch state -> must stay sequential.
            dimension_semantics=("parallel", "arbitrary"),
            vmem_limit_bytes=vmem_limit),
        cost_estimate=pl.CostEstimate(
            flops=int(flops),
            transcendentals=int(transcendentals),
            bytes_accessed=int(bytes_accessed)),
    )(
        x, x,
        wq, params["bq"],
        wk, params["bk"],
        wv, params["bv"],
        params["gamma1"], params["beta1"],
        w1, params["b1"],
        w2, params["b2"],
        params["gamma2"], params["beta2"],
    )


def init_params(key, embedding_dim, hidden_dim):
    D, H = embedding_dim, hidden_dim
    ks = jax.random.split(key, 10)
    scale_d = 1.0 / math.sqrt(D)
    scale_h = 1.0 / math.sqrt(H)
    # Linear weights stored as (in, out) so kernel computes x @ W + b.
    return {
        "wq": jax.random.uniform(ks[0], (D, D), jnp.float32, -scale_d, scale_d),
        "bq": jax.random.uniform(ks[1], (1, D), jnp.float32, -scale_d, scale_d),
        "wk": jax.random.uniform(ks[2], (D, D), jnp.float32, -scale_d, scale_d),
        "bk": jax.random.uniform(ks[3], (1, D), jnp.float32, -scale_d, scale_d),
        "wv": jax.random.uniform(ks[4], (D, D), jnp.float32, -scale_d, scale_d),
        "bv": jax.random.uniform(ks[5], (1, D), jnp.float32, -scale_d, scale_d),
        "gamma1": jnp.ones((1, D), jnp.float32),
        "beta1": jnp.zeros((1, D), jnp.float32),
        "w1": jax.random.uniform(ks[6], (D, H), jnp.float32, -scale_d, scale_d),
        "b1": jax.random.uniform(ks[7], (1, H), jnp.float32, -scale_d, scale_d),
        "w2": jax.random.uniform(ks[8], (H, D), jnp.float32, -scale_h, scale_h),
        "b2": jax.random.uniform(ks[9], (1, D), jnp.float32, -scale_h, scale_h),
        "gamma2": jnp.ones((1, D), jnp.float32),
        "beta2": jnp.zeros((1, D), jnp.float32),
    }


def reference_forward(x, p):
    # Pure-JAX reference mirroring the kernel's precision strategy
    # (bf16 matmul operands, f32 accumulation; f32 softmax / LayerNorm).
    def ln(v, g, b):
        m = jnp.mean(v, axis=-1, keepdims=True)
        var = jnp.mean(jnp.square(v - m), axis=-1, keepdims=True)
        return (v - m) * jax.lax.rsqrt(var + LN_EPS) * g + b

    def mm(a, w):
        return jnp.einsum("...ij,jk->...ik", a.astype(jnp.bfloat16),
                          w.astype(jnp.bfloat16),
                          preferred_element_type=jnp.float32)

    D = x.shape[-1]
    q = (mm(x, p["wq"]) + p["bq"]) * (1.0 / math.sqrt(D))
    k = mm(x, p["wk"]) + p["bk"]
    v = mm(x, p["wv"]) + p["bv"]
    scores = jnp.einsum("bsd,btd->bst", q.astype(jnp.bfloat16),
                        k.astype(jnp.bfloat16),
                        preferred_element_type=jnp.float32)
    attn = jax.nn.softmax(scores, axis=-1)
    attended = jnp.einsum("bst,btd->bsd", attn.astype(jnp.bfloat16),
                          v.astype(jnp.bfloat16),
                          preferred_element_type=jnp.float32)
    h = ln(x + attended, p["gamma1"], p["beta1"])
    z = jnp.maximum(mm(h, p["w1"]) + p["b1"], 0.0)
    ff = mm(z, p["w2"]) + p["b2"]
    return ln(h + ff, p["gamma2"], p["beta2"])


if __name__ == "__main__":
    # Small, but lane-dense shapes (D, H multiples of 128; S multiple of TQ=128)
    # so the grid actually has (B, S/TQ) = (2, 2) steps, the per-batch K/V
    # caching across query tiles is exercised, and the FFN H-chunking
    # (H/HC = 2 chunks) is exercised.
    B, S, D, H = 2, 256, 128, 512
    key = jax.random.PRNGKey(0)
    kx, kp = jax.random.split(key)
    x = jax.random.normal(kx, (B, S, D), jnp.float32)
    params = init_params(kp, D, H)

    out = transformer_block(x, params)
    out = jax.block_until_ready(out)

    ref = reference_forward(x, params)
    assert out.shape == (B, S, D)
    max_err = float(jnp.max(jnp.abs(out - ref)))
    # bf16 matmul operands + approx reciprocal -> compare against a bf16-matmul
    # reference at a correspondingly looser tolerance.
    assert jnp.allclose(out, ref, atol=2e-2, rtol=2e-2), max_err
    print("KERNEL_OK")
</pallas_src>

<mosaic_0001>
module attributes {stable_mosaic.version = 11 : i64} {
  func.func @transformer_block_kernel(%arg0: i32, %arg1: i32, %arg2: memref<1x128x128xf32, #tpu.memory_space<vmem>>, %arg3: memref<1x256x128xf32, #tpu.memory_space<vmem>>, %arg4: memref<128x128xbf16, #tpu.memory_space<vmem>>, %arg5: memref<1x128xf32, #tpu.memory_space<vmem>>, %arg6: memref<128x128xbf16, #tpu.memory_space<vmem>>, %arg7: memref<1x128xf32, #tpu.memory_space<vmem>>, %arg8: memref<128x128xbf16, #tpu.memory_space<vmem>>, %arg9: memref<1x128xf32, #tpu.memory_space<vmem>>, %arg10: memref<1x128xf32, #tpu.memory_space<vmem>>, %arg11: memref<1x128xf32, #tpu.memory_space<vmem>>, %arg12: memref<128x512xbf16, #tpu.memory_space<vmem>>, %arg13: memref<1x512xf32, #tpu.memory_space<vmem>>, %arg14: memref<512x128xbf16, #tpu.memory_space<vmem>>, %arg15: memref<1x128xf32, #tpu.memory_space<vmem>>, %arg16: memref<1x128xf32, #tpu.memory_space<vmem>>, %arg17: memref<1x128xf32, #tpu.memory_space<vmem>>, %arg18: memref<1x128x128xf32, #tpu.memory_space<vmem>>, %arg19: memref<256x128xbf16, #tpu.memory_space<vmem>>, %arg20: memref<256x128xbf16, #tpu.memory_space<vmem>>) attributes {dimension_semantics = [#tpu.dimension_semantics<parallel>, #tpu.dimension_semantics<arbitrary>], iteration_bounds = array<i64: 2, 2>, scalar_prefetch = 0 : i64, scratch_operands = 2 : i64, tpu.core_type = #tpu.core_type<tc>, window_params = [{transform_indices = @transform_0, window_bounds = array<i64: 1, 128, 128>}, {transform_indices = @transform_1, window_bounds = array<i64: 1, 256, 128>}, {pipeline_mode = #tpu.pipeline_mode<synchronous>, transform_indices = @transform_2, window_bounds = array<i64: 128, 128>}, {pipeline_mode = #tpu.pipeline_mode<synchronous>, transform_indices = @transform_3, window_bounds = array<i64: 1, 128>}, {pipeline_mode = #tpu.pipeline_mode<synchronous>, transform_indices = @transform_4, window_bounds = array<i64: 128, 128>}, {pipeline_mode = #tpu.pipeline_mode<synchronous>, transform_indices = @transform_5, window_bounds = array<i64: 1, 128>}, {pipeline_mode = #tpu.pipeline_mode<synchronous>, transform_indices = @transform_6, window_bounds = array<i64: 128, 128>}, {pipeline_mode = #tpu.pipeline_mode<synchronous>, transform_indices = @transform_7, window_bounds = array<i64: 1, 128>}, {pipeline_mode = #tpu.pipeline_mode<synchronous>, transform_indices = @transform_8, window_bounds = array<i64: 1, 128>}, {pipeline_mode = #tpu.pipeline_mode<synchronous>, transform_indices = @transform_9, window_bounds = array<i64: 1, 128>}, {pipeline_mode = #tpu.pipeline_mode<synchronous>, transform_indices = @transform_10, window_bounds = array<i64: 128, 512>}, {pipeline_mode = #tpu.pipeline_mode<synchronous>, transform_indices = @transform_11, window_bounds = array<i64: 1, 512>}, {pipeline_mode = #tpu.pipeline_mode<synchronous>, transform_indices = @transform_12, window_bounds = array<i64: 512, 128>}, {pipeline_mode = #tpu.pipeline_mode<synchronous>, transform_indices = @transform_13, window_bounds = array<i64: 1, 128>}, {pipeline_mode = #tpu.pipeline_mode<synchronous>, transform_indices = @transform_14, window_bounds = array<i64: 1, 128>}, {pipeline_mode = #tpu.pipeline_mode<synchronous>, transform_indices = @transform_15, window_bounds = array<i64: 1, 128>}, {transform_indices = @transform_16, window_bounds = array<i64: 1, 128, 128>}]} {
    %c0_i32 = arith.constant 0 : i32
    %0 = arith.cmpi eq, %arg1, %c0_i32 : i32
    %1 = arith.extui %0 : i1 to i32
    %c0_i32_0 = arith.constant 0 : i32
    %2 = arith.cmpi ne, %1, %c0_i32_0 : i32
    scf.if %2 {
      %c0_57 = arith.constant 0 : index
      %c0_58 = arith.constant 0 : index
      %c0_59 = arith.constant 0 : index
      %109 = vector.load %arg3[%c0_57, %c0_58, %c0_59] : memref<1x256x128xf32, #tpu.memory_space<vmem>>, vector<1x256x128xf32>
      %110 = vector.shape_cast %109 : vector<1x256x128xf32> to vector<256x128xf32>
      %111 = arith.truncf %110 : vector<256x128xf32> to vector<256x128xbf16>
      %c0_60 = arith.constant 0 : index
      %c0_61 = arith.constant 0 : index
      %112 = vector.load %arg6[%c0_60, %c0_61] : memref<128x128xbf16, #tpu.memory_space<vmem>>, vector<128x128xbf16>
      %cst_62 = arith.constant dense<0.000000e+00> : vector<256x128xf32>
      %113 = tpu.matmul %111, %112, %cst_62 {dimension_numbers = #tpu.dot_dimension_numbers<[1], [0], [0], [1], [0, 0, 1, 1], [], []>} : vector<256x128xbf16>, vector<128x128xbf16>, vector<256x128xf32> -> vector<256x128xf32>
      %c0_63 = arith.constant 0 : index
      %c0_64 = arith.constant 0 : index
      %114 = vector.load %arg7[%c0_63, %c0_64] : memref<1x128xf32, #tpu.memory_space<vmem>>, vector<1x128xf32>
      %115 = vector.broadcast %114 : vector<1x128xf32> to vector<256x128xf32>
      %116 = arith.addf %113, %115 : vector<256x128xf32>
      %c0_65 = arith.constant 0 : index
      %c0_66 = arith.constant 0 : index
      %117 = vector.load %arg8[%c0_65, %c0_66] : memref<128x128xbf16, #tpu.memory_space<vmem>>, vector<128x128xbf16>
      %cst_67 = arith.constant dense<0.000000e+00> : vector<256x128xf32>
      %118 = tpu.matmul %111, %117, %cst_67 {dimension_numbers = #tpu.dot_dimension_numbers<[1], [0], [0], [1], [0, 0, 1, 1], [], []>} : vector<256x128xbf16>, vector<128x128xbf16>, vector<256x128xf32> -> vector<256x128xf32>
      %c0_68 = arith.constant 0 : index
      %c0_69 = arith.constant 0 : index
      %119 = vector.load %arg9[%c0_68, %c0_69] : memref<1x128xf32, #tpu.memory_space<vmem>>, vector<1x128xf32>
      %120 = vector.broadcast %119 : vector<1x128xf32> to vector<256x128xf32>
      %121 = arith.addf %118, %120 : vector<256x128xf32>
      %122 = arith.truncf %116 : vector<256x128xf32> to vector<256x128xbf16>
      %c0_70 = arith.constant 0 : index
      %c0_71 = arith.constant 0 : index
      %123 = vector.load %arg19[%c0_70, %c0_71] : memref<256x128xbf16, #tpu.memory_space<vmem>>, vector<256x128xbf16>
      tpu.vector_store %arg19[%c0_70, %c0_71], %122 {strides = array<i32>} : memref<256x128xbf16, #tpu.memory_space<vmem>>, vector<256x128xbf16>,
      %124 = arith.truncf %121 : vector<256x128xf32> to vector<256x128xbf16>
      %c0_72 = arith.constant 0 : index
      %c0_73 = arith.constant 0 : index
      %125 = vector.load %arg20[%c0_72, %c0_73] : memref<256x128xbf16, #tpu.memory_space<vmem>>, vector<256x128xbf16>
      tpu.vector_store %arg20[%c0_72, %c0_73], %124 {strides = array<i32>} : memref<256x128xbf16, #tpu.memory_space<vmem>>, vector<256x128xbf16>,
    } else {
    }
    %c0 = arith.constant 0 : index
    %c0_1 = arith.constant 0 : index
    %c0_2 = arith.constant 0 : index
    %3 = vector.load %arg2[%c0, %c0_1, %c0_2] : memref<1x128x128xf32, #tpu.memory_space<vmem>>, vector<1x128x128xf32>
    %4 = vector.shape_cast %3 : vector<1x128x128xf32> to vector<128x128xf32>
    %5 = arith.truncf %4 : vector<128x128xf32> to vector<128x128xbf16>
    %c0_3 = arith.constant 0 : index
    %c0_4 = arith.constant 0 : index
    %6 = vector.load %arg4[%c0_3, %c0_4] : memref<128x128xbf16, #tpu.memory_space<vmem>>, vector<128x128xbf16>
    %cst = arith.constant dense<0.000000e+00> : vector<128x128xf32>
    %7 = tpu.matmul %5, %6, %cst {dimension_numbers = #tpu.dot_dimension_numbers<[1], [0], [0], [1], [0, 0, 1, 1], [], []>} : vector<128x128xbf16>, vector<128x128xbf16>, vector<128x128xf32> -> vector<128x128xf32>
    %c0_5 = arith.constant 0 : index
    %c0_6 = arith.constant 0 : index
    %8 = vector.load %arg5[%c0_5, %c0_6] : memref<1x128xf32, #tpu.memory_space<vmem>>, vector<1x128xf32>
    %9 = vector.broadcast %8 : vector<1x128xf32> to vector<128x128xf32>
    %10 = arith.addf %7, %9 : vector<128x128xf32>
    %cst_7 = arith.constant 0.0883883461 : f32
    %11 = vector.broadcast %cst_7 : f32 to vector<128x128xf32>
    %12 = arith.mulf %10, %11 : vector<128x128xf32>
    %13 = arith.truncf %12 : vector<128x128xf32> to vector<128x128xbf16>
    %c0_8 = arith.constant 0 : index
    %c0_9 = arith.constant 0 : index
    %14 = vector.load %arg19[%c0_8, %c0_9] : memref<256x128xbf16, #tpu.memory_space<vmem>>, vector<256x128xbf16>
    %cst_10 = arith.constant dense<0.000000e+00> : vector<128x256xf32>
    %15 = tpu.matmul %13, %14, %cst_10 {dimension_numbers = #tpu.dot_dimension_numbers<[1], [1], [0], [0], [0, 0, 1, 0], [], []>} : vector<128x128xbf16>, vector<256x128xbf16>, vector<128x256xf32> -> vector<128x256xf32>
    %cst_11 = arith.constant dense<0xFF800000> : vector<128xf32>
    %16 = vector.multi_reduction <maximumf>, %15, %cst_11 [1] : vector<128x256xf32> to vector<128xf32>
    %17 = vector.shape_cast %16 : vector<128xf32> to vector<128x1xf32>
    %18 = vector.broadcast %17 : vector<128x1xf32> to vector<128x256xf32>
    %19 = arith.subf %15, %18 : vector<128x256xf32>
    %20 = math.exp %19 : vector<128x256xf32>
    %cst_12 = arith.constant dense<0.000000e+00> : vector<128xf32>
    %21 = vector.multi_reduction <add>, %20, %cst_12 [1] : vector<128x256xf32> to vector<128xf32>
    %22 = vector.shape_cast %21 : vector<128xf32> to vector<128x1xf32>
    %23 = tpu.reciprocal %22 {approx = true} : vector<128x1xf32> -> vector<128x1xf32>
    %24 = vector.broadcast %23 : vector<128x1xf32> to vector<128x256xf32>
    %25 = arith.mulf %20, %24 : vector<128x256xf32>
    %26 = arith.truncf %25 : vector<128x256xf32> to vector<128x256xbf16>
    %c0_13 = arith.constant 0 : index
    %c0_14 = arith.constant 0 : index
    %27 = vector.load %arg20[%c0_13, %c0_14] : memref<256x128xbf16, #tpu.memory_space<vmem>>, vector<256x128xbf16>
    %cst_15 = arith.constant dense<0.000000e+00> : vector<128x128xf32>
    %28 = tpu.matmul %26, %27, %cst_15 {dimension_numbers = #tpu.dot_dimension_numbers<[1], [0], [0], [1], [0, 0, 1, 1], [], []>} : vector<128x256xbf16>, vector<256x128xbf16>, vector<128x128xf32> -> vector<128x128xf32>
    %29 = arith.addf %4, %28 : vector<128x128xf32>
    %c0_16 = arith.constant 0 : index
    %c0_17 = arith.constant 0 : index
    %30 = vector.load %arg10[%c0_16, %c0_17] : memref<1x128xf32, #tpu.memory_space<vmem>>, vector<1x128xf32>
    %c0_18 = arith.constant 0 : index
    %c0_19 = arith.constant 0 : index
    %31 = vector.load %arg11[%c0_18, %c0_19] : memref<1x128xf32, #tpu.memory_space<vmem>>, vector<1x128xf32>
    %cst_20 = arith.constant dense<0.000000e+00> : vector<128xf32>
    %32 = vector.multi_reduction <add>, %29, %cst_20 [1] : vector<128x128xf32> to vector<128xf32>
    %33 = vector.shape_cast %32 : vector<128xf32> to vector<128x1xf32>
    %cst_21 = arith.constant 1.280000e+02 : f32
    %34 = vector.broadcast %cst_21 : f32 to vector<128x1xf32>
    %35 = arith.divf %33, %34 : vector<128x1xf32>
    %36 = vector.broadcast %35 : vector<128x1xf32> to vector<128x128xf32>
    %37 = arith.subf %29, %36 : vector<128x128xf32>
    %38 = arith.mulf %37, %37 : vector<128x128xf32>
    %cst_22 = arith.constant dense<0.000000e+00> : vector<128xf32>
    %39 = vector.multi_reduction <add>, %38, %cst_22 [1] : vector<128x128xf32> to vector<128xf32>
    %40 = vector.shape_cast %39 : vector<128xf32> to vector<128x1xf32>
    %cst_23 = arith.constant 1.280000e+02 : f32
    %41 = vector.broadcast %cst_23 : f32 to vector<128x1xf32>
    %42 = arith.divf %40, %41 : vector<128x1xf32>
    %cst_24 = arith.constant 9.99999974E-6 : f32
    %43 = vector.broadcast %cst_24 : f32 to vector<128x1xf32>
    %44 = arith.addf %42, %43 : vector<128x1xf32>
    %45 = math.rsqrt %44 : vector<128x1xf32>
    %46 = vector.broadcast %35 : vector<128x1xf32> to vector<128x128xf32>
    %47 = arith.subf %29, %46 : vector<128x128xf32>
    %48 = vector.broadcast %45 : vector<128x1xf32> to vector<128x128xf32>
    %49 = arith.mulf %47, %48 : vector<128x128xf32>
    %50 = vector.broadcast %30 : vector<1x128xf32> to vector<128x128xf32>
    %51 = arith.mulf %49, %50 : vector<128x128xf32>
    %52 = vector.broadcast %31 : vector<1x128xf32> to vector<128x128xf32>
    %53 = arith.addf %51, %52 : vector<128x128xf32>
    %54 = arith.truncf %53 : vector<128x128xf32> to vector<128x128xbf16>
    %cst_25 = arith.constant 0.000000e+00 : f32
    %55 = vector.broadcast %cst_25 : f32 to vector<128x128xf32>
    %c0_26 = arith.constant 0 : index
    %c0_27 = arith.constant 0 : index
    %56 = vector.load %arg12[%c0_26, %c0_27] : memref<128x512xbf16, #tpu.memory_space<vmem>>, vector<128x256xbf16>
    %c0_28 = arith.constant 0 : index
    %c0_29 = arith.constant 0 : index
    %57 = vector.load %arg13[%c0_28, %c0_29] : memref<1x512xf32, #tpu.memory_space<vmem>>, vector<1x256xf32>
    %cst_30 = arith.constant dense<0.000000e+00> : vector<128x256xf32>
    %58 = tpu.matmul %54, %56, %cst_30 {dimension_numbers = #tpu.dot_dimension_numbers<[1], [0], [0], [1], [0, 0, 1, 1], [], []>} : vector<128x128xbf16>, vector<128x256xbf16>, vector<128x256xf32> -> vector<128x256xf32>
    %59 = vector.broadcast %57 : vector<1x256xf32> to vector<128x256xf32>
    %60 = arith.addf %58, %59 : vector<128x256xf32>
    %cst_31 = arith.constant 0.000000e+00 : f32
    %61 = vector.broadcast %cst_31 : f32 to vector<128x256xf32>
    %62 = arith.maximumf %60, %61 : vector<128x256xf32>
    %63 = arith.truncf %62 : vector<128x256xf32> to vector<128x256xbf16>
    %c0_32 = arith.constant 0 : index
    %c0_33 = arith.constant 0 : index
    %64 = vector.load %arg14[%c0_32, %c0_33] : memref<512x128xbf16, #tpu.memory_space<vmem>>, vector<256x128xbf16>
    %cst_34 = arith.constant dense<0.000000e+00> : vector<128x128xf32>
    %65 = tpu.matmul %63, %64, %cst_34 {dimension_numbers = #tpu.dot_dimension_numbers<[1], [0], [0], [1], [0, 0, 1, 1], [], []>} : vector<128x256xbf16>, vector<256x128xbf16>, vector<128x128xf32> -> vector<128x128xf32>
    %66 = arith.addf %55, %65 : vector<128x128xf32>
    %c0_35 = arith.constant 0 : index
    %c256 = arith.constant 256 : index
    %67 = vector.load %arg12[%c0_35, %c256] : memref<128x512xbf16, #tpu.memory_space<vmem>>, vector<128x256xbf16>
    %c0_36 = arith.constant 0 : index
    %c256_37 = arith.constant 256 : index
    %68 = vector.load %arg13[%c0_36, %c256_37] : memref<1x512xf32, #tpu.memory_space<vmem>>, vector<1x256xf32>
    %cst_38 = arith.constant dense<0.000000e+00> : vector<128x256xf32>
    %69 = tpu.matmul %54, %67, %cst_38 {dimension_numbers = #tpu.dot_dimension_numbers<[1], [0], [0], [1], [0, 0, 1, 1], [], []>} : vector<128x128xbf16>, vector<128x256xbf16>, vector<128x256xf32> -> vector<128x256xf32>
    %70 = vector.broadcast %68 : vector<1x256xf32> to vector<128x256xf32>
    %71 = arith.addf %69, %70 : vector<128x256xf32>
    %cst_39 = arith.constant 0.000000e+00 : f32
    %72 = vector.broadcast %cst_39 : f32 to vector<128x256xf32>
    %73 = arith.maximumf %71, %72 : vector<128x256xf32>
    %74 = arith.truncf %73 : vector<128x256xf32> to vector<128x256xbf16>
    %c256_40 = arith.constant 256 : index
    %c0_41 = arith.constant 0 : index
    %75 = vector.load %arg14[%c256_40, %c0_41] : memref<512x128xbf16, #tpu.memory_space<vmem>>, vector<256x128xbf16>
    %cst_42 = arith.constant dense<0.000000e+00> : vector<128x128xf32>
    %76 = tpu.matmul %74, %75, %cst_42 {dimension_numbers = #tpu.dot_dimension_numbers<[1], [0], [0], [1], [0, 0, 1, 1], [], []>} : vector<128x256xbf16>, vector<256x128xbf16>, vector<128x128xf32> -> vector<128x128xf32>
    %77 = arith.addf %66, %76 : vector<128x128xf32>
    %c0_43 = arith.constant 0 : index
    %c0_44 = arith.constant 0 : index
    %78 = vector.load %arg15[%c0_43, %c0_44] : memref<1x128xf32, #tpu.memory_space<vmem>>, vector<1x128xf32>
    %79 = vector.broadcast %78 : vector<1x128xf32> to vector<128x128xf32>
    %80 = arith.addf %77, %79 : vector<128x128xf32>
    %81 = arith.addf %53, %80 : vector<128x128xf32>
    %c0_45 = arith.constant 0 : index
    %c0_46 = arith.constant 0 : index
    %82 = vector.load %arg16[%c0_45, %c0_46] : memref<1x128xf32, #tpu.memory_space<vmem>>, vector<1x128xf32>
    %c0_47 = arith.constant 0 : index
    %c0_48 = arith.constant 0 : index
    %83 = vector.load %arg17[%c0_47, %c0_48] : memref<1x128xf32, #tpu.memory_space<vmem>>, vector<1x128xf32>
    %cst_49 = arith.constant dense<0.000000e+00> : vector<128xf32>
    %84 = vector.multi_reduction <add>, %81, %cst_49 [1] : vector<128x128xf32> to vector<128xf32>
    %85 = vector.shape_cast %84 : vector<128xf32> to vector<128x1xf32>
    %cst_50 = arith.constant 1.280000e+02 : f32
    %86 = vector.broadcast %cst_50 : f32 to vector<128x1xf32>
    %87 = arith.divf %85, %86 : vector<128x1xf32>
    %88 = vector.broadcast %87 : vector<128x1xf32> to vector<128x128xf32>
    %89 = arith.subf %81, %88 : vector<128x128xf32>
    %90 = arith.mulf %89, %89 : vector<128x128xf32>
    %cst_51 = arith.constant dense<0.000000e+00> : vector<128xf32>
    %91 = vector.multi_reduction <add>, %90, %cst_51 [1] : vector<128x128xf32> to vector<128xf32>
    %92 = vector.shape_cast %91 : vector<128xf32> to vector<128x1xf32>
    %cst_52 = arith.constant 1.280000e+02 : f32
    %93 = vector.broadcast %cst_52 : f32 to vector<128x1xf32>
    %94 = arith.divf %92, %93 : vector<128x1xf32>
    %cst_53 = arith.constant 9.99999974E-6 : f32
    %95 = vector.broadcast %cst_53 : f32 to vector<128x1xf32>
    %96 = arith.addf %94, %95 : vector<128x1xf32>
    %97 = math.rsqrt %96 : vector<128x1xf32>
    %98 = vector.broadcast %87 : vector<128x1xf32> to vector<128x128xf32>
    %99 = arith.subf %81, %98 : vector<128x128xf32>
    %100 = vector.broadcast %97 : vector<128x1xf32> to vector<128x128xf32>
    %101 = arith.mulf %99, %100 : vector<128x128xf32>
    %102 = vector.broadcast %82 : vector<1x128xf32> to vector<128x128xf32>
    %103 = arith.mulf %101, %102 : vector<128x128xf32>
    %104 = vector.broadcast %83 : vector<1x128xf32> to vector<128x128xf32>
    %105 = arith.addf %103, %104 : vector<128x128xf32>
    %c0_54 = arith.constant 0 : index
    %c0_55 = arith.constant 0 : index
    %c0_56 = arith.constant 0 : index
    %106 = vector.load %arg18[%c0_54, %c0_55, %c0_56] : memref<1x128x128xf32, #tpu.memory_space<vmem>>, vector<1x128x128xf32>
    %107 = vector.shape_cast %106 : vector<1x128x128xf32> to vector<128x128xf32>
    %108 = vector.shape_cast %105 : vector<128x128xf32> to vector<1x128x128xf32>
    tpu.vector_store %arg18[%c0_54, %c0_55, %c0_56], %108 {strides = array<i32>} : memref<1x128x128xf32, #tpu.memory_space<vmem>>, vector<1x128x128xf32>,
    return
  }
  func.func @transform_0(%arg0: i32, %arg1: i32) -> (i32, i32, i32) {
    %c0_i32 = arith.constant 0 : i32
    %c0_i32_0 = arith.constant 0 : i32
    return %arg0, %arg1, %c0_i32 : i32, i32, i32
  }
  func.func @transform_1(%arg0: i32, %arg1: i32) -> (i32, i32, i32) {
    %c0_i32 = arith.constant 0 : i32
    %c0_i32_0 = arith.constant 0 : i32
    %c0_i32_1 = arith.constant 0 : i32
    return %arg0, %c0_i32, %c0_i32_0 : i32, i32, i32
  }
  func.func @transform_2(%arg0: i32, %arg1: i32) -> (i32, i32) {
    %c0_i32 = arith.constant 0 : i32
    %c0_i32_0 = arith.constant 0 : i32
    %c0_i32_1 = arith.constant 0 : i32
    return %c0_i32, %c0_i32_0 : i32, i32
  }
  func.func @transform_3(%arg0: i32, %arg1: i32) -> (i32, i32) {
    %c0_i32 = arith.constant 0 : i32
    %c0_i32_0 = arith.constant 0 : i32
    %c0_i32_1 = arith.constant 0 : i32
    return %c0_i32, %c0_i32_0 : i32, i32
  }
  func.func @transform_4(%arg0: i32, %arg1: i32) -> (i32, i32) {
    %c0_i32 = arith.constant 0 : i32
    %c0_i32_0 = arith.constant 0 : i32
    %c0_i32_1 = arith.constant 0 : i32
    return %c0_i32, %c0_i32_0 : i32, i32
  }
  func.func @transform_5(%arg0: i32, %arg1: i32) -> (i32, i32) {
    %c0_i32 = arith.constant 0 : i32
    %c0_i32_0 = arith.constant 0 : i32
    %c0_i32_1 = arith.constant 0 : i32
    return %c0_i32, %c0_i32_0 : i32, i32
  }
  func.func @transform_6(%arg0: i32, %arg1: i32) -> (i32, i32) {
    %c0_i32 = arith.constant 0 : i32
    %c0_i32_0 = arith.constant 0 : i32
    %c0_i32_1 = arith.constant 0 : i32
    return %c0_i32, %c0_i32_0 : i32, i32
  }
  func.func @transform_7(%arg0: i32, %arg1: i32) -> (i32, i32) {
    %c0_i32 = arith.constant 0 : i32
    %c0_i32_0 = arith.constant 0 : i32
    %c0_i32_1 = arith.constant 0 : i32
    return %c0_i32, %c0_i32_0 : i32, i32
  }
  func.func @transform_8(%arg0: i32, %arg1: i32) -> (i32, i32) {
    %c0_i32 = arith.constant 0 : i32
    %c0_i32_0 = arith.constant 0 : i32
    %c0_i32_1 = arith.constant 0 : i32
    return %c0_i32, %c0_i32_0 : i32, i32
  }
  func.func @transform_9(%arg0: i32, %arg1: i32) -> (i32, i32) {
    %c0_i32 = arith.constant 0 : i32
    %c0_i32_0 = arith.constant 0 : i32
    %c0_i32_1 = arith.constant 0 : i32
    return %c0_i32, %c0_i32_0 : i32, i32
  }
  func.func @transform_10(%arg0: i32, %arg1: i32) -> (i32, i32) {
    %c0_i32 = arith.constant 0 : i32
    %c0_i32_0 = arith.constant 0 : i32
    %c0_i32_1 = arith.constant 0 : i32
    return %c0_i32, %c0_i32_0 : i32, i32
  }
  func.func @transform_11(%arg0: i32, %arg1: i32) -> (i32, i32) {
    %c0_i32 = arith.constant 0 : i32
    %c0_i32_0 = arith.constant 0 : i32
    %c0_i32_1 = arith.constant 0 : i32
    return %c0_i32, %c0_i32_0 : i32, i32
  }
  func.func @transform_12(%arg0: i32, %arg1: i32) -> (i32, i32) {
    %c0_i32 = arith.constant 0 : i32
    %c0_i32_0 = arith.constant 0 : i32
    %c0_i32_1 = arith.constant 0 : i32
    return %c0_i32, %c0_i32_0 : i32, i32
  }
  func.func @transform_13(%arg0: i32, %arg1: i32) -> (i32, i32) {
    %c0_i32 = arith.constant 0 : i32
    %c0_i32_0 = arith.constant 0 : i32
    %c0_i32_1 = arith.constant 0 : i32
    return %c0_i32, %c0_i32_0 : i32, i32
  }
  func.func @transform_14(%arg0: i32, %arg1: i32) -> (i32, i32) {
    %c0_i32 = arith.constant 0 : i32
    %c0_i32_0 = arith.constant 0 : i32
    %c0_i32_1 = arith.constant 0 : i32
    return %c0_i32, %c0_i32_0 : i32, i32
  }
  func.func @transform_15(%arg0: i32, %arg1: i32) -> (i32, i32) {
    %c0_i32 = arith.constant 0 : i32
    %c0_i32_0 = arith.constant 0 : i32
    %c0_i32_1 = arith.constant 0 : i32
    return %c0_i32, %c0_i32_0 : i32, i32
  }
  func.func @transform_16(%arg0: i32, %arg1: i32) -> (i32, i32, i32) {
    %c0_i32 = arith.constant 0 : i32
    %c0_i32_0 = arith.constant 0 : i32
    return %arg0, %arg1, %c0_i32 : i32, i32, i32
  }
}

</mosaic_0001>

<bundles_post_ra>
// kernel: tpu_custom_call.1
= control target key start
LH: loop header
LB: loop body
LE: loop exit
PB: predicated region body
PF: predicated region fallthrough
CT: control target
= control target key end

     0   :  { %s7043_s0 = inlined_call_operand.hbm [shape: f32[2,256,128], index: 0, kind: input, shape index: {}]   ;;  %s7044_s1 = inlined_call_operand.hbm [shape: f32[2,256,128], index: 1, kind: input, shape index: {}]   ;;  %s7045_s2 = inlined_call_operand.hbm [shape: bf16[128,128], index: 2, kind: input, shape index: {}]   ;;  %s7046_s3 = inlined_call_operand.vmem [shape: f32[1,128], index: 3, kind: input, shape index: {}]   ;;  %s7047_s4 = inlined_call_operand.hbm [shape: bf16[128,128], index: 4, kind: input, shape index: {}]   ;;  %s7048_s5 = inlined_call_operand.vmem [shape: f32[1,128], index: 5, kind: input, shape index: {}]   ;;  %s7049_s6 = inlined_call_operand.hbm [shape: bf16[128,128], index: 6, kind: input, shape index: {}]   ;;  %s7050_s7 = inlined_call_operand.vmem [shape: f32[1,128], index: 7, kind: input, shape index: {}]   ;;  %s7051_s8 = inlined_call_operand.hbm [shape: f32[1,128], index: 8, kind: input, shape index: {}]   ;;  %s7052_s9 = inlined_call_operand.vmem [shape: f32[1,128], index: 9, kind: input, shape index: {}]   ;;  %s7053_s10 = inlined_call_operand.hbm [shape: bf16[128,512], index: 10, kind: input, shape index: {}]   ;;  %s7054_s11 = inlined_call_operand.vmem [shape: f32[1,512], index: 11, kind: input, shape index: {}]   ;;  %s7055_s12 = inlined_call_operand.hbm [shape: bf16[512,128], index: 12, kind: input, shape index: {}]   ;;  %s7056_s13 = inlined_call_operand.vmem [shape: f32[1,128], index: 13, kind: input, shape index: {}]   ;;  %s7057_s14 = inlined_call_operand.vmem [shape: f32[1,128], index: 14, kind: input, shape index: {}]   ;;  %s7058_s15 = inlined_call_operand.vmem [shape: f32[1,128], index: 15, kind: input, shape index: {}]   ;;  %s7059_s16 = inlined_call_operand.hbm [shape: f32[2,256,128], index: 16, kind: output, shape index: {}]  }
   0x1   :  { %7065 = sst [smem:[#allocation31_spill]] %s7043_s0 }
   0x2   :  { %7066 = sst [smem:[#allocation32_spill]] %s7045_s2 }
   0x3   :  { %7067 = sst [smem:[#allocation33_spill]] %s7046_s3 }
   0x4   :  { %7068 = sst [smem:[#allocation34_spill]] %s7047_s4 }
   0x5   :  { %7069 = sst [smem:[#allocation35_spill]] %s7048_s5 }
   0x6   :  { %7070 = sst [smem:[#allocation36_spill]] %s7049_s6 }
   0x7   :  { %7071 = sst [smem:[#allocation37_spill]] %s7050_s7 }
   0x8   :  { %7072 = sst [smem:[#allocation38_spill]] %s7051_s8 }
   0x9   :  { %7073 = sst [smem:[#allocation39_spill]] %s7052_s9 }
   0xa   :  { %7074 = sst [smem:[#allocation40_spill]] %s7053_s10 }
   0xb   :  { %7075 = sst [smem:[#allocation41_spill]] %s7054_s11 }
   0xc   :  { %7076 = sst [smem:[#allocation42_spill]] %s7055_s12 }
   0xd   :  { %7077 = sst [smem:[#allocation43_spill]] %s7056_s13 }
   0xe   :  { %7078 = sst [smem:[#allocation44_spill]] %s7057_s14 }
   0xf   :  { %7079 = sst [smem:[#allocation45_spill]] %s7058_s15 }
  0x10   :  { %7080 = sst [smem:[#allocation46_spill]] %s7059_s16 }
  0x11   :  { %21 = vsyncpa [#allocation5], 0 }
  0x12   :  { %23 = vsyncpa [#allocation5 + $0x1], 0 }
  0x13   :  { %24 = vsyncpa [#allocation8], 0 }
  0x14   :  { %26 = vsyncpa [#allocation8 + $0x1], 0 }
  0x15   :  { %27 = vsyncpa [#allocation11], 0 }
  0x16   :  { %28 = vsyncpa [#allocation14], 0 }
  0x17   :  { %29 = vsyncpa [#allocation17], 0 }
  0x18   :  { %30 = vsyncpa [#allocation6], 0 }
  0x19   :  { %32 = vsyncpa [#allocation6 + $0x1], 0  ;;  %s5705_s21 = smov 0   ;;  %s5707_s22 = smov 0  }
  0x1a   :  { %s5709_s23 = smov 0   ;;  %s5711_s24 = smov 0  }
  0x1b   :  { %s5713_s25 = smov 0   ;;  %s5715_s26 = smov 0  }
  0x1c   :  { %s5717_s27 = smov 0   ;;  %s5719_s28 = smov 0  }
  0x1d   :  { %s5721_s29 = smov 0   ;;  %s5723_s30 = smov 0  }
  0x1e   :  { %s5725_s0 = smov 0  }
  0x1f LB: > { %7081 = sst [smem:[#allocation26_spill]] %s5587_s27  ;;  %s5761_s17 = sadd.s32 4294967295, %s5603_s0   ;;  %s5603_s0 = sphi %s5725_s0, %s38_s0   ;;  %s5599_s30 = sphi %s5723_s30, %s7124_s30   ;;  %s5595_s29 = sphi %s5721_s29, %s7115_s29   ;;  %s5591_s28 = sphi %s5719_s28, %s7123_s28   ;;  %s5587_s27 = sphi %s5717_s27, %s7114_s27   ;;  %s5583_s26 = sphi %s5715_s26, %s7122_s26   ;;  %s5579_s25 = sphi %s5713_s25, %s7121_s25   ;;  %s5575_s24 = sphi %s5711_s24, %s7120_s24   ;;  %s5571_s23 = sphi %s5709_s23, %s7119_s23   ;;  %s5567_s22 = sphi %s5707_s22, %s7118_s22   ;;  %s5563_s21 = sphi %s5705_s21, %s7117_s21  }
  0x20   : > { %7082 = sst [smem:[#allocation27_spill]] %s5591_s28  ;;  %p4009_p0 = scmp.ge.s32.totalorder %s5603_s0, 1 }
  0x21   : > { %7083 = sst [smem:[#allocation28_spill]] %s5595_s29  ;;  %p73_p1 = scmp.eq.s32.totalorder %s5761_s17, 0 }
  0x22   : > { %p431_p2 = scmp.lt.s32.totalorder %s5603_s0, 5  ;;  %s7084_s2 = sld [smem:[#allocation32_spill]] }
  0x23   : > { %s5605_s28 = smov [#allocation9]   ;;  %s7087_s4 = sld [smem:[#allocation34_spill]] }
  0x24   : > { %p5769_p3 = pnand %p4009_p0, %p431_p2  ;;  %s444_s15 = sshll.u32 %s5605_s28, 4  ;;  %s445_s15 = int_to_ptr.vmem [resolvable:$true] %s444_s15 }
  0x25   : > { %s5606_s19 = smov 64   ;;  %s5608_s28 = smov [#allocation10]  }
  0x26   : > { %p4894_p4 = pneg %p5769_p3  ;;  %s461_s9 = sshll.u32 %s5608_s28, 4  ;;  %s462_s9 = int_to_ptr.vmem [resolvable:$true] %s461_s9 }
  0x27   : > { %s7088_s8 = sld [smem:[#allocation38_spill]]  ;;  %s5609_s27 = smov [#allocation13]  }
  0x28   : > { %s442_s20 = sshll.u32 %s7084_s2, 4  ;;  %p5777_p5 = pnand %p4894_p4, %p73_p1  ;;  %s443_s20 = int_to_ptr.hbm [resolvable:$true] %s442_s20 }
  0x29   : > { %s459_s18 = sshll.u32 %s7087_s4, 4  ;;  %s5607_s2 = smov 4   ;;  %s460_s18 = int_to_ptr.hbm [resolvable:$true] %s459_s18 }
  0x2a   : > { %4897 = dma.hbm_to_vmem [thread:$0]  (!%p5777_p5), %s443_s20, 1024, %s445_s15, [#allocation8], %s5606_s19, %s5606_s19, %s5607_s2  }
  0x2b   : > { %4900 = dma.hbm_to_vmem [thread:$0]  (!%p5777_p5), %s460_s18, 1024, %s462_s9, [#allocation11], %s5606_s19, %s5606_s19, %s5607_s2  }
  0x2c   : > { %s7089_s6 = sld [smem:[#allocation36_spill]]  ;;  %s496_s15 = sshll.u32 %s5609_s27, 4  ;;  %s497_s15 = int_to_ptr.vmem [resolvable:$true] %s496_s15 }
  0x2d   : > { %s494_s5 = sshll.u32 %s7088_s8, 4  ;;  %s5610_s3 = smov [#allocation12]   ;;  %s495_s5 = int_to_ptr.hbm [resolvable:$true] %s494_s5 }
  0x2e   : > { %4906 = dma.hbm_to_vmem [thread:$0]  (!%p5777_p5), %s495_s5, 16, %s497_s15, [#allocation14]  }
  0x2f   : > { %s478_s7 = sshll.u32 %s5610_s3, 4  ;;  %s7090_s10 = sld [smem:[#allocation40_spill]]  ;;  %s479_s7 = int_to_ptr.vmem [resolvable:$true] %s478_s7 }
  0x30   : > { %s5611_s9 = smov [#allocation15]   ;;  %s7091_s12 = sld [smem:[#allocation42_spill]] }
  0x31   : > { %s510_s5 = sshll.u32 %s5611_s9, 4  ;;  %s5612_s13 = smov 256   ;;  %s511_s5 = int_to_ptr.vmem [resolvable:$true] %s510_s5 }
  0x32   : > { %s476_s4 = sshll.u32 %s7089_s6, 4  ;;  %s5613_s15 = smov 16   ;;  %s477_s4 = int_to_ptr.hbm [resolvable:$true] %s476_s4 }
  0x33   : > { %4903 = dma.hbm_to_vmem [thread:$0]  (!%p5777_p5), %s477_s4, 1024, %s479_s7, [#allocation11], %s5606_s19, %s5606_s19, %s5607_s2  }
  0x34   : > { %s5614_s4 = smov [#allocation16]   ;;  %s4008_s7 = sadd.s32 4294967294, %s5603_s0  }
  0x35   : > { %s508_s8 = sshll.u32 %s7090_s10, 4  ;;  %s527_s3 = sshll.u32 %s5614_s4, 4  ;;  %s509_s8 = int_to_ptr.hbm [resolvable:$true] %s508_s8  ;;  %s528_s3 = int_to_ptr.vmem [resolvable:$true] %s527_s3 }
  0x36   : > { %s525_s11 = sshll.u32 %s7091_s12, 4  ;;  %s47_s20 = sadd.s32 1, %s5595_s29  ;;  %s526_s11 = int_to_ptr.hbm [resolvable:$true] %s525_s11 }
  0x37   : > { %4909 = dma.hbm_to_vmem [thread:$0]  (!%p5777_p5), %s509_s8, 4096, %s511_s5, [#allocation14], %s5612_s13, %s5612_s13, %s5613_s15  }
  0x38   : > { %4912 = dma.hbm_to_vmem [thread:$0]  (!%p5777_p5), %s526_s11, 4096, %s528_s3, [#allocation17], %s5606_s19, %s5606_s19, %s5607_s2  }
  0x39   : > { %p48_p6 = scmp.ge.s32.totalorder %s47_s20, 2  ;;  %s50_s28 = sadd.s32 1, %s5599_s30 }
  0x3a   : > { %s59_s8 = sadd.s32 1, %s5583_s26  ;;  %p66_p7 = scmp.ne.s32.totalorder %s5583_s26, %s5579_s25 }
  0x3b   : > { %s7126_s20 = smov (%p48_p6, %s47_s20), 0  ;;  %s7128_s28 = smov (!%p48_p6, %s50_s28), %s5599_s30 }
  0x3c   : > { %7092 = sst [smem:[#allocation29_spill]] %s7126_s20  ;;  %s55_s9 = ssub.s32 %s5595_s29, %s7126_s20 }
  0x3d   : > { %p67_p8 = scmp.eq.s32.totalorder %s5603_s0, 0  ;;  %p52_p9 = scmp.ge.s32.totalorder %s7128_s28, 2 }
  0x3e   : > { %p72_p10 = scmp.ne.s32.totalorder %s5579_s25, %s5575_s24  ;;  %p418_p12 = scmp.eq.s32.totalorder %s5761_s17, 3 }
  0x3f   : > { %p5836_p11 = por %p67_p8, %p66_p7  ;;  %s7130_s28 = smov (%p52_p9, %s7128_s28), 0 }
  0x40   : > { %7094 = sst [smem:[#allocation30_spill]] %s7130_s28  ;;  %p5845_p13 = por %p73_p1, %p72_p10 }
  0x41   : > { %p5849_p0 = por %p418_p12, %p66_p7  ;;  %s5855_s5 = ssub.s32 %s5599_s30, %s7130_s28 }
  0x42   : > { %p424_p2 = scmp.eq.s32.totalorder %s4008_s7, 3  ;;  %s56_s27 = sor.u32 %s55_s9, %s5855_s5 }
  0x43   : > { %p83_p4 = scmp.eq.s32.totalorder %s5855_s5, 0  ;;  %p57_p5 = scmp.eq.s32.totalorder %s56_s27, 0 }
  0x44   : > { %p5859_p6 = por %p424_p2, %p72_p10  ;;  %p4930_p9 = scmp.lt.s32.totalorder %s5603_s0, 4 }
  0x45   : > { %s550_s11 = sand.u32 1, %s5583_s26   ;;  %s4018_s4 = sshll.u32 %s5595_s29, 4 }
  0x46   : > { %s5866_s13 = scalar_select %p57_p5, %s5583_s26, %s59_s8  }
  0x47   : > { %s4017_s15 = sshll.u32 %s550_s11, 7  ;;  %s4019_s3 = sshll.u32 %s5599_s30, 5 }
  0x48   : > { %s554_s7 = scalar_lea.vmem [#allocation4], %s4017_s15  ;;  %s559_s27 = sadd.s32 %s4019_s3, %s4018_s4 }
  0x49   : > { %s564_s9 = sshll.u32 %s554_s7, 4  ;;  %s4020_s6 = sshll.u32 %s559_s27, 3  ;;  %s565_s9 = int_to_ptr.vmem [resolvable:$true] %s564_s9 }
  0x4a   : > { %p4914_p7 = pnand %p4930_p9, %p5836_p11  ;;  %s7098_s12 = sld [smem:[#allocation31_spill]] }
  0x4b   : > { %s551_s15 = scalar_lea.sflag [#allocation5], %s550_s11  ;;  %s5615_s29 = smov 128  }
  0x4c   : > { %s5616_s7 = smov 8   ;;  %s85_s4 = sadd.s32 1, %s5571_s23 }
  0x4d   : > { %p92_p10 = scmp.ne.s32.totalorder %s5571_s23, %s5567_s22  ;;  %p98_p12 = scmp.ne.s32.totalorder %s5567_s22, %s5563_s21 }
  0x4e   : > { %s5883_s3 = scalar_select %p83_p4, %s5571_s23, %s85_s4  }
  0x4f   : > { %p94_p11 = por %p92_p10, %p67_p8  ;;  %s576_s2 = sand.u32 1, %s5571_s23  }
  0x50   : > { %s561_s28 = scalar_lea.hbm %s7098_s12, %s4020_s6  ;;  %p5892_p2 = por %p98_p12, %p73_p1 }
  0x51   : > { %s562_s20 = sshll.u32 %s561_s28, 4  ;;  %s574_s10 = sand.u32 1, %s5603_s0   ;;  %s563_s20 = int_to_ptr.hbm [resolvable:$true] %s562_s20 }
  0x52   : > { %4916 = dma.hbm_to_vmem [thread:$0]  (!%p4914_p7), %s563_s20, 2048, %s565_s9, %s551_s15, %s5615_s29, %s5615_s29, %s5616_s7  }
  0x53   : > { %s4021_s12 = sshll.u32 %s576_s2, 8  ;;  %s4521_s28 = sshll.u32 %s5599_s30, 8 }
  0x54   : > { %s583_s9 = scalar_lea.hbm %s7044_s1, %s4521_s28  ;;  %s578_s5 = scalar_lea.vmem [#allocation7], %s4021_s12 }
  0x55   : > { %s584_s27 = sshll.u32 %s583_s9, 4  ;;  %s586_s8 = sshll.u32 %s578_s5, 4  ;;  %s585_s27 = int_to_ptr.hbm [resolvable:$true] %s584_s27  ;;  %s587_s8 = int_to_ptr.vmem [resolvable:$true] %s586_s8 }
  0x56   : > { %p4917_p8 = pnand %p4930_p9, %p94_p11  ;;  %s575_s21 = scalar_lea.sflag [#allocation8], %s574_s10 }
  0x57   : > { %598 = sbr.rel (%p5769_p3) target bundleno = 2218 (0x8aa), region = 84  ;;  %s5906_s15 = sand.u32 (!%p5769_p3), 1, %s5579_s25  }
  0x58   : > { %4919 = dma.hbm_to_vmem [thread:$0]  (!%p4917_p8), %s585_s27, 4096, %s587_s8, %s575_s21, %s5615_s29, %s5615_s29, %s5616_s7  }
  0x59   : > { %s4025_s4 = sshll.u32 (!%p5769_p3), %s5906_s15, 7  ;;  %s601_s2 = scalar_lea.sflag (!%p5769_p3), [#allocation5], %s5906_s15 }
  0x5a   : > { %s5910_s28 = scalar_lea.vmem (!%p5769_p3), [#allocation4], %s4025_s4 }
  0x5c   : > { %5534 = dma.done.wait (%p5845_p13), %s601_s2, 2048  }
  0x5d   : > { %5536 = vsyncadd (%p5845_p13), %s601_s2, 4294965248  ;;  %s610_s16 = sand.u32 1, %s5761_s17   ;;  %s612_s29 = sand.u32 1, %s5567_s22  }
  0x5e   : > { %s4026_s7 = sshll.u32 %s612_s29, 8  ;;  %s611_s10 = scalar_lea.sflag [#allocation8], %s610_s16 }
  0x5f   : > { %s5918_s12 = scalar_lea.vmem [#allocation7], %s4026_s7 }
  0x60   : > { %5538 = dma.done.wait (%p5892_p2), %s611_s10, 4096  }
  0x61   : > { %5540 = vsyncadd (%p5892_p2), %s611_s10, 4294963200 }
  0x62   : > { %5542 = dma.done.wait (%p73_p1), [#allocation8], 1024  }
  0x63   : > { %5544 = vsyncadd (%p73_p1), [#allocation8], 4294966272 }
  0x64   : > { %5546 = dma.done.wait (%p73_p1), [#allocation11], 2048  }
  0x65   : > { %5548 = vsyncadd (%p73_p1), [#allocation11], 4294965248 }
  0x66   : > { %5550 = dma.done.wait (%p73_p1), [#allocation14], 4112  }
  0x67   : > { %5552 = vsyncadd (%p73_p1), [#allocation14], 4294963184 }
  0x68   : > { %5554 = dma.done.wait (%p73_p1), [#allocation17], 4096  }
  0x69   : > { %5556 = vsyncadd (%p73_p1), [#allocation17], 4294963200  ;;  %s5940_s14 = scalar_lea.vmem [#allocation18], %s4025_s4  ;;  %s7100_s6 = sld [smem:[#allocation26_spill]] }
  0x6f   : > { %p4034_p3 = scmp.ne.s32.totalorder %s7100_s6, 0 }
  0x70   : > { %s7101_s20 = sld [smem:[#allocation35_spill]] (!%p4034_p3) }
  0x71   : > { %704 = sbr.rel (%p4034_p3) target bundleno = 408 (0x198), region = 120  ;;  %s7102_s5 = sld [smem:[#allocation37_spill]] (!%p4034_p3) }
  0x76   : > { %v4529_v0 = vld [vmem:[#allocation10 + $0x38] sm:$0xff]  ;;  %v4528_v2 = vld [vmem:[#allocation10 + $0x30] sm:$0xff]  ;;  %v4527_v4 = vld [vmem:[#allocation10 + $0x28] sm:$0xff] }
  0x77   : > { %v4537_v1 = vld [vmem:[#allocation12 + $0x38] sm:$0xff]  ;;  %821 = vmatpush.bf16.msra.mxu0 %v4529_v0  ;;  %4832 = vmatpush.bf16.msra.mxu2 %v4529_v0  ;;  %v4536_v3 = vld [vmem:[#allocation12 + $0x30] sm:$0xff]  ;;  %v4535_v5 = vld [vmem:[#allocation12 + $0x28] sm:$0xff] }
  0x78   : > { %978 = vmatpush.bf16.msra.mxu1 %v4537_v1  ;;  %4840 = vmatpush.bf16.msra.mxu3 %v4537_v1  ;;  %v4526_v6 = vld [vmem:[#allocation10 + $0x20] sm:$0xff]  ;;  %v4525_v8 = vld [vmem:[#allocation10 + $0x18] sm:$0xff]  ;;  %v4524_v10 = vld [vmem:[#allocation10 + $0x10] sm:$0xff] }
  0x79   : > { %v4534_v7 = vld [vmem:[#allocation12 + $0x20] sm:$0xff]  ;;  %v4533_v9 = vld [vmem:[#allocation12 + $0x18] sm:$0xff]  ;;  %v4532_v11 = vld [vmem:[#allocation12 + $0x10] sm:$0xff] }
  0x7a   : > { %v4523_v12 = vld [vmem:[#allocation10 + $0x8] sm:$0xff]  ;;  %v4522_v14 = vld [vmem:[#allocation10] sm:$0xff]  ;;  %v707_v22 = vld [vmem:[%s5918_s12 + $0x10] sm:$0xff] }
  0x7b   : > { %822 = vmatpush.bf16.msra.mxu0 %v4528_v2  ;;  %4833 = vmatpush.bf16.msra.mxu2 %v4528_v2  ;;  %v4531_v13 = vld [vmem:[#allocation12 + $0x8] sm:$0xff]  ;;  %v705_v15 = vld [vmem:[%s5918_s12] sm:$0xff]  ;;  %v708_v23 = vld [vmem:[%s5918_s12 + $0x18] sm:$0xff] }
  0x7c   : > { %979 = vmatpush.bf16.msra.mxu1 %v4536_v3  ;;  %4841 = vmatpush.bf16.msra.mxu3 %v4536_v3  ;;  %v706_v16 = vld [vmem:[%s5918_s12 + $0x8] sm:$0xff]  ;;  %v721_v17 = vld [vmem:[%s5918_s12 + $0x80] sm:$0xff]  ;;  %v723_v24 = vld [vmem:[%s5918_s12 + $0x90] sm:$0xff]  ;;  %v738_v26 = vpack.c.bf16 %v708_v23, %v707_v22 }
  0x7d   : > { %v722_v18 = vld [vmem:[%s5918_s12 + $0x88] sm:$0xff]  ;;  %v4530_v19 = vld [vmem:[#allocation12] sm:$0xff]  ;;  %v737_v20 = vpack.c.bf16 %v706_v16, %v705_v15  ;;  %v724_v25 = vld [vmem:[%s5918_s12 + $0x98] sm:$0xff] }
  0x7e   : > { %v745_v21 = vpack.c.bf16 %v722_v18, %v721_v17  ;;  %v746_v27 = vpack.c.bf16 %v724_v25, %v723_v24  ;;  %v709_v28 = vld [vmem:[%s5918_s12 + $0x20] sm:$0xff]  ;;  %v710_v29 = vld [vmem:[%s5918_s12 + $0x28] sm:$0xff]  ;;  %v711_v34 = vld [vmem:[%s5918_s12 + $0x30] sm:$0xff] }
  0x7f   : > { %823 = vmatpush.bf16.msra.mxu0 %v4527_v4  ;;  %4834 = vmatpush.bf16.msra.mxu2 %v4527_v4  ;;  %v725_v30 = vld [vmem:[%s5918_s12 + $0xa0] sm:$0xff]  ;;  %v726_v31 = vld [vmem:[%s5918_s12 + $0xa8] sm:$0xff]  ;;  %v739_v32 = vpack.c.bf16 %v710_v29, %v709_v28  ;;  %v712_v35 = vld [vmem:[%s5918_s12 + $0x38] sm:$0xff] }
  0x80   : > { %980 = vmatpush.bf16.msra.mxu1 %v4535_v5  ;;  %4842 = vmatpush.bf16.msra.mxu3 %v4535_v5  ;;  %v747_v33 = vpack.c.bf16 %v726_v31, %v725_v30  ;;  %v727_v36 = vld [vmem:[%s5918_s12 + $0xb0] sm:$0xff]  ;;  %v728_v37 = vld [vmem:[%s5918_s12 + $0xb8] sm:$0xff]  ;;  %v740_v38 = vpack.c.bf16 %v712_v35, %v711_v34  ;;  %v713_v40 = vld [vmem:[%s5918_s12 + $0x40] sm:$0xff] }
  0x81   : > { %v748_v39 = vpack.c.bf16 %v728_v37, %v727_v36  ;;  %v714_v41 = vld [vmem:[%s5918_s12 + $0x48] sm:$0xff]  ;;  %v729_v42 = vld [vmem:[%s5918_s12 + $0xc0] sm:$0xff]  ;;  %v715_v46 = vld [vmem:[%s5918_s12 + $0x50] sm:$0xff] }
  0x82   : > { %v730_v43 = vld [vmem:[%s5918_s12 + $0xc8] sm:$0xff]  ;;  %v741_v44 = vpack.c.bf16 %v714_v41, %v713_v40  ;;  %v716_v47 = vld [vmem:[%s5918_s12 + $0x58] sm:$0xff]  ;;  %v731_v48 = vld [vmem:[%s5918_s12 + $0xd0] sm:$0xff] }
  0x83   : > { %824 = vmatpush.bf16.msra.mxu0 %v4526_v6  ;;  %4835 = vmatpush.bf16.msra.mxu2 %v4526_v6  ;;  %v749_v45 = vpack.c.bf16 %v730_v43, %v729_v42  ;;  %v732_v49 = vld [vmem:[%s5918_s12 + $0xd8] sm:$0xff]  ;;  %v742_v50 = vpack.c.bf16 %v716_v47, %v715_v46  ;;  %v717_v52 = vld [vmem:[%s5918_s12 + $0x60] sm:$0xff]  ;;  %v718_v53 = vld [vmem:[%s5918_s12 + $0x68] sm:$0xff] }
  0x84   : > { %981 = vmatpush.bf16.msra.mxu1 %v4534_v7  ;;  %4843 = vmatpush.bf16.msra.mxu3 %v4534_v7  ;;  %v750_v51 = vpack.c.bf16 %v732_v49, %v731_v48  ;;  %v733_v54 = vld [vmem:[%s5918_s12 + $0xe0] sm:$0xff]  ;;  %v734_v55 = vld [vmem:[%s5918_s12 + $0xe8] sm:$0xff]  ;;  %v743_v56 = vpack.c.bf16 %v718_v53, %v717_v52  ;;  %v719_v58 = vld [vmem:[%s5918_s12 + $0x70] sm:$0xff] }
  0x85   : > { %v751_v57 = vpack.c.bf16 %v734_v55, %v733_v54  ;;  %v720_v59 = vld [vmem:[%s5918_s12 + $0x78] sm:$0xff]  ;;  %v735_v60 = vld [vmem:[%s5918_s12 + $0xf0] sm:$0xff]  ;;  %v5978_v2 = vld [vmem:[%s7101_s20] ss:$0 sm:$0xff] }
  0x86   : > { %v736_v61 = vld [vmem:[%s5918_s12 + $0xf8] sm:$0xff]  ;;  %v744_v62 = vpack.c.bf16 %v720_v59, %v719_v58  ;;  %v5983_v3 = vld [vmem:[%s7102_s5] ss:$0 sm:$0xff] }
  0x87   : > { %825 = vmatpush.bf16.msra.mxu0 %v4525_v8  ;;  %4836 = vmatpush.bf16.msra.mxu2 %v4525_v8  ;;  %v752_v63 = vpack.c.bf16 %v736_v61, %v735_v60 }
  0x88   : > { %982 = vmatpush.bf16.msra.mxu1 %v4533_v9  ;;  %4844 = vmatpush.bf16.msra.mxu3 %v4533_v9 }
  0x8b   : > { %826 = vmatpush.bf16.msra.mxu0 %v4524_v10  ;;  %4837 = vmatpush.bf16.msra.mxu2 %v4524_v10 }
  0x8c   : > { %983 = vmatpush.bf16.msra.mxu1 %v4532_v11  ;;  %4845 = vmatpush.bf16.msra.mxu3 %v4532_v11 }
  0x8f   : > { %827 = vmatpush.bf16.msra.mxu0 %v4523_v12  ;;  %4838 = vmatpush.bf16.msra.mxu2 %v4523_v12 }
  0x90   : > { %984 = vmatpush.bf16.msra.mxu1 %v4531_v13  ;;  %4846 = vmatpush.bf16.msra.mxu3 %v4531_v13 }
  0x93   : > { %828 = vmatpush.bf16.msra.mxu0 %v4522_v14  ;;  %4839 = vmatpush.bf16.msra.mxu2 %v4522_v14 }
  0x94   : > { %985 = vmatpush.bf16.msra.mxu1 %v4530_v19  ;;  %4847 = vmatpush.bf16.msra.mxu3 %v4530_v19 }
  0x96   : > { %829 = vmatmul.bf16.vlgmr.msra.gmra.mxu0 %v737_v20  ;;  %869 = vmatmul.bf16.vlgmr.msra.gmra.mxu2 %v745_v21 }
  0x97   : > { %986 = vmatmul.bf16.vlgmr.msra.gmra.mxu1 %v737_v20  ;;  %1026 = vmatmul.bf16.vlgmr.msra.gmra.mxu3 %v745_v21 }
  0xa6   : > { %834 = vmatmul.bf16.gmra.mxu0 %v738_v26  ;;  %874 = vmatmul.bf16.gmra.mxu2 %v746_v27 }
  0xa7   : > { %991 = vmatmul.bf16.gmra.mxu1 %v738_v26  ;;  %1031 = vmatmul.bf16.gmra.mxu3 %v746_v27 }
  0xb6   : > { %839 = vmatmul.bf16.gmra.mxu0 %v739_v32  ;;  %879 = vmatmul.bf16.gmra.mxu2 %v747_v33 }
  0xb7   : > { %996 = vmatmul.bf16.gmra.mxu1 %v739_v32  ;;  %1036 = vmatmul.bf16.gmra.mxu3 %v747_v33 }
  0xc6   : > { %844 = vmatmul.bf16.gmra.mxu0 %v740_v38  ;;  %884 = vmatmul.bf16.gmra.mxu2 %v748_v39 }
  0xc7   : > { %1001 = vmatmul.bf16.gmra.mxu1 %v740_v38  ;;  %1041 = vmatmul.bf16.gmra.mxu3 %v748_v39 }
  0xd6   : > { %849 = vmatmul.bf16.gmra.mxu0 %v741_v44  ;;  %889 = vmatmul.bf16.gmra.mxu2 %v749_v45 }
  0xd7   : > { %1006 = vmatmul.bf16.gmra.mxu1 %v741_v44  ;;  %1046 = vmatmul.bf16.gmra.mxu3 %v749_v45 }
  0xe6   : > { %854 = vmatmul.bf16.gmra.mxu0 %v742_v50  ;;  %894 = vmatmul.bf16.gmra.mxu2 %v750_v51 }
  0xe7   : > { %1011 = vmatmul.bf16.gmra.mxu1 %v742_v50  ;;  %1051 = vmatmul.bf16.gmra.mxu3 %v750_v51 }
  0xf6   : > { %859 = vmatmul.bf16.gmra.mxu0 %v743_v56  ;;  %899 = vmatmul.bf16.gmra.mxu2 %v751_v57 }
  0xf7   : > { %1016 = vmatmul.bf16.gmra.mxu1 %v743_v56  ;;  %1056 = vmatmul.bf16.gmra.mxu3 %v751_v57 }
 0x106   : > { %864 = vmatmul.bf16.gmra.mxu0 %v744_v62  ;;  %904 = vmatmul.bf16.gmra.mxu2 %v752_v63 }
 0x107   : > { %1021 = vmatmul.bf16.gmra.mxu1 %v744_v62  ;;  %1061 = vmatmul.bf16.gmra.mxu3 %v752_v63 }
 0x113   : > { %v830_v0 = vpop.f32.mrf.mxu0 }
 0x114   : > { %v987_v1 = vpop.f32.mrf.mxu1  ;;  %v831_v7 = vadd.f32 %v5978_v2, %v830_v0 }
 0x115   : > { %v988_v10 = vadd.f32 %v5983_v3, %v987_v1 }
 0x119   : > { %v870_v4 = vpop.f32.mrf.mxu2 }
 0x11a   : > { %v1027_v5 = vpop.f32.mrf.mxu3  ;;  %v871_v15 = vadd.f32 %v5978_v2, %v870_v4 }
 0x11b   : > { %v832_v6 = vpop.f32.mrf.mxu0  ;;  %v1028_v18 = vadd.f32 %v5983_v3, %v1027_v5 }
 0x11c   : > { %v833_v8 = vadd.f32 %v5978_v2, %v832_v6  ;;  %v989_v9 = vpop.f32.mrf.mxu1 }
 0x11d   : > { %v990_v11 = vadd.f32 %v5983_v3, %v989_v9 }
 0x11e   : > { %v4645_v12 = vpack.c.bf16 %v833_v8, %v831_v7 }
 0x11f   : > { %v4725_v13 = vpack.c.bf16 %v990_v11, %v988_v10 }
 0x120   : > { %4646 = vst [vmem:[#allocation2 + $0x30] sm:$0xff] %v4645_v12  }
 0x121   : > { %4726 = vst [vmem:[#allocation3 + $0x28] sm:$0xff] %v4725_v13   ;;  %v872_v14 = vpop.f32.mrf.mxu2 }
 0x122   : > { %v873_v16 = vadd.f32 %v5978_v2, %v872_v14  ;;  %v1029_v17 = vpop.f32.mrf.mxu3 }
 0x123   : > { %v1030_v19 = vadd.f32 %v5983_v3, %v1029_v17  ;;  %v835_v20 = vpop.f32.mrf.mxu0 }
 0x124   : > { %v4685_v21 = vpack.c.bf16 %v873_v16, %v871_v15  ;;  %v992_v22 = vpop.f32.mrf.mxu1  ;;  %v836_v27 = vadd.f32 %v5978_v2, %v835_v20 }
 0x125   : > { %v4765_v23 = vpack.c.bf16 %v1030_v19, %v1028_v18  ;;  %v993_v30 = vadd.f32 %v5983_v3, %v992_v22 }
 0x126   : > { %4809 = vst [vmem:[#allocation2 + $0x40] sm:$0xff] %v4685_v21  }
 0x127   : > { %4824 = vst [vmem:[#allocation3 + $0x20] sm:$0xff] %v4765_v23  }
 0x129   : > { %v875_v24 = vpop.f32.mrf.mxu2 }
 0x12a   : > { %v1032_v25 = vpop.f32.mrf.mxu3  ;;  %v876_v35 = vadd.f32 %v5978_v2, %v875_v24 }
 0x12b   : > { %v837_v26 = vpop.f32.mrf.mxu0  ;;  %v1033_v38 = vadd.f32 %v5983_v3, %v1032_v25 }
 0x12c   : > { %v838_v28 = vadd.f32 %v5978_v2, %v837_v26  ;;  %v994_v29 = vpop.f32.mrf.mxu1 }
 0x12d   : > { %v995_v31 = vadd.f32 %v5983_v3, %v994_v29 }
 0x12e   : > { %v4650_v32 = vpack.c.bf16 %v838_v28, %v836_v27 }
 0x12f   : > { %v4730_v33 = vpack.c.bf16 %v995_v31, %v993_v30 }
 0x130   : > { %4802 = vst [vmem:[#allocation2] sm:$0xff] %v4650_v32  }
 0x131   : > { %4817 = vst [vmem:[#allocation3 + $0x68] sm:$0xff] %v4730_v33   ;;  %v877_v34 = vpop.f32.mrf.mxu2 }
 0x132   : > { %v878_v36 = vadd.f32 %v5978_v2, %v877_v34  ;;  %v1034_v37 = vpop.f32.mrf.mxu3 }
 0x133   : > { %v1035_v39 = vadd.f32 %v5983_v3, %v1034_v37  ;;  %v840_v40 = vpop.f32.mrf.mxu0 }
 0x134   : > { %v4690_v41 = vpack.c.bf16 %v878_v36, %v876_v35  ;;  %v997_v42 = vpop.f32.mrf.mxu1  ;;  %v841_v47 = vadd.f32 %v5978_v2, %v840_v40 }
 0x135   : > { %v4770_v43 = vpack.c.bf16 %v1035_v39, %v1033_v38  ;;  %v998_v50 = vadd.f32 %v5983_v3, %v997_v42 }
 0x136   : > { %4810 = vst [vmem:[#allocation2 + $0x20] sm:$0xff] %v4690_v41  }
 0x137   : > { %4825 = vst [vmem:[#allocation3 + $0x78] sm:$0xff] %v4770_v43  }
 0x139   : > { %v880_v44 = vpop.f32.mrf.mxu2 }
 0x13a   : > { %v1037_v45 = vpop.f32.mrf.mxu3  ;;  %v881_v55 = vadd.f32 %v5978_v2, %v880_v44 }
 0x13b   : > { %v842_v46 = vpop.f32.mrf.mxu0  ;;  %v1038_v58 = vadd.f32 %v5983_v3, %v1037_v45 }
 0x13c   : > { %v843_v48 = vadd.f32 %v5978_v2, %v842_v46  ;;  %v999_v49 = vpop.f32.mrf.mxu1 }
 0x13d   : > { %v1000_v51 = vadd.f32 %v5983_v3, %v999_v49 }
 0x13e   : > { %v4655_v52 = vpack.c.bf16 %v843_v48, %v841_v47 }
 0x13f   : > { %v4735_v53 = vpack.c.bf16 %v1000_v51, %v998_v50 }
 0x140   : > { %4803 = vst [vmem:[#allocation2 + $0x58] sm:$0xff] %v4655_v52  }
 0x141   : > { %4818 = vst [vmem:[#allocation3 + $0x10] sm:$0xff] %v4735_v53   ;;  %v882_v54 = vpop.f32.mrf.mxu2 }
 0x142   : > { %v883_v56 = vadd.f32 %v5978_v2, %v882_v54  ;;  %v1039_v57 = vpop.f32.mrf.mxu3 }
 0x143   : > { %v1040_v59 = vadd.f32 %v5983_v3, %v1039_v57  ;;  %v845_v60 = vpop.f32.mrf.mxu0 }
 0x144   : > { %v4695_v61 = vpack.c.bf16 %v883_v56, %v881_v55  ;;  %v1002_v62 = vpop.f32.mrf.mxu1  ;;  %v846_v5 = vadd.f32 %v5978_v2, %v845_v60 }
 0x145   : > { %v4775_v63 = vpack.c.bf16 %v1040_v59, %v1038_v58  ;;  %v1003_v8 = vadd.f32 %v5983_v3, %v1002_v62 }
 0x146   : > { %4811 = vst [vmem:[#allocation2 + $0x10] sm:$0xff] %v4695_v61  }
 0x147   : > { %4826 = vst [vmem:[#allocation3 + $0x18] sm:$0xff] %v4775_v63  }
 0x149   : > { %v885_v0 = vpop.f32.mrf.mxu2 }
 0x14a   : > { %v1042_v1 = vpop.f32.mrf.mxu3  ;;  %v886_v13 = vadd.f32 %v5978_v2, %v885_v0 }
 0x14b   : > { %v847_v4 = vpop.f32.mrf.mxu0  ;;  %v1043_v16 = vadd.f32 %v5983_v3, %v1042_v1 }
 0x14c   : > { %v848_v6 = vadd.f32 %v5978_v2, %v847_v4  ;;  %v1004_v7 = vpop.f32.mrf.mxu1 }
 0x14d   : > { %v1005_v9 = vadd.f32 %v5983_v3, %v1004_v7 }
 0x14e   : > { %v4660_v10 = vpack.c.bf16 %v848_v6, %v846_v5 }
 0x14f   : > { %v4740_v11 = vpack.c.bf16 %v1005_v9, %v1003_v8 }
 0x150   : > { %4804 = vst [vmem:[#allocation2 + $0x18] sm:$0xff] %v4660_v10  }
 0x151   : > { %4819 = vst [vmem:[#allocation3 + $0x40] sm:$0xff] %v4740_v11   ;;  %v887_v12 = vpop.f32.mrf.mxu2 }
 0x152   : > { %v888_v14 = vadd.f32 %v5978_v2, %v887_v12  ;;  %v1044_v15 = vpop.f32.mrf.mxu3 }
 0x153   : > { %v1045_v17 = vadd.f32 %v5983_v3, %v1044_v15  ;;  %v850_v18 = vpop.f32.mrf.mxu0 }
 0x154   : > { %v4700_v19 = vpack.c.bf16 %v888_v14, %v886_v13  ;;  %v1007_v20 = vpop.f32.mrf.mxu1  ;;  %v851_v25 = vadd.f32 %v5978_v2, %v850_v18 }
 0x155   : > { %v4780_v21 = vpack.c.bf16 %v1045_v17, %v1043_v16  ;;  %v1008_v28 = vadd.f32 %v5983_v3, %v1007_v20 }
 0x156   : > { %4812 = vst [vmem:[#allocation2 + $0x38] sm:$0xff] %v4700_v19  }
 0x157   : > { %4827 = vst [vmem:[#allocation3 + $0x58] sm:$0xff] %v4780_v21  }
 0x159   : > { %v890_v22 = vpop.f32.mrf.mxu2 }
 0x15a   : > { %v1047_v23 = vpop.f32.mrf.mxu3  ;;  %v891_v33 = vadd.f32 %v5978_v2, %v890_v22 }
 0x15b   : > { %v852_v24 = vpop.f32.mrf.mxu0  ;;  %v1048_v36 = vadd.f32 %v5983_v3, %v1047_v23 }
 0x15c   : > { %v853_v26 = vadd.f32 %v5978_v2, %v852_v24  ;;  %v1009_v27 = vpop.f32.mrf.mxu1 }
 0x15d   : > { %v1010_v29 = vadd.f32 %v5983_v3, %v1009_v27 }
 0x15e   : > { %v4665_v30 = vpack.c.bf16 %v853_v26, %v851_v25 }
 0x15f   : > { %v4745_v31 = vpack.c.bf16 %v1010_v29, %v1008_v28 }
 0x160   : > { %4805 = vst [vmem:[#allocation2 + $0x50] sm:$0xff] %v4665_v30  }
 0x161   : > { %4820 = vst [vmem:[#allocation3 + $0x48] sm:$0xff] %v4745_v31   ;;  %v892_v32 = vpop.f32.mrf.mxu2 }
 0x162   : > { %v893_v34 = vadd.f32 %v5978_v2, %v892_v32  ;;  %v1049_v35 = vpop.f32.mrf.mxu3 }
 0x163   : > { %v1050_v37 = vadd.f32 %v5983_v3, %v1049_v35  ;;  %v855_v38 = vpop.f32.mrf.mxu0 }
 0x164   : > { %v4705_v39 = vpack.c.bf16 %v893_v34, %v891_v33  ;;  %v1012_v40 = vpop.f32.mrf.mxu1  ;;  %v856_v45 = vadd.f32 %v5978_v2, %v855_v38 }
 0x165   : > { %v4785_v41 = vpack.c.bf16 %v1050_v37, %v1048_v36  ;;  %v1013_v48 = vadd.f32 %v5983_v3, %v1012_v40 }
 0x166   : > { %4813 = vst [vmem:[#allocation2 + $0x60] sm:$0xff] %v4705_v39  }
 0x167   : > { %4828 = vst [vmem:[#allocation3] sm:$0xff] %v4785_v41  }
 0x169   : > { %v895_v42 = vpop.f32.mrf.mxu2 }
 0x16a   : > { %v1052_v43 = vpop.f32.mrf.mxu3  ;;  %v896_v53 = vadd.f32 %v5978_v2, %v895_v42 }
 0x16b   : > { %v857_v44 = vpop.f32.mrf.mxu0  ;;  %v1053_v56 = vadd.f32 %v5983_v3, %v1052_v43 }
 0x16c   : > { %v858_v46 = vadd.f32 %v5978_v2, %v857_v44  ;;  %v1014_v47 = vpop.f32.mrf.mxu1 }
 0x16d   : > { %v1015_v49 = vadd.f32 %v5983_v3, %v1014_v47 }
 0x16e   : > { %v4670_v50 = vpack.c.bf16 %v858_v46, %v856_v45 }
 0x16f   : > { %v4750_v51 = vpack.c.bf16 %v1015_v49, %v1013_v48 }
 0x170   : > { %4806 = vst [vmem:[#allocation2 + $0x68] sm:$0xff] %v4670_v50  }
 0x171   : > { %4821 = vst [vmem:[#allocation3 + $0x30] sm:$0xff] %v4750_v51   ;;  %v897_v52 = vpop.f32.mrf.mxu2 }
 0x172   : > { %v898_v54 = vadd.f32 %v5978_v2, %v897_v52  ;;  %v1054_v55 = vpop.f32.mrf.mxu3 }
 0x173   : > { %v1055_v57 = vadd.f32 %v5983_v3, %v1054_v55  ;;  %v860_v58 = vpop.f32.mrf.mxu0 }
 0x174   : > { %v4710_v59 = vpack.c.bf16 %v898_v54, %v896_v53  ;;  %v1017_v60 = vpop.f32.mrf.mxu1  ;;  %v861_v1 = vadd.f32 %v5978_v2, %v860_v58 }
 0x175   : > { %v4790_v61 = vpack.c.bf16 %v1055_v57, %v1053_v56  ;;  %v1018_v6 = vadd.f32 %v5983_v3, %v1017_v60 }
 0x176   : > { %4814 = vst [vmem:[#allocation2 + $0x70] sm:$0xff] %v4710_v59  }
 0x177   : > { %4829 = vst [vmem:[#allocation3 + $0x8] sm:$0xff] %v4790_v61  }
 0x179   : > { %v900_v62 = vpop.f32.mrf.mxu2 }
 0x17a   : > { %v1057_v63 = vpop.f32.mrf.mxu3  ;;  %v901_v11 = vadd.f32 %v5978_v2, %v900_v62 }
 0x17b   : > { %v862_v0 = vpop.f32.mrf.mxu0  ;;  %v1058_v14 = vadd.f32 %v5983_v3, %v1057_v63 }
 0x17c   : > { %v863_v4 = vadd.f32 %v5978_v2, %v862_v0  ;;  %v1019_v5 = vpop.f32.mrf.mxu1 }
 0x17d   : > { %v1020_v7 = vadd.f32 %v5983_v3, %v1019_v5 }
 0x17e   : > { %v4675_v8 = vpack.c.bf16 %v863_v4, %v861_v1 }
 0x17f   : > { %v4755_v9 = vpack.c.bf16 %v1020_v7, %v1018_v6 }
 0x180   : > { %4807 = vst [vmem:[#allocation2 + $0x8] sm:$0xff] %v4675_v8  }
 0x181   : > { %4822 = vst [vmem:[#allocation3 + $0x70] sm:$0xff] %v4755_v9   ;;  %v902_v10 = vpop.f32.mrf.mxu2 }
 0x182   : > { %v903_v12 = vadd.f32 %v5978_v2, %v902_v10  ;;  %v1059_v13 = vpop.f32.mrf.mxu3 }
 0x183   : > { %v1060_v15 = vadd.f32 %v5983_v3, %v1059_v13  ;;  %v865_v16 = vpop.f32.mrf.mxu0 }
 0x184   : > { %v4715_v17 = vpack.c.bf16 %v903_v12, %v901_v11  ;;  %v1022_v18 = vpop.f32.mrf.mxu1  ;;  %v866_v23 = vadd.f32 %v5978_v2, %v865_v16 }
 0x185   : > { %v4795_v19 = vpack.c.bf16 %v1060_v15, %v1058_v14  ;;  %v1023_v26 = vadd.f32 %v5983_v3, %v1022_v18 }
 0x186   : > { %4815 = vst [vmem:[#allocation2 + $0x78] sm:$0xff] %v4715_v17  }
 0x187   : > { %4830 = vst [vmem:[#allocation3 + $0x60] sm:$0xff] %v4795_v19  }
 0x189   : > { %v905_v20 = vpop.f32.mrf.mxu2 }
 0x18a   : > { %v1062_v21 = vpop.f32.mrf.mxu3  ;;  %v906_v31 = vadd.f32 %v5978_v2, %v905_v20 }
 0x18b   : > { %v867_v22 = vpop.f32.mrf.mxu0  ;;  %v1063_v34 = vadd.f32 %v5983_v3, %v1062_v21 }
 0x18c   : > { %v868_v24 = vadd.f32 %v5978_v2, %v867_v22  ;;  %v1024_v25 = vpop.f32.mrf.mxu1 }
 0x18d   : > { %v1025_v27 = vadd.f32 %v5983_v3, %v1024_v25 }
 0x18e   : > { %v4680_v28 = vpack.c.bf16 %v868_v24, %v866_v23 }
 0x18f   : > { %v4760_v29 = vpack.c.bf16 %v1025_v27, %v1023_v26 }
 0x190   : > { %4808 = vst [vmem:[#allocation2 + $0x48] sm:$0xff] %v4680_v28  }
 0x191   : > { %4823 = vst [vmem:[#allocation3 + $0x38] sm:$0xff] %v4760_v29   ;;  %v907_v30 = vpop.f32.mrf.mxu2 }
 0x192   : > { %v908_v32 = vadd.f32 %v5978_v2, %v907_v30  ;;  %v1064_v33 = vpop.f32.mrf.mxu3 }
 0x193   : > { %v1065_v35 = vadd.f32 %v5983_v3, %v1064_v33 }
 0x194   : > { %v4720_v36 = vpack.c.bf16 %v908_v32, %v906_v31 }
 0x195   : > { %v4800_v37 = vpack.c.bf16 %v1065_v35, %v1063_v34 }
 0x196   : > { %4816 = vst [vmem:[#allocation2 + $0x28] sm:$0xff] %v4720_v36  }
 0x197   : > { %4831 = vst [vmem:[#allocation3 + $0x50] sm:$0xff] %v4800_v37  }
 0x198 PF: > { %v4545_v38 = vld [vmem:[#allocation9 + $0x38] sm:$0xff]  ;;  %v4544_v39 = vld [vmem:[#allocation9 + $0x30] sm:$0xff]  ;;  %v4543_v40 = vld [vmem:[#allocation9 + $0x28] sm:$0xff]  ;;  %s7103_s4 = sld [smem:[#allocation33_spill]]  ;;  %s3834_s9 = sshll.u32 %s5940_s14, 4  ;;  %s3835_s9 = int_to_ptr.vmem [resolvable:$true] %s3834_s9 }
 0x199   : > { %1287 = vmatpush.bf16.msra.mxu0 %v4545_v38  ;;  %4848 = vmatpush.bf16.msra.mxu1 %v4545_v38  ;;  %v4542_v2 = vld [vmem:[#allocation9 + $0x20] sm:$0xff]  ;;  %v4541_v3 = vld [vmem:[#allocation9 + $0x18] sm:$0xff]  ;;  %v4540_v41 = vld [vmem:[#allocation9 + $0x10] sm:$0xff]  ;;  %s7104_s29 = sld [smem:[#allocation39_spill]] }
 0x19a   : > { %4849 = vmatpush.bf16.msra.mxu3 %v4545_v38  ;;  %v4539_v42 = vld [vmem:[#allocation9 + $0x8] sm:$0xff]  ;;  %v4538_v43 = vld [vmem:[#allocation9] sm:$0xff]  ;;  %v1201_v47 = vld [vmem:[%s5910_s28 + $0x30] sm:$0xff]  ;;  %s7107_s10 = sld [smem:[#allocation41_spill]] }
 0x19b   : > { %v6050_v44 = vld [vmem:[%s5910_s28] sm:$0xff]  ;;  %v6053_v45 = vld [vmem:[%s5910_s28 + $0x8] sm:$0xff]  ;;  %v1202_v48 = vld [vmem:[%s5910_s28 + $0x38] sm:$0xff]  ;;  %s7108_s20 = sld [smem:[#allocation43_spill]] }
 0x19c   : > { %v1211_v46 = vpack.c.bf16 %v6053_v45, %v6050_v44  ;;  %v1214_v49 = vpack.c.bf16 %v1202_v48, %v1201_v47  ;;  %v4553_v50 = vld [vmem:[#allocation2 + $0x48] sm:$0xff]  ;;  %v4560_v52 = vld [vmem:[#allocation2 + $0x78] sm:$0xff]  ;;  %v6060_v54 = vld [vmem:[%s5910_s28 + $0x10] sm:$0xff]  ;;  %s7109_s5 = sld [smem:[#allocation44_spill]] }
 0x19d   : > { %1288 = vmatpush.bf16.msra.mxu0 %v4544_v39  ;;  %4850 = vmatpush.bf16.msra.mxu1 %v4544_v39  ;;  %v4561_v51 = vld [vmem:[#allocation2 + $0x28] sm:$0xff]  ;;  %v6063_v55 = vld [vmem:[%s5910_s28 + $0x18] sm:$0xff]  ;;  %v1203_v57 = vld [vmem:[%s5910_s28 + $0x40] sm:$0xff]  ;;  %s7111_s2 = sld [smem:[#allocation26_spill]] }
 0x19e   : > { %4851 = vmatpush.bf16.msra.mxu3 %v4544_v39  ;;  %1537 = vmatpush.bf16.xpose.msra.mxu2 %v4561_v51  ;;  %v4552_v53 = vld [vmem:[#allocation2 + $0x8] sm:$0xff]  ;;  %v1212_v56 = vpack.c.bf16 %v6063_v55, %v6060_v54  ;;  %v4559_v60 = vld [vmem:[#allocation2 + $0x70] sm:$0xff]  ;;  %v4558_v62 = vld [vmem:[#allocation2 + $0x60] sm:$0xff]  ;;  %s7112_s16 = sld [smem:[#allocation27_spill]] }
 0x19f   : > { %v1204_v58 = vld [vmem:[%s5910_s28 + $0x48] sm:$0xff]  ;;  %v4550_v63 = vld [vmem:[#allocation2 + $0x50] sm:$0xff]  ;;  %v6070_v0 = vld [vmem:[%s5910_s28 + $0x20] sm:$0xff]  ;;  %s7113_s11 = sld [smem:[#allocation46_spill]] }
 0x1a0   : > { %v1215_v59 = vpack.c.bf16 %v1204_v58, %v1203_v57  ;;  %v4551_v61 = vld [vmem:[#allocation2 + $0x68] sm:$0xff]  ;;  %v1205_v5 = vld [vmem:[%s5910_s28 + $0x50] sm:$0xff]  ;;  %v1206_v6 = vld [vmem:[%s5910_s28 + $0x58] sm:$0xff] }
 0x1a1   : > { %1289 = vmatpush.bf16.msra.mxu0 %v4543_v40  ;;  %4852 = vmatpush.bf16.msra.mxu1 %v4543_v40  ;;  %v6073_v1 = vld [vmem:[%s5910_s28 + $0x28] sm:$0xff]  ;;  %v1216_v7 = vpack.c.bf16 %v1206_v6, %v1205_v5  ;;  %v4557_v8 = vld [vmem:[#allocation2 + $0x38] sm:$0xff]  ;;  %v4556_v10 = vld [vmem:[#allocation2 + $0x10] sm:$0xff] }
 0x1a2   : > { %4853 = vmatpush.bf16.msra.mxu3 %v4543_v40  ;;  %v1213_v4 = vpack.c.bf16 %v6073_v1, %v6070_v0  ;;  %v4549_v9 = vld [vmem:[#allocation2 + $0x18] sm:$0xff]  ;;  %v4547_v12 = vld [vmem:[#allocation2] sm:$0xff]  ;;  %v4546_v14 = vld [vmem:[#allocation2 + $0x30] sm:$0xff] }
 0x1a3   : > { %v4548_v11 = vld [vmem:[#allocation2 + $0x58] sm:$0xff]  ;;  %v4555_v13 = vld [vmem:[#allocation2 + $0x20] sm:$0xff]  ;;  %v1208_v17 = vld [vmem:[%s5910_s28 + $0x68] sm:$0xff] }
 0x1a4   : > { %v4554_v15 = vld [vmem:[#allocation2 + $0x40] sm:$0xff]  ;;  %v1209_v26 = vld [vmem:[%s5910_s28 + $0x70] sm:$0xff]  ;;  %v1210_v27 = vld [vmem:[%s5910_s28 + $0x78] sm:$0xff] }
 0x1a5   : > { %1290 = vmatpush.bf16.msra.mxu0 %v4542_v2  ;;  %4854 = vmatpush.bf16.msra.mxu1 %v4542_v2  ;;  %v1207_v16 = vld [vmem:[%s5910_s28 + $0x60] sm:$0xff]  ;;  %v1218_v28 = vpack.c.bf16 %v1210_v27, %v1209_v26 }
 0x1a6   : > { %4855 = vmatpush.bf16.msra.mxu3 %v4542_v2  ;;  %1538 = vmatpush.bf16.xpose.msra.mxu2 %v4560_v52  ;;  %v1217_v18 = vpack.c.bf16 %v1208_v17, %v1207_v16  ;;  %v6084_v20 = vld [vmem:[%s7103_s4] ss:$0 sm:$0xff]  ;;  %s7110_s4 = sld [smem:[#allocation45_spill]] }
 0x1a9   : > { %1291 = vmatpush.bf16.msra.mxu0 %v4541_v3  ;;  %4856 = vmatpush.bf16.msra.mxu1 %v4541_v3 }
 0x1aa   : > { %4857 = vmatpush.bf16.msra.mxu3 %v4541_v3 }
 0x1ad   : > { %1292 = vmatpush.bf16.msra.mxu0 %v4540_v41  ;;  %4858 = vmatpush.bf16.msra.mxu1 %v4540_v41 }
 0x1ae   : > { %4859 = vmatpush.bf16.msra.mxu3 %v4540_v41  ;;  %1539 = vmatpush.bf16.xpose.msra.mxu2 %v4559_v60 }
 0x1b1   : > { %1293 = vmatpush.bf16.msra.mxu0 %v4539_v42  ;;  %4860 = vmatpush.bf16.msra.mxu1 %v4539_v42 }
 0x1b2   : > { %4861 = vmatpush.bf16.msra.mxu3 %v4539_v42 }
 0x1b5   : > { %1294 = vmatpush.bf16.msra.mxu0 %v4538_v43  ;;  %4862 = vmatpush.bf16.msra.mxu1 %v4538_v43 }
 0x1b6   : > { %4863 = vmatpush.bf16.msra.mxu3 %v4538_v43  ;;  %1540 = vmatpush.bf16.xpose.msra.mxu2 %v4558_v62 }
 0x1b8   : > { %1295 = vmatmul.bf16.vlgmr.msra.gmra.mxu0 %v1211_v46  ;;  %1310 = vmatmul.bf16.vlgmr.msra.gmra.mxu1 %v1214_v49 }
 0x1b9   : > { %1488 = vmatpush.bf16.xpose.msrb.mxu1 %v4553_v50  ;;  %1325 = vmatmul.bf16.vlgmr.msra.gmra.mxu3 %v1217_v18 }
 0x1be   : > { %1541 = vmatpush.bf16.xpose.msra.mxu2 %v4557_v8 }
 0x1c1   : > { %1489 = vmatpush.bf16.xpose.msrb.mxu1 %v4552_v53 }
 0x1c6   : > { %1542 = vmatpush.bf16.xpose.msra.mxu2 %v4556_v10 }
 0x1c8   : > { %1300 = vmatmul.bf16.gmra.mxu0 %v1212_v56  ;;  %1315 = vmatmul.bf16.gmra.mxu1 %v1215_v59 }
 0x1c9   : > { %1490 = vmatpush.bf16.xpose.msrb.mxu1 %v4551_v61  ;;  %1330 = vmatmul.bf16.gmra.mxu3 %v1218_v28 }
 0x1ce   : > { %1543 = vmatpush.bf16.xpose.msra.mxu2 %v4555_v13 }
 0x1d1   : > { %1491 = vmatpush.bf16.xpose.msrb.mxu1 %v4550_v63 }
 0x1d6   : > { %1544 = vmatpush.bf16.xpose.msra.mxu2 %v4554_v15 }
 0x1d8   : > { %1305 = vmatmul.bf16.gmra.mxu0 %v1213_v4  ;;  %1320 = vmatmul.bf16.gmra.mxu1 %v1216_v7 }
 0x1d9   : > { %1492 = vmatpush.bf16.xpose.msrb.mxu1 %v4549_v9 }
 0x1e1   : > { %1493 = vmatpush.bf16.xpose.msrb.mxu1 %v4548_v11 }
 0x1e9   : > { %1494 = vmatpush.bf16.xpose.msrb.mxu1 %v4547_v12 }
 0x1f1   : > { %1495 = vmatpush.bf16.xpose.msrb.mxu1 %v4546_v14 }
 0x235   : > { %v1296_v19 = vpop.f32.mrf.mxu0  ;;  %v1311_v38 = vpop.f32.mrf.mxu1 }
 0x236   : > { %v1297_v21 = vadd.f32 %v6084_v20, %v1296_v19  ;;  %v1312_v46 = vadd.f32 %v6084_v20, %v1311_v38 }
 0x238   : > { %v1336_v24 = vmul.f32 0.088388346, %v1297_v21  ;;  %v1342_v49 = vmul.f32 0.088388346, %v1312_v46 }
 0x23c   : > { %v1326_v7 = vpop.f32.mrf.mxu3 }
 0x23d   : > { %v1298_v22 = vpop.f32.mrf.mxu0  ;;  %v1313_v41 = vpop.f32.mrf.mxu1  ;;  %v1327_v8 = vadd.f32 %v6084_v20, %v1326_v7 }
 0x23e   : > { %v1299_v23 = vadd.f32 %v6084_v20, %v1298_v22  ;;  %v1314_v47 = vadd.f32 %v6084_v20, %v1313_v41 }
 0x23f   : > { %v1348_v10 = vmul.f32 0.088388346, %v1327_v8 }
 0x240   : > { %v1337_v25 = vmul.f32 0.088388346, %v1299_v23  ;;  %v1343_v50 = vmul.f32 0.088388346, %v1314_v47 }
 0x242   : > { %v1352_v29 = vpack.c.bf16 %v1337_v25, %v1336_v24  ;;  %v1355_v51 = vpack.c.bf16 %v1343_v50, %v1342_v49 }
 0x244   : > { %1496 = vmatmul.bf16.vlgmr.msrb.gmra.mxu1 %v1352_v29  ;;  %1545 = vmatmul.bf16.vlgmr.msra.gmra.mxu2 %v1352_v29  ;;  %v1328_v9 = vpop.f32.mrf.mxu3 }
 0x245   : > { %v1301_v30 = vpop.f32.mrf.mxu0  ;;  %v1316_v48 = vpop.f32.mrf.mxu1  ;;  %v1329_v11 = vadd.f32 %v6084_v20, %v1328_v9 }
 0x246   : > { %v1302_v31 = vadd.f32 %v6084_v20, %v1301_v30  ;;  %v1317_v53 = vadd.f32 %v6084_v20, %v1316_v48 }
 0x247   : > { %v1349_v13 = vmul.f32 0.088388346, %v1329_v11 }
 0x248   : > { %v1338_v33 = vmul.f32 0.088388346, %v1302_v31  ;;  %v1344_v58 = vmul.f32 0.088388346, %v1317_v53 }
 0x249   : > { %v1358_v14 = vpack.c.bf16 %v1349_v13, %v1348_v10 }
 0x24c   : > { %v1331_v15 = vpop.f32.mrf.mxu3 }
 0x24d   : > { %v1303_v32 = vpop.f32.mrf.mxu0  ;;  %v1318_v52 = vpop.f32.mrf.mxu1  ;;  %v1332_v19 = vadd.f32 %v6084_v20, %v1331_v15 }
 0x24e   : > { %v1304_v34 = vadd.f32 %v6084_v20, %v1303_v32  ;;  %v1319_v56 = vadd.f32 %v6084_v20, %v1318_v52 }
 0x24f   : > { %v1350_v23 = vmul.f32 0.088388346, %v1332_v19 }
 0x250   : > { %v1339_v35 = vmul.f32 0.088388346, %v1304_v34  ;;  %v1345_v59 = vmul.f32 0.088388346, %v1319_v56 }
 0x252   : > { %v1353_v36 = vpack.c.bf16 %v1339_v35, %v1338_v33  ;;  %v1356_v60 = vpack.c.bf16 %v1345_v59, %v1344_v58 }
 0x254   : > { %1550 = vmatmul.bf16.gmra.mxu2 %v1353_v36  ;;  %1501 = vmatmul.bf16.gmra.mxu1 %v1353_v36  ;;  %v1333_v21 = vpop.f32.mrf.mxu3 }
 0x255   : > { %v1306_v37 = vpop.f32.mrf.mxu0  ;;  %v1321_v57 = vpop.f32.mrf.mxu1  ;;  %v1334_v24 = vadd.f32 %v6084_v20, %v1333_v21 }
 0x256   : > { %v1307_v39 = vadd.f32 %v6084_v20, %v1306_v37  ;;  %v1322_v62 = vadd.f32 %v6084_v20, %v1321_v57 }
 0x257   : > { %v1351_v27 = vmul.f32 0.088388346, %v1334_v24 }
 0x258   : > { %v1340_v2 = vmul.f32 0.088388346, %v1307_v39  ;;  %v1346_v4 = vmul.f32 0.088388346, %v1322_v62 }
 0x259   : > { %v1359_v28 = vpack.c.bf16 %v1351_v27, %v1350_v23 }
 0x25d   : > { %v1308_v40 = vpop.f32.mrf.mxu0  ;;  %v1323_v61 = vpop.f32.mrf.mxu1 }
 0x25e   : > { %v1309_v3 = vadd.f32 %v6084_v20, %v1308_v40  ;;  %v1324_v63 = vadd.f32 %v6084_v20, %v1323_v61 }
 0x260   : > { %v1341_v42 = vmul.f32 0.088388346, %v1309_v3  ;;  %v1347_v5 = vmul.f32 0.088388346, %v1324_v63 }
 0x262   : > { %v1354_v43 = vpack.c.bf16 %v1341_v42, %v1340_v2  ;;  %v1357_v6 = vpack.c.bf16 %v1347_v5, %v1346_v4 }
 0x264   : > { %1555 = vmatmul.bf16.gmra.mxu2 %v1354_v43  ;;  %1506 = vmatmul.bf16.gmra.mxu1 %v1354_v43 }
 0x274   : > { %1560 = vmatmul.bf16.gmra.mxu2 %v1355_v51  ;;  %1511 = vmatmul.bf16.gmra.mxu1 %v1355_v51 }
 0x284   : > { %1565 = vmatmul.bf16.gmra.mxu2 %v1356_v60  ;;  %1516 = vmatmul.bf16.gmra.mxu1 %v1356_v60 }
 0x294   : > { %1570 = vmatmul.bf16.gmra.mxu2 %v1357_v6  ;;  %1521 = vmatmul.bf16.gmra.mxu1 %v1357_v6 }
 0x2a4   : > { %1575 = vmatmul.bf16.gmra.mxu2 %v1358_v14  ;;  %1526 = vmatmul.bf16.gmra.mxu1 %v1358_v14 }
 0x2b4   : > { %1580 = vmatmul.bf16.gmra.mxu2 %v1359_v28  ;;  %1531 = vmatmul.bf16.gmra.mxu1 %v1359_v28 }
 0x2c1   : > { %v1497_v12 = vpop.f32.mrf.mxu1 }
 0x2c7   : > { %v1546_v16 = vpop.f32.mrf.mxu2 }
 0x2c8   : > { %v1586_v17 = vmax.f32 %v1497_v12, %v1546_v16 }
 0x2c9   : > { %v1499_v18 = vpop.f32.mrf.mxu1 }
 0x2ca   : > { %1587 = vmax.xlane.f32.xlu0 %v1586_v17 }
 0x2cf   : > { %v1548_v22 = vpop.f32.mrf.mxu2 }
 0x2d0   : > { %v1589_v25 = vmax.f32 %v1499_v18, %v1548_v22 }
 0x2d1   : > { %v1502_v26 = vpop.f32.mrf.mxu1 }
 0x2d2   : > { %1590 = vmax.xlane.f32.xlu0 %v1589_v25 }
 0x2d7   : > { %v1551_v29 = vpop.f32.mrf.mxu2 }
 0x2d8   : > { %v1592_v30 = vmax.f32 %v1502_v26, %v1551_v29 }
 0x2d9   : > { %v6104_v31 = vpop.f32.mrf.mxu1 }
 0x2da   : > { %1593 = vmax.xlane.f32.xlu1 %v1592_v30 }
 0x2df   : > { %v6106_v32 = vpop.f32.mrf.mxu2 }
 0x2e0   : > { %v1595_v33 = vmax.f32 %v6104_v31, %v6106_v32 }
 0x2e1   : > { %v6110_v34 = vpop.f32.mrf.mxu1 }
 0x2e2   : > { %1596 = vmax.xlane.f32.xlu1 %v1595_v33 }
 0x2e7   : > { %v6112_v20 = vpop.f32.mrf.mxu2 }
 0x2e8   : > { %v1598_v35 = vmax.f32 %v6110_v34, %v6112_v20 }
 0x2e9   : > { %v6116_v36 = vpop.f32.mrf.mxu1 }
 0x2ea   : > { %1599 = vmax.xlane.f32.xlu2 %v1598_v35 }
 0x2ef   : > { %v6118_v37 = vpop.f32.mrf.mxu2 }
 0x2f0   : > { %v1601_v38 = vmax.f32 %v6116_v36, %v6118_v37 }
 0x2f1   : > { %v6122_v39 = vpop.f32.mrf.mxu1 }
 0x2f2   : > { %1602 = vmax.xlane.f32.xlu2 %v1601_v38 }
 0x2f7   : > { %v6124_v40 = vpop.f32.mrf.mxu2 }
 0x2f8   : > { %v1604_v2 = vmax.f32 %v6122_v39, %v6124_v40 }
 0x2f9   : > { %v6128_v3 = vpop.f32.mrf.mxu1 }
 0x2fa   : > { %1605 = vmax.xlane.f32.xlu0 %v1604_v2 }
 0x2ff   : > { %v6130_v41 = vpop.f32.mrf.mxu2 }
 0x300   : > { %v1607_v42 = vmax.f32 %v6128_v3, %v6130_v41 }
 0x301   : > { %v6134_v43 = vpop.f32.mrf.mxu1 }
 0x302   : > { %1608 = vmax.xlane.f32.xlu1 %v1607_v42 }
 0x307   : > { %v6136_v46 = vpop.f32.mrf.mxu2 }
 0x308   : > { %v1610_v47 = vmax.f32 %v6134_v43, %v6136_v46 }
 0x309   : > { %v6140_v53 = vpop.f32.mrf.mxu1 }
 0x30a   : > { %1611 = vmax.xlane.f32.xlu1 %v1610_v47 }
 0x30f   : > { %v6142_v56 = vpop.f32.mrf.mxu2 }
 0x310   : > { %v1613_v15 = vmax.f32 %v6140_v53, %v6142_v56 }
 0x311   : > { %v6150_v5 = vpop.f32.mrf.mxu1 }
 0x317   : > { %v6152_v6 = vpop.f32.mrf.mxu2 }
 0x318   : > { %v1616_v27 = vmax.f32 %v6150_v5, %v6152_v6 }
 0x319   : > { %v6162_v17 = vpop.f32.mrf.mxu1 }
 0x31f   : > { %v6166_v21 = vpop.f32.mrf.mxu2 }
 0x320   : > { %v1619_v47 = vmax.f32 %v6162_v17, %v6166_v21 }
 0x33d   : > { %v1588_v48 = vpop.xlane.xlu0 %1587 }
 0x33e   : > { %v1634_v49 = vsub.f32 %v1497_v12, %v1588_v48  ;;  %v1635_v50 = vsub.f32 %v1546_v16, %v1588_v48 }
 0x340   : > { %v1666_v51 = vmul.f32 1.442695, %v1634_v49  ;;  %v1668_v52 = vmul.f32 1.442695, %v1635_v50 }
 0x342   : > { %5049 = vpow2.f32 %v1666_v51 }
 0x343   : > { %5051 = vpow2.f32 %v1668_v52 }
 0x345   : > { %v1591_v57 = vpop.xlane.xlu0 %1590 }
 0x346   : > { %v1636_v58 = vsub.f32 %v1499_v18, %v1591_v57  ;;  %v1637_v59 = vsub.f32 %v1548_v22, %v1591_v57 }
 0x348   : > { %v6144_v60 = vpop.eup %5049  ;;  %v1670_v61 = vmul.f32 1.442695, %v1636_v58  ;;  %v1672_v62 = vmul.f32 1.442695, %v1637_v59 }
 0x349   : > { %v6146_v63 = vpop.eup %5051 }
 0x34a   : > { %5053 = vpow2.f32 %v1670_v61  ;;  %v1730_v4 = vadd.f32 %v6146_v63, %v6144_v60 }
 0x34b   : > { %5055 = vpow2.f32 %v1672_v62 }
 0x34c   : > { %1731 = vadd.xlane.f32.xlu2 %v1730_v4 }
 0x34d   : > { %v1594_v7 = vpop.xlane.xlu1 %1593 }
 0x34e   : > { %v1638_v8 = vsub.f32 %v1502_v26, %v1594_v7  ;;  %v1639_v9 = vsub.f32 %v1551_v29, %v1594_v7 }
 0x350   : > { %v6154_v10 = vpop.eup %5053  ;;  %v1674_v11 = vmul.f32 1.442695, %v1638_v8  ;;  %v1676_v12 = vmul.f32 1.442695, %v1639_v9  ;;  %v4576_v8 = vld [vmem:[#allocation3 + $0x60] sm:$0xff]  ;;  %v4568_v9 = vld [vmem:[#allocation3 + $0x70] sm:$0xff] }
 0x351   : > { %v6156_v13 = vpop.eup %5055 }
 0x352   : > { %5057 = vpow2.f32 %v1674_v11  ;;  %v1733_v14 = vadd.f32 %v6156_v13, %v6154_v10 }
 0x353   : > { %5059 = vpow2.f32 %v1676_v12 }
 0x354   : > { %1734 = vadd.xlane.f32.xlu0 %v1733_v14  ;;  %1614 = vmax.xlane.f32.xlu2 %v1613_v15 }
 0x355   : > { %v1597_v16 = vpop.xlane.xlu1 %1596 }
 0x356   : > { %v1640_v18 = vsub.f32 %v6104_v31, %v1597_v16  ;;  %v1641_v19 = vsub.f32 %v6106_v32, %v1597_v16  ;;  %v6178_v31 = vpop.f32.mrf.mxu1  ;;  %v6180_v32 = vpop.f32.mrf.mxu2 }
 0x357   : > { %v1622_v52 = vmax.f32 %v6178_v31, %v6180_v32 }
 0x358   : > { %v6168_v22 = vpop.eup %5057  ;;  %v1678_v23 = vmul.f32 1.442695, %v1640_v18  ;;  %v1680_v24 = vmul.f32 1.442695, %v1641_v19  ;;  %v4567_v19 = vld [vmem:[#allocation3 + $0x30] sm:$0xff] }
 0x359   : > { %v6170_v25 = vpop.eup %5059 }
 0x35a   : > { %5061 = vpow2.f32 %v1678_v23  ;;  %v1736_v26 = vadd.f32 %v6170_v25, %v6168_v22 }
 0x35b   : > { %5063 = vpow2.f32 %v1680_v24 }
 0x35c   : > { %1737 = vadd.xlane.f32.xlu0 %v1736_v26  ;;  %1617 = vmax.xlane.f32.xlu2 %v1616_v27 }
 0x35d   : > { %v1600_v28 = vpop.xlane.xlu2 %1599 }
 0x35e   : > { %v1642_v29 = vsub.f32 %v6110_v34, %v1600_v28  ;;  %v1643_v30 = vsub.f32 %v6112_v20, %v1600_v28  ;;  %v6196_v57 = vpop.f32.mrf.mxu1  ;;  %v6200_v59 = vpop.f32.mrf.mxu2  ;;  %v4574_v28 = vld [vmem:[#allocation3] sm:$0xff] }
 0x35f   : > { %v1625_v15 = vmax.f32 %v6196_v57, %v6200_v59 }
 0x360   : > { %v6182_v33 = vpop.eup %5061  ;;  %v1682_v35 = vmul.f32 1.442695, %v1642_v29  ;;  %v1684_v38 = vmul.f32 1.442695, %v1643_v30  ;;  %v4566_v29 = vld [vmem:[#allocation3 + $0x48] sm:$0xff] }
 0x361   : > { %v6184_v2 = vpop.eup %5063 }
 0x362   : > { %5065 = vpow2.f32 %v1682_v35  ;;  %v1739_v42 = vadd.f32 %v6184_v2, %v6182_v33 }
 0x363   : > { %5067 = vpow2.f32 %v1684_v38 }
 0x364   : > { %1740 = vadd.xlane.f32.xlu1 %v1739_v42  ;;  %1620 = vmax.xlane.f32.xlu0 %v1619_v47 }
 0x365   : > { %v1603_v34 = vpop.xlane.xlu2 %1602 }
 0x366   : > { %v1644_v20 = vsub.f32 %v6116_v36, %v1603_v34  ;;  %v1645_v48 = vsub.f32 %v6118_v37, %v1603_v34  ;;  %v4577_v36 = vld [vmem:[#allocation3 + $0x50] sm:$0xff]  ;;  %v4569_v37 = vld [vmem:[#allocation3 + $0x38] sm:$0xff]  ;;  %v6216_v23 = vpop.f32.mrf.mxu2 }
 0x367   : > { %2019 = vmatpush.bf16.msrb.mxu0 %v4577_v36  ;;  %1970 = vmatpush.bf16.msrb.mxu3 %v4569_v37 }
 0x368   : > { %v6192_v49 = vpop.eup %5065  ;;  %v1686_v50 = vmul.f32 1.442695, %v1644_v20  ;;  %v1688_v51 = vmul.f32 1.442695, %v1645_v48 }
 0x369   : > { %v6198_v58 = vpop.eup %5067 }
 0x36a   : > { %5069 = vpow2.f32 %v1686_v50  ;;  %v1742_v61 = vadd.f32 %v6198_v58, %v6192_v49 }
 0x36b   : > { %5071 = vpow2.f32 %v1688_v51  ;;  %2020 = vmatpush.bf16.msrb.mxu0 %v4576_v8  ;;  %1971 = vmatpush.bf16.msrb.mxu3 %v4568_v9  ;;  %v4565_v8 = vld [vmem:[#allocation3 + $0x40] sm:$0xff]  ;;  %v4564_v9 = vld [vmem:[#allocation3 + $0x10] sm:$0xff] }
 0x36c   : > { %1743 = vadd.xlane.f32.xlu1 %v1742_v61  ;;  %1623 = vmax.xlane.f32.xlu0 %v1622_v52 }
 0x36d   : > { %v1606_v62 = vpop.xlane.xlu0 %1605 }
 0x36e   : > { %v1646_v4 = vsub.f32 %v6122_v39, %v1606_v62  ;;  %v1647_v7 = vsub.f32 %v6124_v40, %v1606_v62  ;;  %v6214_v39 = vpop.f32.mrf.mxu1  ;;  %v4575_v40 = vld [vmem:[#allocation3 + $0x8] sm:$0xff]  ;;  %v6230_v20 = vpop.f32.mrf.mxu2 }
 0x36f   : > { %2021 = vmatpush.bf16.msrb.mxu0 %v4575_v40  ;;  %1972 = vmatpush.bf16.msrb.mxu3 %v4567_v19  ;;  %v1628_v42 = vmax.f32 %v6214_v39, %v6216_v23  ;;  %v4570_v40 = vld [vmem:[#allocation3 + $0x20] sm:$0xff] }
 0x370   : > { %v6206_v11 = vpop.eup %5069  ;;  %v1690_v12 = vmul.f32 1.442695, %v1646_v4  ;;  %v1692_v14 = vmul.f32 1.442695, %v1647_v7  ;;  %v4573_v7 = vld [vmem:[#allocation3 + $0x58] sm:$0xff] }
 0x371   : > { %v6210_v16 = vpop.eup %5071 }
 0x372   : > { %5073 = vpow2.f32 %v1690_v12  ;;  %v1745_v18 = vadd.f32 %v6210_v16, %v6206_v11  ;;  %v4572_v12 = vld [vmem:[#allocation3 + $0x18] sm:$0xff] }
 0x373   : > { %5075 = vpow2.f32 %v1692_v14  ;;  %2022 = vmatpush.bf16.msrb.mxu0 %v4574_v28  ;;  %1973 = vmatpush.bf16.msrb.mxu3 %v4566_v29  ;;  %v4563_v14 = vld [vmem:[#allocation3 + $0x68] sm:$0xff] }
 0x374   : > { %1746 = vadd.xlane.f32.xlu2 %v1745_v18  ;;  %1626 = vmax.xlane.f32.xlu1 %v1625_v15  ;;  %v4571_v15 = vld [vmem:[#allocation3 + $0x78] sm:$0xff]  ;;  %v4562_v18 = vld [vmem:[#allocation3 + $0x28] sm:$0xff] }
 0x375   : > { %v1609_v24 = vpop.xlane.xlu1 %1608 }
 0x376   : > { %v1648_v26 = vsub.f32 %v6128_v3, %v1609_v24  ;;  %v1649_v27 = vsub.f32 %v6130_v41, %v1609_v24  ;;  %v6228_v3 = vpop.f32.mrf.mxu1 }
 0x377   : > { %v1631_v36 = vmax.f32 %v6228_v3, %v6230_v20  ;;  %2023 = vmatpush.bf16.msrb.mxu0 %v4573_v7  ;;  %1974 = vmatpush.bf16.msrb.mxu3 %v4565_v8 }
 0x378   : > { %v6220_v30 = vpop.eup %5073  ;;  %v1694_v35 = vmul.f32 1.442695, %v1648_v26  ;;  %v1696_v38 = vmul.f32 1.442695, %v1649_v27 }
 0x379   : > { %v6224_v47 = vpop.eup %5075 }
 0x37a   : > { %5077 = vpow2.f32 %v1694_v35  ;;  %v1748_v34 = vadd.f32 %v6224_v47, %v6220_v30 }
 0x37b   : > { %5079 = vpow2.f32 %v1696_v38  ;;  %1975 = vmatpush.bf16.msrb.mxu3 %v4564_v9  ;;  %2024 = vmatpush.bf16.msrb.mxu0 %v4572_v12 }
 0x37c   : > { %1749 = vadd.xlane.f32.xlu2 %v1748_v34  ;;  %1629 = vmax.xlane.f32.xlu1 %v1628_v42 }
 0x37d   : > { %v1612_v41 = vpop.xlane.xlu1 %1611 }
 0x37e   : > { %v1650_v48 = vsub.f32 %v6134_v43, %v1612_v41  ;;  %v1651_v50 = vsub.f32 %v6136_v46, %v1612_v41 }
 0x37f   : > { %1976 = vmatpush.bf16.msrb.mxu3 %v4563_v14  ;;  %2025 = vmatpush.bf16.msrb.mxu0 %v4571_v15 }
 0x380   : > { %v6234_v51 = vpop.eup %5077  ;;  %v1698_v52 = vmul.f32 1.442695, %v1650_v48  ;;  %v1700_v61 = vmul.f32 1.442695, %v1651_v50 }
 0x381   : > { %v6238_v37 = vpop.eup %5079 }
 0x382   : > { %5081 = vpow2.f32 %v1698_v52  ;;  %v1751_v62 = vadd.f32 %v6238_v37, %v6234_v51 }
 0x383   : > { %5083 = vpow2.f32 %v1700_v61  ;;  %1977 = vmatpush.bf16.msrb.mxu3 %v4562_v18  ;;  %2026 = vmatpush.bf16.msrb.mxu0 %v4570_v40 }
 0x384   : > { %1752 = vadd.xlane.f32.xlu0 %v1751_v62  ;;  %1632 = vmax.xlane.f32.xlu2 %v1631_v36 }
 0x388   : > { %v6242_v4 = vpop.eup %5081 }
 0x389   : > { %v6244_v43 = vpop.eup %5083 }
 0x38a   : > { %v1754_v46 = vadd.f32 %v6244_v43, %v6242_v4 }
 0x38c   : > { %1755 = vadd.xlane.f32.xlu0 %v1754_v46 }
 0x3bf   : > { %v1732_v19 = vpop.xlane.xlu2 %1731 }
 0x3c0   : > { %5085 = vrcp.f32 %v1732_v19 }
 0x3c6   : > { %v5086_v38 = vpop.eup %5085 }
 0x3c7   : > { %v1735_v24 = vpop.xlane.xlu0 %1734  ;;  %v1615_v26 = vpop.xlane.xlu2 %1614  ;;  %v1794_v48 = vmul.f32 %v5086_v38, %v6144_v60  ;;  %v1795_v52 = vmul.f32 %v5086_v38, %v6146_v63 }
 0x3c8   : > { %5087 = vrcp.f32 %v1735_v24  ;;  %v1652_v27 = vsub.f32 %v6140_v53, %v1615_v26  ;;  %v1653_v28 = vsub.f32 %v6142_v56, %v1615_v26 }
 0x3ca   : > { %v1702_v29 = vmul.f32 1.442695, %v1652_v27  ;;  %v1704_v35 = vmul.f32 1.442695, %v1653_v28 }
 0x3cc   : > { %5089 = vpow2.f32 %v1702_v29 }
 0x3cd   : > { %5091 = vpow2.f32 %v1704_v35 }
 0x3ce   : > { %v5088_v42 = vpop.eup %5087 }
 0x3cf   : > { %v1738_v34 = vpop.xlane.xlu0 %1737  ;;  %v1618_v41 = vpop.xlane.xlu2 %1617  ;;  %v1796_v50 = vmul.f32 %v5088_v42, %v6154_v10  ;;  %v1797_v61 = vmul.f32 %v5088_v42, %v6156_v13 }
 0x3d0   : > { %v1654_v53 = vsub.f32 %v6150_v5, %v1618_v41  ;;  %v1655_v56 = vsub.f32 %v6152_v6, %v1618_v41 }
 0x3d1   : > { %v1826_v36 = vpack.c.bf16 %v1796_v50, %v1794_v48  ;;  %v1827_v62 = vpack.c.bf16 %v1797_v61, %v1795_v52 }
 0x3d2   : > { %v6256_v46 = vpop.eup %5089  ;;  %v1706_v7 = vmul.f32 1.442695, %v1654_v53  ;;  %v1708_v8 = vmul.f32 1.442695, %v1655_v56 }
 0x3d3   : > { %v6258_v9 = vpop.eup %5091  ;;  %1978 = vmatmul.bf16.vlgmr.msrb.gmra.mxu3 %v1826_v36  ;;  %2027 = vmatmul.bf16.vlgmr.msrb.gmra.mxu0 %v1827_v62 }
 0x3d4   : > { %5093 = vpow2.f32 %v1706_v7  ;;  %v1757_v60 = vadd.f32 %v6258_v9, %v6256_v46 }
 0x3d5   : > { %5095 = vpow2.f32 %v1708_v8 }
 0x3d6   : > { %5097 = vrcp.f32 %v1738_v34  ;;  %1758 = vadd.xlane.f32.xlu1 %v1757_v60 }
 0x3d7   : > { %v1741_v63 = vpop.xlane.xlu1 %1740  ;;  %v1621_v5 = vpop.xlane.xlu0 %1620 }
 0x3d8   : > { %5099 = vrcp.f32 %v1741_v63  ;;  %v1656_v6 = vsub.f32 %v6162_v17, %v1621_v5  ;;  %v1657_v10 = vsub.f32 %v6166_v21, %v1621_v5 }
 0x3da   : > { %v6264_v13 = vpop.eup %5093  ;;  %v1710_v12 = vmul.f32 1.442695, %v1656_v6  ;;  %v1712_v14 = vmul.f32 1.442695, %v1657_v10 }
 0x3db   : > { %v6266_v15 = vpop.eup %5095 }
 0x3dc   : > { %v5098_v18 = vpop.eup %5097  ;;  %5101 = vpow2.f32 %v1710_v12  ;;  %v1760_v40 = vadd.f32 %v6266_v15, %v6264_v13 }
 0x3dd   : > { %5103 = vpow2.f32 %v1712_v14  ;;  %v1798_v17 = vmul.f32 %v5098_v18, %v6168_v22  ;;  %v1799_v27 = vmul.f32 %v5098_v18, %v6170_v25 }
 0x3de   : > { %v5100_v19 = vpop.eup %5099  ;;  %1761 = vadd.xlane.f32.xlu2 %v1760_v40 }
 0x3df   : > { %v1744_v24 = vpop.xlane.xlu1 %1743  ;;  %v1624_v26 = vpop.xlane.xlu0 %1623  ;;  %v1800_v21 = vmul.f32 %v5100_v19, %v6182_v33  ;;  %v1801_v28 = vmul.f32 %v5100_v19, %v6184_v2 }
 0x3e0   : > { %v1658_v29 = vsub.f32 %v6178_v31, %v1624_v26  ;;  %v1659_v35 = vsub.f32 %v6180_v32, %v1624_v26 }
 0x3e1   : > { %v1828_v38 = vpack.c.bf16 %v1800_v21, %v1798_v17  ;;  %v1829_v42 = vpack.c.bf16 %v1801_v28, %v1799_v27 }
 0x3e2   : > { %v6276_v34 = vpop.eup %5101  ;;  %v1714_v41 = vmul.f32 1.442695, %v1658_v29  ;;  %v1716_v48 = vmul.f32 1.442695, %v1659_v35 }
 0x3e3   : > { %v6278_v50 = vpop.eup %5103  ;;  %1983 = vmatmul.bf16.gmra.mxu3 %v1828_v38  ;;  %2032 = vmatmul.bf16.gmra.mxu0 %v1829_v42 }
 0x3e4   : > { %5105 = vpow2.f32 %v1714_v41  ;;  %v1763_v22 = vadd.f32 %v6278_v50, %v6276_v34 }
 0x3e5   : > { %5107 = vpow2.f32 %v1716_v48 }
 0x3e6   : > { %5109 = vrcp.f32 %v1744_v24  ;;  %1764 = vadd.xlane.f32.xlu0 %v1763_v22 }
 0x3e7   : > { %v1747_v25 = vpop.xlane.xlu2 %1746  ;;  %v1627_v31 = vpop.xlane.xlu1 %1626 }
 0x3e8   : > { %5111 = vrcp.f32 %v1747_v25  ;;  %v1660_v32 = vsub.f32 %v6196_v57, %v1627_v31  ;;  %v1661_v33 = vsub.f32 %v6200_v59, %v1627_v31 }
 0x3ea   : > { %v6284_v2 = vpop.eup %5105  ;;  %v1718_v52 = vmul.f32 1.442695, %v1660_v32  ;;  %v1720_v61 = vmul.f32 1.442695, %v1661_v33 }
 0x3eb   : > { %v6286_v53 = vpop.eup %5107 }
 0x3ec   : > { %v5110_v56 = vpop.eup %5109  ;;  %5113 = vpow2.f32 %v1718_v52  ;;  %v1766_v36 = vadd.f32 %v6286_v53, %v6284_v2 }
 0x3ed   : > { %5115 = vpow2.f32 %v1720_v61  ;;  %v1802_v57 = vmul.f32 %v5110_v56, %v6192_v49  ;;  %v1803_v60 = vmul.f32 %v5110_v56, %v6198_v58 }
 0x3ee   : > { %v5112_v62 = vpop.eup %5111  ;;  %1767 = vadd.xlane.f32.xlu1 %v1766_v36 }
 0x3ef   : > { %v1750_v7 = vpop.xlane.xlu2 %1749  ;;  %v1630_v8 = vpop.xlane.xlu1 %1629  ;;  %v1804_v59 = vmul.f32 %v5112_v62, %v6206_v11  ;;  %v1805_v63 = vmul.f32 %v5112_v62, %v6210_v16 }
 0x3f0   : > { %v1662_v5 = vsub.f32 %v6214_v39, %v1630_v8  ;;  %v1663_v6 = vsub.f32 %v6216_v23, %v1630_v8 }
 0x3f1   : > { %v1830_v10 = vpack.c.bf16 %v1804_v59, %v1802_v57  ;;  %v1831_v12 = vpack.c.bf16 %v1805_v63, %v1803_v60 }
 0x3f2   : > { %v6296_v14 = vpop.eup %5113  ;;  %v1722_v18 = vmul.f32 1.442695, %v1662_v5  ;;  %v1724_v40 = vmul.f32 1.442695, %v1663_v6 }
 0x3f3   : > { %v6298_v19 = vpop.eup %5115  ;;  %1988 = vmatmul.bf16.gmra.mxu3 %v1830_v10  ;;  %2037 = vmatmul.bf16.gmra.mxu0 %v1831_v12 }
 0x3f4   : > { %5117 = vpow2.f32 %v1722_v18  ;;  %v1769_v49 = vadd.f32 %v6298_v19, %v6296_v14 }
 0x3f5   : > { %5119 = vpow2.f32 %v1724_v40 }
 0x3f6   : > { %5121 = vrcp.f32 %v1750_v7  ;;  %1770 = vadd.xlane.f32.xlu2 %v1769_v49 }
 0x3f7   : > { %v1753_v58 = vpop.xlane.xlu0 %1752  ;;  %v1633_v11 = vpop.xlane.xlu2 %1632 }
 0x3f8   : > { %5123 = vrcp.f32 %v1753_v58  ;;  %v1664_v16 = vsub.f32 %v6228_v3, %v1633_v11  ;;  %v1665_v39 = vsub.f32 %v6230_v20, %v1633_v11 }
 0x3fa   : > { %v6304_v23 = vpop.eup %5117  ;;  %v1726_v24 = vmul.f32 1.442695, %v1664_v16  ;;  %v1728_v26 = vmul.f32 1.442695, %v1665_v39 }
 0x3fb   : > { %v6306_v17 = vpop.eup %5119 }
 0x3fc   : > { %v5122_v21 = vpop.eup %5121  ;;  %5125 = vpow2.f32 %v1726_v24  ;;  %v1772_v27 = vadd.f32 %v6306_v17, %v6304_v23 }
 0x3fd   : > { %5127 = vpow2.f32 %v1728_v26  ;;  %v1806_v29 = vmul.f32 %v5122_v21, %v6220_v30  ;;  %v1807_v20 = vmul.f32 %v5122_v21, %v6224_v47 }
 0x3fe   : > { %v5124_v28 = vpop.eup %5123  ;;  %1773 = vadd.xlane.f32.xlu0 %v1772_v27 }
 0x3ff   : > { %v1808_v3 = vmul.f32 %v5124_v28, %v6234_v51  ;;  %v1809_v35 = vmul.f32 %v5124_v28, %v6238_v37  ;;  %v1756_v25 = vpop.xlane.xlu0 %1755 }
 0x400   : > { %5129 = vrcp.f32 %v1756_v25 }
 0x401   : > { %v1832_v38 = vpack.c.bf16 %v1808_v3, %v1806_v29  ;;  %v1833_v42 = vpack.c.bf16 %v1809_v35, %v1807_v20 }
 0x402   : > { %v6314_v41 = vpop.eup %5125 }
 0x403   : > { %v6316_v48 = vpop.eup %5127  ;;  %1993 = vmatmul.bf16.gmra.mxu3 %v1832_v38  ;;  %2042 = vmatmul.bf16.gmra.mxu0 %v1833_v42 }
 0x404   : > { %v1775_v22 = vadd.f32 %v6316_v48, %v6314_v41 }
 0x406   : > { %1776 = vadd.xlane.f32.xlu1 %v1775_v22  ;;  %v5130_v51 = vpop.eup %5129 }
 0x407   : > { %v1810_v37 = vmul.f32 %v5130_v51, %v6242_v4  ;;  %v1811_v33 = vmul.f32 %v5130_v51, %v6244_v43 }
 0x449   : > { %v1759_v30 = vpop.xlane.xlu1 %1758 }
 0x44a   : > { %5131 = vrcp.f32 %v1759_v30 }
 0x450   : > { %v5132_v47 = vpop.eup %5131  ;;  %v2028_v31 = vpop.f32.mrf.mxu0 }
 0x451   : > { %v1812_v32 = vmul.f32 %v5132_v47, %v6256_v46  ;;  %v1813_v52 = vmul.f32 %v5132_v47, %v6258_v9  ;;  %v1762_v36 = vpop.xlane.xlu2 %1761 }
 0x452   : > { %5133 = vrcp.f32 %v1762_v36 }
 0x453   : > { %v1834_v61 = vpack.c.bf16 %v1812_v32, %v1810_v37  ;;  %v1835_v56 = vpack.c.bf16 %v1813_v52, %v1811_v33  ;;  %v5211_v52 = vld [vmem:[%s5910_s28 + $0x30] sm:$0xff] }
 0x455   : > { %1998 = vmatmul.bf16.gmra.mxu3 %v1834_v61  ;;  %2047 = vmatmul.bf16.gmra.mxu0 %v1835_v56 }
 0x456   : > { %v1979_v62 = vpop.f32.mrf.mxu3 }
 0x457   : > { %v2029_v7 = vadd.f32 %v2028_v31, %v1979_v62 }
 0x458   : > { %v2030_v8 = vpop.f32.mrf.mxu0  ;;  %v5134_v4 = vpop.eup %5133 }
 0x459   : > { %v1765_v57 = vpop.xlane.xlu0 %1764  ;;  %v6325_v59 = vadd.f32 %v2029_v7, %v6050_v44  ;;  %v1814_v63 = vmul.f32 %v5134_v4, %v6264_v13  ;;  %v1815_v10 = vmul.f32 %v5134_v4, %v6266_v15 }
 0x45a   : > { %5135 = vrcp.f32 %v1765_v57 }
 0x45b   : > { %2086 = vadd.xlane.f32.xlu2 %v6325_v59 }
 0x45e   : > { %v1981_v43 = vpop.f32.mrf.mxu3 }
 0x45f   : > { %v2031_v46 = vadd.f32 %v2030_v8, %v1981_v43 }
 0x460   : > { %v5136_v9 = vpop.eup %5135  ;;  %v2033_v60 = vpop.f32.mrf.mxu0 }
 0x461   : > { %v6330_v5 = vadd.f32 %v2031_v46, %v6053_v45  ;;  %v1816_v6 = vmul.f32 %v5136_v9, %v6276_v34  ;;  %v1817_v44 = vmul.f32 %v5136_v9, %v6278_v50  ;;  %v1768_v40 = vpop.xlane.xlu1 %1767 }
 0x462   : > { %5137 = vrcp.f32 %v1768_v40 }
 0x463   : > { %2088 = vadd.xlane.f32.xlu0 %v6330_v5  ;;  %v1836_v12 = vpack.c.bf16 %v1816_v6, %v1814_v63  ;;  %v1837_v18 = vpack.c.bf16 %v1817_v44, %v1815_v10 }
 0x465   : > { %2003 = vmatmul.bf16.gmra.mxu3 %v1836_v12  ;;  %2052 = vmatmul.bf16.gmra.mxu0 %v1837_v18  ;;  %v5212_v12 = vld [vmem:[%s5910_s28 + $0x38] sm:$0xff] }
 0x466   : > { %v1984_v49 = vpop.f32.mrf.mxu3 }
 0x467   : > { %v2034_v58 = vadd.f32 %v2033_v60, %v1984_v49 }
 0x468   : > { %v2035_v13 = vpop.f32.mrf.mxu0  ;;  %v5138_v15 = vpop.eup %5137 }
 0x469   : > { %v1771_v11 = vpop.xlane.xlu2 %1770  ;;  %v6337_v45 = vadd.f32 %v2034_v58, %v6060_v54  ;;  %v1818_v39 = vmul.f32 %v5138_v15, %v6284_v2  ;;  %v1819_v21 = vmul.f32 %v5138_v15, %v6286_v53  ;;  %v5213_v15 = vld [vmem:[%s5910_s28 + $0x40] sm:$0xff] }
 0x46a   : > { %5139 = vrcp.f32 %v1771_v11 }
 0x46b   : > { %2090 = vadd.xlane.f32.xlu1 %v6337_v45 }
 0x46e   : > { %v1986_v34 = vpop.f32.mrf.mxu3 }
 0x46f   : > { %v2036_v50 = vadd.f32 %v2035_v13, %v1986_v34 }
 0x470   : > { %v5140_v16 = vpop.eup %5139  ;;  %v2038_v54 = vpop.f32.mrf.mxu0 }
 0x471   : > { %v6342_v24 = vadd.f32 %v2036_v50, %v6063_v55  ;;  %v1820_v26 = vmul.f32 %v5140_v16, %v6296_v14  ;;  %v1821_v27 = vmul.f32 %v5140_v16, %v6298_v19  ;;  %v1774_v3 = vpop.xlane.xlu0 %1773 }
 0x472   : > { %5141 = vrcp.f32 %v1774_v3 }
 0x473   : > { %2092 = vadd.xlane.f32.xlu2 %v6342_v24  ;;  %v1838_v28 = vpack.c.bf16 %v1820_v26, %v1818_v39  ;;  %v1839_v29 = vpack.c.bf16 %v1821_v27, %v1819_v21 }
 0x475   : > { %2008 = vmatmul.bf16.gmra.mxu3 %v1838_v28  ;;  %2057 = vmatmul.bf16.gmra.mxu0 %v1839_v29 }
 0x476   : > { %v1989_v20 = vpop.f32.mrf.mxu3 }
 0x477   : > { %v2039_v2 = vadd.f32 %v2038_v54, %v1989_v20 }
 0x478   : > { %v2040_v53 = vpop.f32.mrf.mxu0  ;;  %v5142_v14 = vpop.eup %5141 }
 0x479   : > { %v1777_v35 = vpop.xlane.xlu1 %1776  ;;  %v6349_v55 = vadd.f32 %v2039_v2, %v6070_v0  ;;  %v1822_v22 = vmul.f32 %v5142_v14, %v6304_v23  ;;  %v1823_v51 = vmul.f32 %v5142_v14, %v6306_v17 }
 0x47a   : > { %5143 = vrcp.f32 %v1777_v35 }
 0x47b   : > { %2094 = vadd.xlane.f32.xlu0 %v6349_v55 }
 0x47e   : > { %v1991_v19 = vpop.f32.mrf.mxu3 }
 0x47f   : > { %v2041_v38 = vadd.f32 %v2040_v53, %v1991_v19 }
 0x480   : > { %v5144_v42 = vpop.eup %5143  ;;  %v2043_v37 = vpop.f32.mrf.mxu0 }
 0x481   : > { %v6354_v25 = vadd.f32 %v2041_v38, %v6073_v1  ;;  %v1824_v30 = vmul.f32 %v5144_v42, %v6314_v41  ;;  %v1825_v0 = vmul.f32 %v5144_v42, %v6316_v48  ;;  %v5617_v1 = vmov 128.0  }
 0x482   : > { %5145 = vrcp.f32 %v5617_v1 }
 0x483   : > { %2096 = vadd.xlane.f32.xlu1 %v6354_v25  ;;  %v1840_v47 = vpack.c.bf16 %v1824_v30, %v1822_v22  ;;  %v1841_v31 = vpack.c.bf16 %v1825_v0, %v1823_v51 }
 0x485   : > { %2013 = vmatmul.bf16.gmra.mxu3 %v1840_v47  ;;  %2062 = vmatmul.bf16.gmra.mxu0 %v1841_v31  ;;  %v5216_v47 = vld [vmem:[%s5910_s28 + $0x58] sm:$0xff] }
 0x486   : > { %v1994_v32 = vpop.f32.mrf.mxu3 }
 0x487   : > { %v2044_v33 = vadd.f32 %v2043_v37, %v1994_v32 }
 0x488   : > { %v5146_v41 = vpop.eup %5145  ;;  %v2045_v36 = vpop.f32.mrf.mxu0 }
 0x489   : > { %v6361_v23 = vadd.f32 %v5211_v52, %v2044_v33  ;;  %v2119_v17 = vmul.f32 128.0, %v5146_v41  ;;  %vm2123_vm0 = vweird.f32 %v5146_v41 }
 0x48b   : > { %2098 = vadd.xlane.f32.xlu1 %v6361_v23  ;;  %v2120_v61 = vsub.f32 1.0, %v2119_v17 }
 0x48d   : > { %v2121_v48 = vmul.f32 %v5146_v41, %v2120_v61 }
 0x48e   : > { %v1996_v57 = vpop.f32.mrf.mxu3 }
 0x48f   : > { %v2122_v56 = vadd.f32 %v5146_v41, %v2121_v48  ;;  %v2046_v60 = vadd.f32 %v2045_v36, %v1996_v57  ;;  %v5219_v57 = vld [vmem:[%s5910_s28 + $0x70] sm:$0xff] }
 0x491   : > { %v6364_v62 = vsel %vm2123_vm0, %v5146_v41, %v2122_v56  ;;  %v5217_v41 = vld [vmem:[%s5910_s28 + $0x60] sm:$0xff]  ;;  %v5218_v56 = vld [vmem:[%s5910_s28 + $0x68] sm:$0xff] }
 0x4ce   : > { %v2087_v7 = vpop.xlane.xlu2 %2086 }
 0x4cf   : > { %v2125_v8 = vmul.f32 %v6364_v62, %v2087_v7 }
 0x4d1   : > { %v6368_v4 = vsub.f32 %v6325_v59, %v2125_v8  ;;  %v6379_v59 = vadd.f32 %v5212_v12, %v2046_v60  ;;  %v4592_v60 = vld [vmem:[#allocation15 + $0xe4] sm:$0xf]  ;;  %v4625_v12 = vld [vmem:[#allocation15 + $0xf4] sm:$0xf0] }
 0x4d2   : > { %v2048_v43 = vpop.f32.mrf.mxu0 }
 0x4d3   : > { %v2157_v46 = vmul.f32 %v6368_v4, %v6368_v4 }
 0x4d5   : > { %2173 = vadd.xlane.f32.xlu2 %v2157_v46  ;;  %v4317_v46 = vld [vmem:[#allocation15 + $0xe0] sm:$0xf] }
 0x4d6   : > { %v2089_v9 = vpop.xlane.xlu0 %2088 }
 0x4d7   : > { %v2126_v63 = vmul.f32 %v6364_v62, %v2089_v9  ;;  %v4593_v9 = vld [vmem:[#allocation15 + $0xec] sm:$0xf0] }
 0x4d8   : > { %v1999_v6 = vpop.f32.mrf.mxu3 }
 0x4d9   : > { %v6374_v10 = vsub.f32 %v6330_v5, %v2126_v63  ;;  %v2049_v49 = vadd.f32 %v2048_v43, %v1999_v6  ;;  %v4318_v63 = vor.u32 %v4593_v9, %v4317_v46  ;;  %v4319_v6 = vld [vmem:[#allocation15 + $0xf0] sm:$0xf0]  ;;  %v4285_v46 = vld [vmem:[#allocation15 + $0x60] sm:$0xf]  ;;  %v4585_v9 = vld [vmem:[#allocation15 + $0x6c] sm:$0xf0] }
 0x4da   : > { %v2050_v18 = vpop.f32.mrf.mxu0 }
 0x4db   : > { %v2158_v44 = vmul.f32 %v6374_v10, %v6374_v10  ;;  %v6389_v34 = vadd.f32 %v5213_v15, %v2049_v49  ;;  %v4624_v49 = vld [vmem:[#allocation15 + $0xec] sm:$0xf]  ;;  %2561 = vmatpush.bf16.msra.mxu3 %v4318_v63  ;;  %v4591_v15 = vld [vmem:[#allocation15 + $0xcc] sm:$0xf0]  ;;  %v4286_v63 = vor.u32 %v4585_v9, %v4285_v46  ;;  %v4327_v46 = vld [vmem:[#allocation15 + $0x18] sm:$0xf0] }
 0x4dd   : > { %2175 = vadd.xlane.f32.xlu0 %v2158_v44  ;;  %2100 = vadd.xlane.f32.xlu2 %v6379_v59  ;;  %v4381_v44 = vld [vmem:[#allocation15 + $0xe8] sm:$0xf] }
 0x4de   : > { %v2091_v40 = vpop.xlane.xlu1 %2090 }
 0x4df   : > { %v2127_v58 = vmul.f32 %v6364_v62, %v2091_v40  ;;  %v4382_v40 = vor.u32 %v4625_v12, %v4381_v44  ;;  %v4349_v44 = vld [vmem:[#allocation15 + $0x68] sm:$0xf]  ;;  %v4617_v12 = vld [vmem:[#allocation15 + $0x74] sm:$0xf0] }
 0x4e0   : > { %v2001_v13 = vpop.f32.mrf.mxu3 }
 0x4e1   : > { %v6384_v11 = vsub.f32 %v6337_v45, %v2127_v58  ;;  %v2051_v39 = vadd.f32 %v2050_v18, %v2001_v13  ;;  %v5214_v45 = vld [vmem:[%s5910_s28 + $0x48] sm:$0xff]  ;;  %v4322_v18 = vor.u32 %v4592_v60, %v4319_v6  ;;  %v4383_v58 = vld [vmem:[#allocation15 + $0xf8] sm:$0xf0]  ;;  %2841 = vmatpush.bf16.msrb.mxu2 %v4382_v40  ;;  %v4287_v6 = vld [vmem:[#allocation15 + $0x70] sm:$0xf0]  ;;  %v4350_v40 = vor.u32 %v4617_v12, %v4349_v44 }
 0x4e2   : > { %v2053_v50 = vpop.f32.mrf.mxu0  ;;  %v4386_v13 = vor.u32 %v4624_v49, %v4383_v58  ;;  %v4584_v60 = vld [vmem:[#allocation15 + $0x64] sm:$0xf]  ;;  %v4616_v49 = vld [vmem:[#allocation15 + $0x6c] sm:$0xf]  ;;  %v4351_v58 = vld [vmem:[#allocation15 + $0x78] sm:$0xf0] }
 0x4e3   : > { %v2159_v5 = vmul.f32 %v6384_v11, %v6384_v11  ;;  %v6397_v54 = vadd.f32 %v5214_v45, %v2051_v39  ;;  %2610 = vmatpush.bf16.msra.mxu1 %v4322_v18  ;;  %v4311_v39 = vld [vmem:[#allocation15 + $0xd0] sm:$0xf0]  ;;  %v4290_v18 = vor.u32 %v4584_v60, %v4287_v6 }
 0x4e4   : > { %2890 = vmatpush.bf16.msra.mxu0 %v4386_v13  ;;  %v4354_v13 = vor.u32 %v4616_v49, %v4351_v58 }
 0x4e5   : > { %2177 = vadd.xlane.f32.xlu0 %v2159_v5  ;;  %2102 = vadd.xlane.f32.xlu2 %v6389_v34  ;;  %v4309_v5 = vld [vmem:[#allocation15 + $0xc0] sm:$0xf] }
 0x4e6   : > { %v2093_v16 = vpop.xlane.xlu2 %2092 }
 0x4e7   : > { %v2128_v26 = vmul.f32 %v6364_v62, %v2093_v16  ;;  %v4310_v16 = vor.u32 %v4591_v15, %v4309_v5  ;;  %v4277_v5 = vld [vmem:[#allocation15 + $0x40] sm:$0xf]  ;;  %v4583_v15 = vld [vmem:[#allocation15 + $0x4c] sm:$0xf0] }
 0x4e8   : > { %v2004_v21 = vpop.f32.mrf.mxu3 }
 0x4e9   : > { %v6394_v27 = vsub.f32 %v6342_v24, %v2128_v26  ;;  %v2054_v3 = vadd.f32 %v2053_v50, %v2004_v21  ;;  %v5215_v24 = vld [vmem:[%s5910_s28 + $0x50] sm:$0xff]  ;;  %v4590_v50 = vld [vmem:[#allocation15 + $0xc4] sm:$0xf]  ;;  %v4373_v26 = vld [vmem:[#allocation15 + $0xc8] sm:$0xf]  ;;  %2562 = vmatpush.bf16.msra.mxu3 %v4310_v16  ;;  %v4278_v16 = vor.u32 %v4583_v15, %v4277_v5 }
 0x4ea   : > { %v2055_v2 = vpop.f32.mrf.mxu0  ;;  %v4623_v21 = vld [vmem:[#allocation15 + $0xd4] sm:$0xf0]  ;;  %v4314_v45 = vor.u32 %v4590_v50, %v4311_v39  ;;  %v4582_v50 = vld [vmem:[#allocation15 + $0x44] sm:$0xf]  ;;  %v4279_v39 = vld [vmem:[#allocation15 + $0x50] sm:$0xf0] }
 0x4eb   : > { %v2160_v28 = vmul.f32 %v6394_v27, %v6394_v27  ;;  %v6407_v14 = vadd.f32 %v5215_v24, %v2054_v3  ;;  %v4375_v3 = vld [vmem:[#allocation15 + $0xd8] sm:$0xf0]  ;;  %v4588_v24 = vld [vmem:[#allocation15 + $0xa4] sm:$0xf] }
 0x4ec   : > { %2611 = vmatpush.bf16.msra.mxu1 %v4314_v45  ;;  %v4282_v45 = vor.u32 %v4582_v50, %v4279_v39 }
 0x4ed   : > { %2104 = vadd.xlane.f32.xlu0 %v6397_v54  ;;  %2179 = vadd.xlane.f32.xlu1 %v2160_v28  ;;  %v4374_v28 = vor.u32 %v4623_v21, %v4373_v26  ;;  %v4341_v26 = vld [vmem:[#allocation15 + $0x48] sm:$0xf]  ;;  %v4615_v21 = vld [vmem:[#allocation15 + $0x54] sm:$0xf0] }
 0x4ee   : > { %v2095_v29 = vpop.xlane.xlu0 %2094 }
 0x4ef   : > { %v2129_v20 = vmul.f32 %v6364_v62, %v2095_v29  ;;  %v4622_v29 = vld [vmem:[#allocation15 + $0xcc] sm:$0xf]  ;;  %2842 = vmatpush.bf16.msrb.mxu2 %v4374_v28  ;;  %v4342_v28 = vor.u32 %v4615_v21, %v4341_v26 }
 0x4f0   : > { %v2006_v35 = vpop.f32.mrf.mxu3 }
 0x4f1   : > { %v6404_v53 = vsub.f32 %v6349_v55, %v2129_v20  ;;  %v2056_v42 = vadd.f32 %v2055_v2, %v2006_v35  ;;  %v4378_v20 = vor.u32 %v4622_v29, %v4375_v3  ;;  %v4301_v2 = vld [vmem:[#allocation15 + $0xa0] sm:$0xf]  ;;  %v4589_v35 = vld [vmem:[#allocation15 + $0xac] sm:$0xf0]  ;;  %v4614_v29 = vld [vmem:[#allocation15 + $0x4c] sm:$0xf] }
 0x4f2   : > { %v2058_v55 = vpop.f32.mrf.mxu0  ;;  %v4343_v3 = vld [vmem:[#allocation15 + $0x58] sm:$0xf0] }
 0x4f3   : > { %v2161_v19 = vmul.f32 %v6404_v53, %v6404_v53  ;;  %v6419_v31 = vadd.f32 %v5216_v47, %v2056_v42  ;;  %2891 = vmatpush.bf16.msra.mxu0 %v4378_v20  ;;  %v4365_v42 = vld [vmem:[#allocation15 + $0xa8] sm:$0xf]  ;;  %v4367_v47 = vld [vmem:[#allocation15 + $0xb8] sm:$0xf0]  ;;  %v4346_v20 = vor.u32 %v4614_v29, %v4343_v3 }
 0x4f5   : > { %2106 = vadd.xlane.f32.xlu0 %v6407_v14  ;;  %2181 = vadd.xlane.f32.xlu1 %v2161_v19  ;;  %v4302_v19 = vor.u32 %v4589_v35, %v4301_v2  ;;  %v4269_v2 = vld [vmem:[#allocation15 + $0x20] sm:$0xf]  ;;  %v4581_v35 = vld [vmem:[#allocation15 + $0x2c] sm:$0xf0] }
 0x4f6   : > { %v2097_v38 = vpop.xlane.xlu1 %2096 }
 0x4f7   : > { %v2130_v22 = vmul.f32 %v6364_v62, %v2097_v38  ;;  %v4303_v38 = vld [vmem:[#allocation15 + $0xb0] sm:$0xf0]  ;;  %2563 = vmatpush.bf16.msra.mxu3 %v4302_v19  ;;  %v4270_v19 = vor.u32 %v4581_v35, %v4269_v2 }
 0x4f8   : > { %v2009_v30 = vpop.f32.mrf.mxu3 }
 0x4f9   : > { %v6414_v51 = vsub.f32 %v6354_v25, %v2130_v22  ;;  %v2059_v32 = vadd.f32 %v2058_v55, %v2009_v30  ;;  %v4621_v22 = vld [vmem:[#allocation15 + $0xb4] sm:$0xf0]  ;;  %v4306_v30 = vor.u32 %v4588_v24, %v4303_v38  ;;  %v4580_v24 = vld [vmem:[#allocation15 + $0x24] sm:$0xf]  ;;  %v4271_v38 = vld [vmem:[#allocation15 + $0x30] sm:$0xf0] }
 0x4fa   : > { %v2060_v61 = vpop.f32.mrf.mxu0  ;;  %v4366_v55 = vor.u32 %v4621_v22, %v4365_v42  ;;  %v4333_v42 = vld [vmem:[#allocation15 + $0x28] sm:$0xf]  ;;  %v4613_v22 = vld [vmem:[#allocation15 + $0x34] sm:$0xf0] }
 0x4fb   : > { %v2162_v0 = vmul.f32 %v6414_v51, %v6414_v51  ;;  %v6429_v17 = vadd.f32 %v5217_v41, %v2059_v32  ;;  %2612 = vmatpush.bf16.msra.mxu1 %v4306_v30  ;;  %v4293_v32 = vld [vmem:[#allocation15 + $0x80] sm:$0xf]  ;;  %v4295_v41 = vld [vmem:[#allocation15 + $0x90] sm:$0xf0] }
 0x4fc   : > { %2843 = vmatpush.bf16.msrb.mxu2 %v4366_v55  ;;  %v4274_v55 = vor.u32 %v4580_v24, %v4271_v38 }
 0x4fd   : > { %2183 = vadd.xlane.f32.xlu2 %v2162_v0  ;;  %2108 = vadd.xlane.f32.xlu1 %v6419_v31  ;;  %v4620_v0 = vld [vmem:[#allocation15 + $0xac] sm:$0xf] }
 0x4fe   : > { %v2099_v37 = vpop.xlane.xlu1 %2098 }
 0x4ff   : > { %v2131_v33 = vmul.f32 %v6364_v62, %v2099_v37  ;;  %v4370_v37 = vor.u32 %v4620_v0, %v4367_v47  ;;  %v4334_v0 = vor.u32 %v4613_v22, %v4333_v42  ;;  %v4612_v47 = vld [vmem:[#allocation15 + $0x2c] sm:$0xf] }
 0x500   : > { %v2011_v25 = vpop.f32.mrf.mxu3 }
 0x501   : > { %v6424_v52 = vsub.f32 %v6361_v23, %v2131_v33  ;;  %v2061_v48 = vadd.f32 %v2060_v61, %v2011_v25  ;;  %v4587_v33 = vld [vmem:[#allocation15 + $0x8c] sm:$0xf0]  ;;  %v4586_v25 = vld [vmem:[#allocation15 + $0x84] sm:$0xf]  ;;  %2892 = vmatpush.bf16.msra.mxu0 %v4370_v37  ;;  %v4357_v61 = vld [vmem:[#allocation15 + $0x88] sm:$0xf] }
 0x502   : > { %v2063_v23 = vpop.f32.mrf.mxu0  ;;  %v4335_v37 = vld [vmem:[#allocation15 + $0x38] sm:$0xf0] }
 0x503   : > { %v2163_v1 = vmul.f32 %v6424_v52, %v6424_v52  ;;  %v6433_v36 = vadd.f32 %v5218_v56, %v2061_v48  ;;  %v4619_v48 = vld [vmem:[#allocation15 + $0x94] sm:$0xf0]  ;;  %v4298_v56 = vor.u32 %v4586_v25, %v4295_v41  ;;  %v4261_v25 = vld [vmem:[#allocation15] sm:$0xf]  ;;  %v4578_v41 = vld [vmem:[#allocation15 + $0x4] sm:$0xf] }
 0x505   : > { %2185 = vadd.xlane.f32.xlu2 %v2163_v1  ;;  %2110 = vadd.xlane.f32.xlu1 %v6429_v17  ;;  %v4294_v1 = vor.u32 %v4587_v33, %v4293_v32  ;;  %v4338_v33 = vor.u32 %v4612_v47, %v4335_v37 }
 0x506   : > { %2613 = vmatpush.bf16.msra.mxu1 %v4298_v56  ;;  %v4263_v56 = vld [vmem:[#allocation15 + $0x10] sm:$0xf0] }
 0x507   : > { %2564 = vmatpush.bf16.msra.mxu3 %v4294_v1  ;;  %v4579_v1 = vld [vmem:[#allocation15 + $0xc] sm:$0xf0] }
 0x508   : > { %v2014_v7 = vpop.f32.mrf.mxu3 }
 0x509   : > { %v2064_v8 = vadd.f32 %v2063_v23, %v2014_v7  ;;  %v4358_v7 = vor.u32 %v4619_v48, %v4357_v61  ;;  %v4618_v23 = vld [vmem:[#allocation15 + $0x8c] sm:$0xf]  ;;  %v4262_v48 = vor.u32 %v4579_v1, %v4261_v25  ;;  %v6461_v25 = vld [vmem:[#allocation13] ss:$0 sm:$0xff] }
 0x50a   : > { %2614 = vmatpush.bf16.msra.mxu1 %v4290_v18  ;;  %v2065_v24 = vpop.f32.mrf.mxu0 }
 0x50b   : > { %v6437_v43 = vadd.f32 %v5219_v57, %v2064_v8  ;;  %v4359_v8 = vld [vmem:[#allocation15 + $0x98] sm:$0xf0]  ;;  %2844 = vmatpush.bf16.msrb.mxu2 %v4358_v7  ;;  %2565 = vmatpush.bf16.msra.mxu3 %v4286_v63  ;;  %v4325_v7 = vld [vmem:[#allocation15 + $0x8] sm:$0xf] }
 0x50c   : > { %v4362_v57 = vor.u32 %v4618_v23, %v4359_v8  ;;  %v4266_v23 = vor.u32 %v4578_v41, %v4263_v56  ;;  %v4611_v8 = vld [vmem:[#allocation15 + $0x14] sm:$0xf0] }
 0x50d   : > { %2112 = vadd.xlane.f32.xlu2 %v6433_v36  ;;  %v4326_v9 = vor.u32 %v4611_v8, %v4325_v7  ;;  %v6474_v8 = vld [vmem:[%s7104_s29] ss:$0 sm:$0xff]  ;;  %s4516_s29 = sshll.u32 %s7111_s2, 4 }
 0x50e   : > { %2893 = vmatpush.bf16.msra.mxu0 %v4362_v57  ;;  %2615 = vmatpush.bf16.msra.mxu1 %v4282_v45  ;;  %v4610_v57 = vld [vmem:[#allocation15 + $0xc] sm:$0xf] }
 0x50f   : > { %2845 = vmatpush.bf16.msrb.mxu2 %v4350_v40  ;;  %2566 = vmatpush.bf16.msra.mxu3 %v4278_v16  ;;  %v4330_v60 = vor.u32 %v4610_v57, %v4327_v46 }
 0x510   : > { %v2016_v2 = vpop.f32.mrf.mxu3 }
 0x512   : > { %2894 = vmatpush.bf16.msra.mxu0 %v4354_v13  ;;  %2616 = vmatpush.bf16.msra.mxu1 %v4274_v55 }
 0x513   : > { %2846 = vmatpush.bf16.msrb.mxu2 %v4342_v28  ;;  %2567 = vmatpush.bf16.msra.mxu3 %v4270_v19 }
 0x515   : > { %2114 = vadd.xlane.f32.xlu2 %v6437_v43 }
 0x516   : > { %2895 = vmatpush.bf16.msra.mxu0 %v4346_v20  ;;  %2617 = vmatpush.bf16.msra.mxu1 %v4266_v23 }
 0x517   : > { %2847 = vmatpush.bf16.msrb.mxu2 %v4334_v0  ;;  %2568 = vmatpush.bf16.msra.mxu3 %v4262_v48  ;;  %v5220_v48 = vld [vmem:[%s5910_s28 + $0x78] sm:$0xff]  ;;  %s4517_s28 = sshll.u32 %s7112_s16, 5  ;;  %s5481_s16 = scalar_lea.hbm %s7113_s11, 512 }
 0x518   : > { %s3831_s7 = sadd.s32 %s4517_s28, %s4516_s29 }
 0x519   : > { %s4518_s12 = sshll.u32 %s3831_s7, 3 }
 0x51a   : > { %2896 = vmatpush.bf16.msra.mxu0 %v4338_v33 }
 0x51b   : > { %2848 = vmatpush.bf16.msrb.mxu2 %v4326_v9 }
 0x51e   : > { %2897 = vmatpush.bf16.msra.mxu0 %v4330_v60 }
 0x548   : > { %v2174_v30 = vpop.xlane.xlu2 %2173 }
 0x549   : > { %v2205_v32 = vmul.f32 %v2174_v30, %v6364_v62  ;;  %v2066_v30 = vadd.f32 %v2065_v24, %v2016_v2 }
 0x54b   : > { %v2221_v61 = vadd.f32 1e-05, %v2205_v32  ;;  %v6466_v56 = vadd.f32 %v5220_v48, %v2066_v30 }
 0x54d   : > { %5147 = vrsqrt.f32 %v2221_v61  ;;  %vm2243_vm2 = vweird.f32 %v2221_v61 }
 0x550   : > { %v2176_v63 = vpop.xlane.xlu0 %2175  ;;  %v2101_v6 = vpop.xlane.xlu2 %2100 }
 0x551   : > { %v2206_v44 = vmul.f32 %v2176_v63, %v6364_v62  ;;  %v2132_v12 = vmul.f32 %v6364_v62, %v2101_v6 }
 0x553   : > { %v5148_v18 = vpop.eup %5147  ;;  %v2222_v40 = vadd.f32 1e-05, %v2206_v44  ;;  %v6444_v49 = vsub.f32 %v6379_v59, %v2132_v12 }
 0x554   : > { %v2238_v58 = vmul.f32 %v5148_v18, %v2221_v61  ;;  %vm2244_vm1 = vweird.f32 %v5148_v18 }
 0x555   : > { %5149 = vrsqrt.f32 %v2222_v40  ;;  %v2164_v13 = vmul.f32 %v6444_v49, %v6444_v49  ;;  %vm2245_vm3 = vmor %vm2243_vm2, %vm2244_vm1  ;;  %vm2253_vm5 = vweird.f32 %v2222_v40 }
 0x556   : > { %v2239_v5 = vmul.f32 %v5148_v18, %v2238_v58 }
 0x557   : > { %2187 = vadd.xlane.f32.xlu0 %v2164_v13 }
 0x558   : > { %v2240_v15 = vmul.f32 0.5, %v2239_v5  ;;  %v2178_v50 = vpop.xlane.xlu0 %2177  ;;  %v2103_v16 = vpop.xlane.xlu2 %2102 }
 0x559   : > { %v2207_v39 = vmul.f32 %v2178_v50, %v6364_v62  ;;  %v2133_v26 = vmul.f32 %v6364_v62, %v2103_v16 }
 0x55a   : > { %v2241_v21 = vsub.f32 1.5, %v2240_v15 }
 0x55b   : > { %v5150_v45 = vpop.eup %5149  ;;  %v2223_v28 = vadd.f32 1e-05, %v2207_v39  ;;  %v6451_v59 = vsub.f32 %v6389_v34, %v2133_v26 }
 0x55c   : > { %v2242_v29 = vmul.f32 %v5148_v18, %v2241_v21  ;;  %v2248_v3 = vmul.f32 %v5150_v45, %v2222_v40  ;;  %vm2254_vm4 = vweird.f32 %v5150_v45 }
 0x55d   : > { %5151 = vrsqrt.f32 %v2223_v28  ;;  %v2165_v20 = vmul.f32 %v6451_v59, %v6451_v59  ;;  %vm2255_vm6 = vmor %vm2253_vm5, %vm2254_vm4  ;;  %vm2263_vm8 = vweird.f32 %v2223_v28 }
 0x55e   : > { %v2249_v35 = vmul.f32 %v5150_v45, %v2248_v3  ;;  %v2246_v19 = vsel %vm2245_vm3, %v5148_v18, %v2242_v29 }
 0x55f   : > { %2189 = vadd.xlane.f32.xlu0 %v2165_v20  ;;  %v2397_v37 = vmul.f32 %v2246_v19, %v6368_v4 }
 0x560   : > { %v2250_v38 = vmul.f32 0.5, %v2249_v35  ;;  %v2105_v42 = vpop.xlane.xlu0 %2104  ;;  %v2180_v22 = vpop.xlane.xlu1 %2179 }
 0x561   : > { %v2134_v34 = vmul.f32 %v6364_v62, %v2105_v42  ;;  %v2208_v55 = vmul.f32 %v2180_v22, %v6364_v62 }
 0x562   : > { %v2251_v0 = vsub.f32 1.5, %v2250_v38 }
 0x563   : > { %v5152_v47 = vpop.eup %5151  ;;  %v6459_v32 = vsub.f32 %v6397_v54, %v2134_v34  ;;  %v2224_v33 = vadd.f32 1e-05, %v2208_v55  ;;  %v2416_v54 = vmul.f32 %v6461_v25, %v2397_v37 }
 0x564   : > { %v2252_v1 = vmul.f32 %v5150_v45, %v2251_v0  ;;  %v2258_v41 = vmul.f32 %v5152_v47, %v2223_v28  ;;  %vm2264_vm7 = vweird.f32 %v5152_v47 }
 0x565   : > { %5153 = vrsqrt.f32 %v2224_v33  ;;  %v2166_v61 = vmul.f32 %v6459_v32, %v6459_v32  ;;  %v6483_v40 = vadd.f32 %v6474_v8, %v2416_v54  ;;  %vm2265_vm9 = vmor %vm2263_vm8, %vm2264_vm7  ;;  %vm2273_vm11 = vweird.f32 %v2224_v33 }
 0x566   : > { %v2256_v7 = vsel %vm2255_vm6, %v5150_v45, %v2252_v1  ;;  %v2259_v23 = vmul.f32 %v5152_v47, %v2258_v41 }
 0x567   : > { %v2398_v4 = vmul.f32 %v2256_v7, %v6374_v10  ;;  %2191 = vadd.xlane.f32.xlu1 %v2166_v61  ;;  %2116 = vadd.xlane.f32.xlu0 %v6466_v56 }
 0x568   : > { %v2260_v57 = vmul.f32 0.5, %v2259_v23  ;;  %v2107_v46 = vpop.xlane.xlu0 %2106  ;;  %v2182_v9 = vpop.xlane.xlu1 %2181 }
 0x569   : > { %v2135_v60 = vmul.f32 %v6364_v62, %v2107_v46  ;;  %v2209_v63 = vmul.f32 %v2182_v9, %v6364_v62  ;;  %v2417_v6 = vmul.f32 %v6461_v25, %v2398_v4 }
 0x56a   : > { %v2261_v10 = vsub.f32 1.5, %v2260_v57 }
 0x56b   : > { %v5154_v44 = vpop.eup %5153  ;;  %v6480_v12 = vsub.f32 %v6407_v14, %v2135_v60  ;;  %v2225_v18 = vadd.f32 1e-05, %v2209_v63  ;;  %v6486_v58 = vadd.f32 %v6474_v8, %v2417_v6 }
 0x56c   : > { %v2262_v13 = vmul.f32 %v5152_v47, %v2261_v10  ;;  %v2268_v5 = vmul.f32 %v5154_v44, %v2224_v33  ;;  %vm2274_vm10 = vweird.f32 %v5154_v44 }
 0x56d   : > { %5155 = vrsqrt.f32 %v2225_v18  ;;  %v2167_v15 = vmul.f32 %v6480_v12, %v6480_v12  ;;  %v2451_v50 = vpack.c.bf16 %v6486_v58, %v6483_v40  ;;  %vm2275_vm12 = vmor %vm2273_vm11, %vm2274_vm10  ;;  %vm2283_vm14 = vweird.f32 %v2225_v18 }
 0x56e   : > { %v2269_v14 = vmul.f32 %v5154_v44, %v2268_v5  ;;  %v2266_v16 = vsel %vm2265_vm9, %v5152_v47, %v2262_v13 }
 0x56f   : > { %2193 = vadd.xlane.f32.xlu1 %v2167_v15  ;;  %2569 = vmatmul.bf16.vlgmr.msra.gmra.mxu3 %v2451_v50  ;;  %v2399_v28 = vmul.f32 %v2266_v16, %v6384_v11 }
 0x570   : > { %v2270_v39 = vmul.f32 0.5, %v2269_v14  ;;  %2618 = vmatmul.bf16.vlgmr.msra.gmra.mxu1 %v2451_v50  ;;  %2849 = vmatmul.bf16.vlgmr.msrb.gmra.mxu2 %v2451_v50  ;;  %v2109_v26 = vpop.xlane.xlu1 %2108  ;;  %v2184_v21 = vpop.xlane.xlu2 %2183 }
 0x571   : > { %2898 = vmatmul.bf16.vlgmr.msra.gmra.mxu0 %v2451_v50  ;;  %v2136_v45 = vmul.f32 %v6364_v62, %v2109_v26  ;;  %v2210_v29 = vmul.f32 %v2184_v21, %v6364_v62  ;;  %v2418_v34 = vmul.f32 %v6461_v25, %v2399_v28 }
 0x572   : > { %v2271_v3 = vsub.f32 1.5, %v2270_v39 }
 0x573   : > { %v5156_v20 = vpop.eup %5155  ;;  %v6496_v2 = vsub.f32 %v6419_v31, %v2136_v45  ;;  %v2226_v35 = vadd.f32 1e-05, %v2210_v29  ;;  %v6508_v41 = vadd.f32 %v6474_v8, %v2418_v34 }
 0x574   : > { %v2272_v24 = vmul.f32 %v5154_v44, %v2271_v3  ;;  %v2278_v19 = vmul.f32 %v5156_v20, %v2225_v18  ;;  %vm2284_vm13 = vweird.f32 %v5156_v20 }
 0x575   : > { %5157 = vrsqrt.f32 %v2226_v35  ;;  %v2168_v38 = vmul.f32 %v6496_v2, %v6496_v2  ;;  %vm2285_vm15 = vmor %vm2283_vm14, %vm2284_vm13  ;;  %vm2293_vm1 = vweird.f32 %v2226_v35 }
 0x576   : > { %v2276_v42 = vsel %vm2275_vm12, %v5154_v44, %v2272_v24  ;;  %v2279_v22 = vmul.f32 %v5156_v20, %v2278_v19 }
 0x577   : > { %v2400_v30 = vmul.f32 %v2276_v42, %v6394_v27  ;;  %2195 = vadd.xlane.f32.xlu2 %v2168_v38 }
 0x578   : > { %v2280_v11 = vmul.f32 0.5, %v2279_v22  ;;  %v2111_v55 = vpop.xlane.xlu1 %2110  ;;  %v2186_v31 = vpop.xlane.xlu2 %2185 }
 0x579   : > { %v2137_v0 = vmul.f32 %v6364_v62, %v2111_v55  ;;  %v2419_v47 = vmul.f32 %v6461_v25, %v2400_v30 }
 0x57a   : > { %v2281_v37 = vsub.f32 1.5, %v2280_v11 }
 0x57b   : > { %v5158_v33 = vpop.eup %5157  ;;  %v6505_v1 = vsub.f32 %v6429_v17, %v2137_v0  ;;  %v6511_v27 = vadd.f32 %v6474_v8, %v2419_v47 }
 0x57c   : > { %v2282_v61 = vmul.f32 %v5156_v20, %v2281_v37  ;;  %v2288_v48 = vmul.f32 %v5158_v33, %v2226_v35  ;;  %vm2294_vm0 = vweird.f32 %v5158_v33 }
 0x57d   : > { %v2452_v7 = vpack.c.bf16 %v6511_v27, %v6508_v41  ;;  %v2169_v23 = vmul.f32 %v6505_v1, %v6505_v1  ;;  %vm2295_vm2 = vmor %vm2293_vm1, %vm2294_vm0 }
 0x57e   : > { %v2289_v4 = vmul.f32 %v5158_v33, %v2288_v48  ;;  %v2286_v17 = vsel %vm2285_vm15, %v5156_v20, %v2282_v61 }
 0x57f   : > { %2574 = vmatmul.bf16.gmra.mxu3 %v2452_v7  ;;  %2197 = vadd.xlane.f32.xlu0 %v2169_v23  ;;  %v2401_v60 = vmul.f32 %v2286_v17, %v6404_v53 }
 0x580   : > { %v2290_v54 = vmul.f32 0.5, %v2289_v4  ;;  %2623 = vmatmul.bf16.gmra.mxu1 %v2452_v7  ;;  %2854 = vmatmul.bf16.gmra.mxu2 %v2452_v7  ;;  %v2113_v57 = vpop.xlane.xlu2 %2112 }
 0x581   : > { %2903 = vmatmul.bf16.gmra.mxu0 %v2452_v7  ;;  %v2138_v46 = vmul.f32 %v6364_v62, %v2113_v57  ;;  %v2420_v13 = vmul.f32 %v6461_v25, %v2401_v60 }
 0x582   : > { %v2291_v9 = vsub.f32 1.5, %v2290_v54 }
 0x583   : > { %v6520_v63 = vsub.f32 %v6433_v36, %v2138_v46  ;;  %v6532_v50 = vadd.f32 %v6474_v8, %v2420_v13 }
 0x584   : > { %v2292_v6 = vmul.f32 %v5158_v33, %v2291_v9 }
 0x585   : > { %v2170_v10 = vmul.f32 %v6520_v63, %v6520_v63 }
 0x586   : > { %v2296_v44 = vsel %vm2295_vm2, %v5158_v33, %v2292_v6 }
 0x587   : > { %v2402_v18 = vmul.f32 %v2296_v44, %v6414_v51  ;;  %2199 = vadd.xlane.f32.xlu1 %v2170_v10 }
 0x588   : > { %v2115_v5 = vpop.xlane.xlu2 %2114 }
 0x589   : > { %v2139_v15 = vmul.f32 %v6364_v62, %v2115_v5  ;;  %v2421_v53 = vmul.f32 %v6461_v25, %v2402_v18 }
 0x58b   : > { %v6529_v36 = vsub.f32 %v6437_v43, %v2139_v15  ;;  %v6535_v14 = vadd.f32 %v6474_v8, %v2421_v53  ;;  %v2211_v43 = vmul.f32 %v2186_v31, %v6364_v62 }
 0x58d   : > { %v2453_v51 = vpack.c.bf16 %v6535_v14, %v6532_v50  ;;  %v2171_v16 = vmul.f32 %v6529_v36, %v6529_v36  ;;  %v2227_v39 = vadd.f32 1e-05, %v2211_v43 }
 0x58f   : > { %2579 = vmatmul.bf16.gmra.mxu3 %v2453_v51  ;;  %2201 = vadd.xlane.f32.xlu2 %v2171_v16  ;;  %5159 = vrsqrt.f32 %v2227_v39  ;;  %vm2303_vm4 = vweird.f32 %v2227_v39 }
 0x590   : > { %2628 = vmatmul.bf16.gmra.mxu1 %v2453_v51  ;;  %2859 = vmatmul.bf16.gmra.mxu2 %v2453_v51 }
 0x591   : > { %2908 = vmatmul.bf16.gmra.mxu0 %v2453_v51 }
 0x595   : > { %v5160_v26 = vpop.eup %5159 }
 0x596   : > { %v2298_v21 = vmul.f32 %v5160_v26, %v2227_v39  ;;  %vm2304_vm3 = vweird.f32 %v5160_v26 }
 0x597   : > { %vm2305_vm5 = vmor %vm2303_vm4, %vm2304_vm3 }
 0x598   : > { %v2299_v45 = vmul.f32 %v5160_v26, %v2298_v21 }
 0x59a   : > { %v2300_v28 = vmul.f32 0.5, %v2299_v45 }
 0x59c   : > { %v2301_v35 = vsub.f32 1.5, %v2300_v28 }
 0x59e   : > { %v2302_v22 = vmul.f32 %v5160_v26, %v2301_v35 }
 0x5a0   : > { %v2306_v11 = vsel %vm2305_vm5, %v5160_v26, %v2302_v22 }
 0x5a1   : > { %v2403_v48 = vmul.f32 %v2306_v11, %v6424_v52 }
 0x5a3   : > { %v2422_v60 = vmul.f32 %v6461_v25, %v2403_v48 }
 0x5a5   : > { %v6557_v5 = vadd.f32 %v6474_v8, %v2422_v60 }
 0x5ca   : > { %v2188_v29 = vpop.xlane.xlu0 %2187 }
 0x5cb   : > { %v2212_v3 = vmul.f32 %v2188_v29, %v6364_v62 }
 0x5cd   : > { %v2228_v20 = vadd.f32 1e-05, %v2212_v3 }
 0x5cf   : > { %5161 = vrsqrt.f32 %v2228_v20  ;;  %vm2313_vm7 = vweird.f32 %v2228_v20 }
 0x5d2   : > { %v2190_v24 = vpop.xlane.xlu0 %2189 }
 0x5d3   : > { %v2213_v19 = vmul.f32 %v2190_v24, %v6364_v62 }
 0x5d5   : > { %v5162_v38 = vpop.eup %5161  ;;  %v2229_v42 = vadd.f32 1e-05, %v2213_v19 }
 0x5d6   : > { %v2308_v30 = vmul.f32 %v5162_v38, %v2228_v20  ;;  %vm2314_vm6 = vweird.f32 %v5162_v38 }
 0x5d7   : > { %5163 = vrsqrt.f32 %v2229_v42  ;;  %vm2315_vm8 = vmor %vm2313_vm7, %vm2314_vm6  ;;  %vm2323_vm10 = vweird.f32 %v2229_v42 }
 0x5d8   : > { %v2309_v34 = vmul.f32 %v5162_v38, %v2308_v30 }
 0x5da   : > { %v2310_v55 = vmul.f32 0.5, %v2309_v34  ;;  %v2192_v31 = vpop.xlane.xlu1 %2191  ;;  %v2117_v0 = vpop.xlane.xlu0 %2116 }
 0x5db   : > { %v2214_v47 = vmul.f32 %v2192_v31, %v6364_v62  ;;  %v2140_v37 = vmul.f32 %v6364_v62, %v2117_v0 }
 0x5dc   : > { %v2311_v33 = vsub.f32 1.5, %v2310_v55 }
 0x5dd   : > { %v5164_v61 = vpop.eup %5163  ;;  %v2230_v7 = vadd.f32 1e-05, %v2214_v47  ;;  %v6548_v23 = vsub.f32 %v6466_v56, %v2140_v37 }
 0x5de   : > { %v2312_v4 = vmul.f32 %v5162_v38, %v2311_v33  ;;  %v2318_v17 = vmul.f32 %v5164_v61, %v2229_v42  ;;  %vm2324_vm9 = vweird.f32 %v5164_v61 }
 0x5df   : > { %5165 = vrsqrt.f32 %v2230_v7  ;;  %v2172_v54 = vmul.f32 %v6548_v23, %v6548_v23  ;;  %vm2325_vm11 = vmor %vm2323_vm10, %vm2324_vm9  ;;  %vm2333_vm13 = vweird.f32 %v2230_v7 }
 0x5e0   : > { %v2316_v57 = vsel %vm2315_vm8, %v5162_v38, %v2312_v4  ;;  %v2319_v46 = vmul.f32 %v5164_v61, %v2318_v17  ;;  %v4601_v4 = vld [vmem:[#allocation16 + $0x38] sm:$0xff] }
 0x5e1   : > { %v2404_v9 = vmul.f32 %v2316_v57, %v6444_v49  ;;  %2203 = vadd.xlane.f32.xlu0 %v2172_v54  ;;  %3309 = vmatpush.bf16.msra.mxu2 %v4601_v4 }
 0x5e2   : > { %v2320_v52 = vmul.f32 0.5, %v2319_v46  ;;  %v2194_v6 = vpop.xlane.xlu1 %2193 }
 0x5e3   : > { %v2215_v56 = vmul.f32 %v2194_v6, %v6364_v62  ;;  %v2423_v10 = vmul.f32 %v6461_v25, %v2404_v9 }
 0x5e4   : > { %v2321_v44 = vsub.f32 1.5, %v2320_v52 }
 0x5e5   : > { %v5166_v18 = vpop.eup %5165  ;;  %v2231_v13 = vadd.f32 1e-05, %v2215_v56  ;;  %v6560_v15 = vadd.f32 %v6474_v8, %v2423_v10  ;;  %v4641_v10 = vld [vmem:[#allocation16 + $0xf8] sm:$0xff] }
 0x5e6   : > { %v2328_v53 = vmul.f32 %v5166_v18, %v2230_v7  ;;  %v2322_v49 = vmul.f32 %v5164_v61, %v2321_v44  ;;  %vm2334_vm12 = vweird.f32 %v5166_v18  ;;  %v4633_v7 = vld [vmem:[#allocation16 + $0xb8] sm:$0xff]  ;;  %3164 = vmatpush.bf16.msrb.mxu1 %v4641_v10  ;;  %v4628_v10 = vld [vmem:[#allocation16 + $0x90] sm:$0xff] }
 0x5e7   : > { %5167 = vrsqrt.f32 %v2231_v13  ;;  %v2454_v51 = vpack.c.bf16 %v6560_v15, %v6557_v5  ;;  %vm2335_vm14 = vmor %vm2333_vm13, %vm2334_vm12  ;;  %vm2343_vm0 = vweird.f32 %v2231_v13  ;;  %3115 = vmatpush.bf16.msrb.mxu3 %v4633_v7  ;;  %v4609_v44 = vld [vmem:[#allocation16 + $0x78] sm:$0xff] }
 0x5e8   : > { %v2329_v16 = vmul.f32 %v5166_v18, %v2328_v53  ;;  %v2326_v26 = vsel %vm2325_vm11, %v5164_v61, %v2322_v49  ;;  %v4600_v53 = vld [vmem:[#allocation16 + $0x30] sm:$0xff]  ;;  %3358 = vmatpush.bf16.msrb.mxu0 %v4609_v44 }
 0x5e9   : > { %2584 = vmatmul.bf16.gmra.mxu3 %v2454_v51  ;;  %2633 = vmatmul.bf16.gmra.mxu1 %v2454_v51  ;;  %v2405_v20 = vmul.f32 %v2326_v26, %v6451_v59  ;;  %v4631_v26 = vld [vmem:[#allocation16 + $0xa8] sm:$0xff]  ;;  %v4596_v44 = vld [vmem:[#allocation16 + $0x10] sm:$0xff] }
 0x5ea   : > { %v2330_v43 = vmul.f32 0.5, %v2329_v16  ;;  %2864 = vmatmul.bf16.gmra.mxu2 %v2454_v51  ;;  %2913 = vmatmul.bf16.gmra.mxu0 %v2454_v51  ;;  %v2196_v39 = vpop.xlane.xlu2 %2195  ;;  %v4640_v16 = vld [vmem:[#allocation16 + $0xf0] sm:$0xff] }
 0x5eb   : > { %v2216_v21 = vmul.f32 %v2196_v39, %v6364_v62  ;;  %v2424_v30 = vmul.f32 %v6461_v25, %v2405_v20  ;;  %3310 = vmatpush.bf16.msra.mxu2 %v4600_v53  ;;  %3165 = vmatpush.bf16.msrb.mxu1 %v4640_v16  ;;  %v4639_v20 = vld [vmem:[#allocation16 + $0xe8] sm:$0xff]  ;;  %v4604_v53 = vld [vmem:[#allocation16 + $0x50] sm:$0xff] }
 0x5ec   : > { %v2331_v45 = vsub.f32 1.5, %v2330_v43 }
 0x5ed   : > { %v5168_v29 = vpop.eup %5167  ;;  %v2232_v3 = vadd.f32 1e-05, %v2216_v21 }
 0x5ee   : > { %v2332_v28 = vmul.f32 %v5166_v18, %v2331_v45  ;;  %v2338_v35 = vmul.f32 %v5168_v29, %v2231_v13  ;;  %vm2344_vm15 = vweird.f32 %v5168_v29  ;;  %v4599_v45 = vld [vmem:[#allocation16 + $0x28] sm:$0xff] }
 0x5ef   : > { %5169 = vrsqrt.f32 %v2232_v3  ;;  %vm6581_vm1 = vmor %vm2343_vm0, %vm2344_vm15  ;;  %vm2353_vm3 = vweird.f32 %v2232_v3  ;;  %3311 = vmatpush.bf16.msra.mxu2 %v4599_v45  ;;  %3166 = vmatpush.bf16.msrb.mxu1 %v4639_v20  ;;  %v4635_v20 = vld [vmem:[#allocation16 + $0xc8] sm:$0xff] }
 0x5f0   : > { %v2336_v24 = vsel %vm2335_vm14, %v5166_v18, %v2332_v28  ;;  %v2339_v19 = vmul.f32 %v5168_v29, %v2338_v35  ;;  %v4632_v18 = vld [vmem:[#allocation16 + $0xb0] sm:$0xff]  ;;  %v4607_v35 = vld [vmem:[#allocation16 + $0x68] sm:$0xff] }
 0x5f1   : > { %v2406_v38 = vmul.f32 %v2336_v24, %v6459_v32  ;;  %v6576_v32 = vadd.f32 %v6474_v8, %v2424_v30  ;;  %3116 = vmatpush.bf16.msrb.mxu3 %v4632_v18  ;;  %v4630_v24 = vld [vmem:[#allocation16 + $0xa0] sm:$0xff]  ;;  %v4636_v18 = vld [vmem:[#allocation16 + $0xd0] sm:$0xff] }
 0x5f2   : > { %v2340_v42 = vmul.f32 0.5, %v2339_v19  ;;  %v2198_v22 = vpop.xlane.xlu0 %2197  ;;  %v4598_v30 = vld [vmem:[#allocation16 + $0x20] sm:$0xff] }
 0x5f3   : > { %v2217_v34 = vmul.f32 %v2198_v22, %v6364_v62  ;;  %v2425_v11 = vmul.f32 %v6461_v25, %v2406_v38  ;;  %3312 = vmatpush.bf16.msra.mxu2 %v4598_v30 }
 0x5f4   : > { %v2341_v55 = vsub.f32 1.5, %v2340_v42 }
 0x5f5   : > { %v5170_v31 = vpop.eup %5169  ;;  %v6570_v59 = vadd.f32 1e-05, %v2217_v34  ;;  %v6573_v0 = vadd.f32 %v6474_v8, %v2425_v11  ;;  %3117 = vmatpush.bf16.msrb.mxu3 %v4631_v26  ;;  %v4638_v34 = vld [vmem:[#allocation16 + $0xe0] sm:$0xff]  ;;  %v6622_v26 = vpop.f32.mrf.mxu3 }
 0x5f6   : > { %v2342_v47 = vmul.f32 %v5168_v29, %v2341_v55  ;;  %v2348_v37 = vmul.f32 %v5170_v31, %v2232_v3  ;;  %vm2354_vm2 = vweird.f32 %v5170_v31  ;;  %v4606_v11 = vld [vmem:[#allocation16 + $0x60] sm:$0xff]  ;;  %3167 = vmatpush.bf16.msrb.mxu1 %v4638_v34 }
 0x5f7   : > { %5171 = vrsqrt.f32 %v6570_v59  ;;  %v2455_v61 = vpack.c.bf16 %v6573_v0, %v6576_v32  ;;  %vm2355_vm4 = vmor %vm2353_vm3, %vm2354_vm2  ;;  %vm2363_vm6 = vweird.f32 %v6570_v59 }
 0x5f8   : > { %v2349_v33 = vmul.f32 %v5170_v31, %v2348_v37  ;;  %v2346_v17 = vsel %vm6581_vm1, %v5168_v29, %v2342_v47 }
 0x5f9   : > { %2589 = vmatmul.bf16.gmra.mxu3 %v2455_v61  ;;  %2638 = vmatmul.bf16.gmra.mxu1 %v2455_v61  ;;  %v2407_v52 = vmul.f32 %v2346_v17, %v6480_v12  ;;  %v4608_v12 = vld [vmem:[#allocation16 + $0x70] sm:$0xff] }
 0x5fa   : > { %v2350_v54 = vmul.f32 0.5, %v2349_v33  ;;  %v2200_v57 = vpop.xlane.xlu1 %2199  ;;  %2869 = vmatmul.bf16.gmra.mxu2 %v2455_v61  ;;  %2918 = vmatmul.bf16.gmra.mxu0 %v2455_v61 }
 0x5fb   : > { %v2218_v9 = vmul.f32 %v2200_v57, %v6364_v62  ;;  %v2426_v39 = vmul.f32 %v6461_v25, %v2407_v52  ;;  %3359 = vmatpush.bf16.msrb.mxu0 %v4608_v12  ;;  %3118 = vmatpush.bf16.msrb.mxu3 %v4630_v24  ;;  %v4637_v52 = vld [vmem:[#allocation16 + $0xd8] sm:$0xff]  ;;  %v6620_v12 = vpop.f32.mrf.mxu1  ;;  %v4603_v24 = vld [vmem:[#allocation16 + $0x48] sm:$0xff] }
 0x5fc   : > { %v2351_v46 = vsub.f32 1.5, %v2350_v54  ;;  %3168 = vmatpush.bf16.msrb.mxu1 %v4637_v52 }
 0x5fd   : > { %v5172_v60 = vpop.eup %5171  ;;  %v2234_v13 = vadd.f32 1e-05, %v2218_v9  ;;  %v6594_v28 = vadd.f32 %v6474_v8, %v2426_v39  ;;  %v4629_v9 = vld [vmem:[#allocation16 + $0x98] sm:$0xff]  ;;  %v6618_v39 = vpop.f32.mrf.mxu2 }
 0x5fe   : > { %v2352_v6 = vmul.f32 %v5170_v31, %v2351_v46  ;;  %v2358_v56 = vmul.f32 %v5172_v60, %v6570_v59  ;;  %vm2364_vm5 = vweird.f32 %v5172_v60 }
 0x5ff   : > { %5173 = vrsqrt.f32 %v2234_v13  ;;  %3360 = vmatpush.bf16.msrb.mxu0 %v4607_v35  ;;  %vm2365_vm7 = vmor %vm2363_vm6, %vm2364_vm5  ;;  %vm2373_vm9 = vweird.f32 %v2234_v13  ;;  %3119 = vmatpush.bf16.msrb.mxu3 %v4629_v9 }
 0x600   : > { %v2356_v49 = vsel %vm2355_vm4, %v5170_v31, %v2352_v6  ;;  %v2359_v51 = vmul.f32 %v5172_v60, %v2358_v56  ;;  %v4605_v6 = vld [vmem:[#allocation16 + $0x58] sm:$0xff]  ;;  %3169 = vmatpush.bf16.msrb.mxu1 %v4636_v18 }
 0x601   : > { %v2408_v43 = vmul.f32 %v2356_v49, %v6496_v2 }
 0x602   : > { %v2360_v21 = vmul.f32 0.5, %v2359_v51 }
 0x603   : > { %v2427_v29 = vmul.f32 %v6461_v25, %v2408_v43  ;;  %3361 = vmatpush.bf16.msrb.mxu0 %v4606_v11  ;;  %3120 = vmatpush.bf16.msrb.mxu3 %v4628_v10  ;;  %v6616_v43 = vpop.f32.mrf.mxu0  ;;  %v2621_v34 = vpop.f32.mrf.mxu1 }
 0x604   : > { %v2361_v3 = vsub.f32 1.5, %v2360_v21  ;;  %3170 = vmatpush.bf16.msrb.mxu1 %v4635_v20  ;;  %v2572_v11 = vpop.f32.mrf.mxu3 }
 0x605   : > { %v6597_v2 = vadd.f32 %v6474_v8, %v2427_v29  ;;  %v5174_v19 = vpop.eup %5173  ;;  %v4627_v29 = vld [vmem:[#allocation16 + $0x88] sm:$0xff] }
 0x606   : > { %v2362_v42 = vmul.f32 %v5172_v60, %v2361_v3  ;;  %v2368_v22 = vmul.f32 %v5174_v19, %v2234_v13  ;;  %vm2374_vm8 = vweird.f32 %v5174_v19  ;;  %v4595_v3 = vld [vmem:[#allocation16 + $0x8] sm:$0xff] }
 0x607   : > { %v2456_v38 = vpack.c.bf16 %v6597_v2, %v6594_v28  ;;  %vm2375_vm10 = vmor %vm2373_vm9, %vm2374_vm8  ;;  %3362 = vmatpush.bf16.msrb.mxu0 %v4605_v6  ;;  %3121 = vmatpush.bf16.msrb.mxu3 %v4627_v29 }
 0x608   : > { %v2369_v55 = vmul.f32 %v5174_v19, %v2368_v22  ;;  %v2366_v31 = vsel %vm2365_vm7, %v5172_v60, %v2362_v42  ;;  %v4597_v60 = vld [vmem:[#allocation16 + $0x18] sm:$0xff]  ;;  %v2852_v42 = vpop.f32.mrf.mxu2 }
 0x609   : > { %2594 = vmatmul.bf16.gmra.mxu3 %v2456_v38  ;;  %2643 = vmatmul.bf16.gmra.mxu1 %v2456_v38  ;;  %v2409_v33 = vmul.f32 %v2366_v31, %v6505_v1  ;;  %v2202_v1 = vpop.xlane.xlu2 %2201  ;;  %v4634_v31 = vld [vmem:[#allocation16 + $0xc0] sm:$0xff] }
 0x60a   : > { %2874 = vmatmul.bf16.gmra.mxu2 %v2456_v38  ;;  %2923 = vmatmul.bf16.gmra.mxu0 %v2456_v38  ;;  %v2370_v47 = vmul.f32 0.5, %v2369_v55  ;;  %v4626_v55 = vld [vmem:[#allocation16 + $0x80] sm:$0xff] }
 0x60b   : > { %v2428_v7 = vmul.f32 %v6461_v25, %v2409_v33  ;;  %3313 = vmatpush.bf16.msra.mxu2 %v4597_v60  ;;  %3363 = vmatpush.bf16.msrb.mxu0 %v4604_v53  ;;  %v2901_v38 = vpop.f32.mrf.mxu0  ;;  %v4602_v33 = vld [vmem:[#allocation16 + $0x40] sm:$0xff] }
 0x60c   : > { %v2371_v37 = vsub.f32 1.5, %v2370_v47  ;;  %3122 = vmatpush.bf16.msrb.mxu3 %v4626_v55  ;;  %3171 = vmatpush.bf16.msrb.mxu1 %v4634_v31  ;;  %v2575_v9 = vpop.f32.mrf.mxu3 }
 0x60d   : > { %v6607_v17 = vadd.f32 %v6474_v8, %v2428_v7 }
 0x60e   : > { %v2372_v61 = vmul.f32 %v5174_v19, %v2371_v37  ;;  %v4594_v37 = vld [vmem:[#allocation16] sm:$0xff] }
 0x60f   : > { %3314 = vmatpush.bf16.msra.mxu2 %v4596_v44  ;;  %3364 = vmatpush.bf16.msrb.mxu0 %v4603_v24  ;;  %v2755_v44 = vld [vmem:[%s7107_s10 + $0x2] sm:$0x3] }
 0x610   : > { %v2376_v48 = vsel %vm2375_vm10, %v5174_v19, %v2372_v61  ;;  %v6642_v53 = vperm.slane %v2755_v44, 1 }
 0x611   : > { %v2410_v59 = vmul.f32 %v2376_v48, %v6520_v63  ;;  %v2219_v63 = vmul.f32 %v2202_v1, %v6364_v62  ;;  %v2855_v1 = vpop.f32.mrf.mxu2 }
 0x612   : > { %v2900_v20 = vadd.f32 %v6616_v43, %v6642_v53 }
 0x613   : > { %v2429_v4 = vmul.f32 %v6461_v25, %v2410_v59  ;;  %v2235_v46 = vadd.f32 1e-05, %v2219_v63  ;;  %3315 = vmatpush.bf16.msra.mxu2 %v4595_v3  ;;  %3365 = vmatpush.bf16.msrb.mxu0 %v4602_v33 }
 0x614   : > { %v2940_v31 = vmax.f32 %v2900_v20, 0.0 }
 0x615   : > { %v6610_v54 = vadd.f32 %v6474_v8, %v2429_v4  ;;  %5175 = vrsqrt.f32 %v2235_v46  ;;  %vm2383_vm12 = vweird.f32 %v2235_v46 }
 0x617   : > { %v2457_v57 = vpack.c.bf16 %v6610_v54, %v6607_v17  ;;  %3316 = vmatpush.bf16.msra.mxu2 %v4594_v37 }
 0x619   : > { %2599 = vmatmul.bf16.gmra.mxu3 %v2457_v57  ;;  %2648 = vmatmul.bf16.gmra.mxu1 %v2457_v57  ;;  %v2857_v18 = vpop.f32.mrf.mxu2 }
 0x61a   : > { %2879 = vmatmul.bf16.gmra.mxu2 %v2457_v57  ;;  %2928 = vmatmul.bf16.gmra.mxu0 %v2457_v57  ;;  %v2904_v57 = vpop.f32.mrf.mxu0 }
 0x61b   : > { %v5176_v56 = vpop.eup %5175 }
 0x61c   : > { %v2378_v13 = vmul.f32 %v5176_v56, %v2235_v46  ;;  %vm2384_vm11 = vweird.f32 %v5176_v56  ;;  %v2624_v46 = vpop.f32.mrf.mxu1 }
 0x61d   : > { %vm2385_vm13 = vmor %vm2383_vm12, %vm2384_vm11 }
 0x61e   : > { %v2379_v49 = vmul.f32 %v5176_v56, %v2378_v13 }
 0x620   : > { %v2380_v45 = vmul.f32 0.5, %v2379_v49  ;;  %v6644_v49 = vperm.slane %v2755_v44, 0 }
 0x622   : > { %v2381_v35 = vsub.f32 1.5, %v2380_v45  ;;  %v2853_v45 = vadd.f32 %v2852_v42, %v6644_v49  ;;  %v2856_v44 = vadd.f32 %v2855_v1, %v6644_v49 }
 0x624   : > { %v2382_v22 = vmul.f32 %v5176_v56, %v2381_v35  ;;  %v2626_v13 = vpop.f32.mrf.mxu1  ;;  %v2851_v35 = vadd.f32 %v6618_v39, %v6644_v49 }
 0x626   : > { %v2386_v61 = vsel %vm2385_vm13, %v5176_v56, %v2382_v22 }
 0x627   : > { %v2411_v7 = vmul.f32 %v2386_v61, %v6529_v36 }
 0x629   : > { %v2430_v52 = vmul.f32 %v6461_v25, %v2411_v7 }
 0x62b   : > { %v6629_v56 = vadd.f32 %v6474_v8, %v2430_v52 }
 0x654   : > { %v2204_v51 = vpop.xlane.xlu0 %2203 }
 0x655   : > { %v2220_v16 = vmul.f32 %v2204_v51, %v6364_v62 }
 0x657   : > { %v2236_v21 = vadd.f32 1e-05, %v2220_v16 }
 0x659   : > { %5177 = vrsqrt.f32 %v2236_v21  ;;  %vm2393_vm15 = vweird.f32 %v2236_v21 }
 0x65f   : > { %v5178_v19 = vpop.eup %5177 }
 0x660   : > { %v2388_v30 = vmul.f32 %v5178_v19, %v2236_v21  ;;  %vm2394_vm14 = vweird.f32 %v5178_v19  ;;  %v2902_v21 = vadd.f32 %v2901_v38, %v6642_v53  ;;  %v2941_v38 = vmax.f32 %v2853_v45, 0.0 }
 0x661   : > { %vm2395_vm0 = vmor %vm2393_vm15, %vm2394_vm14 }
 0x662   : > { %v2389_v47 = vmul.f32 %v5178_v19, %v2388_v30  ;;  %v2942_v22 = vmax.f32 %v2902_v21, 0.0 }
 0x664   : > { %v2390_v48 = vmul.f32 0.5, %v2389_v47  ;;  %v2629_v47 = vpop.f32.mrf.mxu1  ;;  %v2972_v61 = vpack.c.bf16 %v2942_v22, %v2940_v31 }
 0x666   : > { %v2391_v59 = vsub.f32 1.5, %v2390_v48 }
 0x668   : > { %v2392_v4 = vmul.f32 %v5178_v19, %v2391_v59 }
 0x66a   : > { %v2396_v63 = vsel %vm2395_vm0, %v5178_v19, %v2392_v4  ;;  %v2858_v4 = vadd.f32 %v2857_v18, %v6644_v49  ;;  %v2943_v18 = vmax.f32 %v2856_v44, 0.0 }
 0x66b   : > { %v2412_v60 = vmul.f32 %v2396_v63, %v6548_v23  ;;  %v2906_v23 = vpop.f32.mrf.mxu0 }
 0x66c   : > { %v2907_v7 = vadd.f32 %v2906_v23, %v6642_v53  ;;  %v2631_v63 = vpop.f32.mrf.mxu1 }
 0x66d   : > { %v2431_v6 = vmul.f32 %v6461_v25, %v2412_v60  ;;  %v2475_v25 = vld [vmem:[%s7107_s10] sm:$0x3] }
 0x66e   : > { %v6646_v51 = vperm.slane %v2475_v25, 1  ;;  %v6648_v16 = vperm.slane %v2475_v25, 0  ;;  %v2946_v45 = vmax.f32 %v2907_v7, 0.0 }
 0x66f   : > { %v6632_v10 = vadd.f32 %v6474_v8, %v2431_v6  ;;  %v2577_v8 = vpop.f32.mrf.mxu3 }
 0x670   : > { %v2622_v29 = vadd.f32 %v2621_v34, %v6646_v51  ;;  %v2573_v3 = vadd.f32 %v2572_v11, %v6648_v16  ;;  %v2620_v24 = vadd.f32 %v6620_v12, %v6646_v51  ;;  %v2571_v19 = vadd.f32 %v6622_v26, %v6648_v16  ;;  %v2860_v34 = vpop.f32.mrf.mxu2 }
 0x671   : > { %v2458_v36 = vpack.c.bf16 %v6632_v10, %v6629_v56  ;;  %v2939_v11 = vmax.f32 %v2851_v35, 0.0  ;;  %v2627_v52 = vadd.f32 %v2626_v13, %v6646_v51  ;;  %v2578_v6 = vadd.f32 %v2577_v8, %v6648_v16 }
 0x672   : > { %v2662_v30 = vmax.f32 %v2622_v29, 0.0  ;;  %v2661_v42 = vmax.f32 %v2573_v3, 0.0  ;;  %v2660_v43 = vmax.f32 %v2620_v24, 0.0  ;;  %v2659_v33 = vmax.f32 %v2571_v19, 0.0 }
 0x673   : > { %2604 = vmatmul.bf16.gmra.mxu3 %v2458_v36  ;;  %2653 = vmatmul.bf16.gmra.mxu1 %v2458_v36  ;;  %v2909_v55 = vpop.f32.mrf.mxu0  ;;  %v2971_v39 = vpack.c.bf16 %v2941_v38, %v2939_v11  ;;  %v2625_v25 = vadd.f32 %v2624_v46, %v6646_v51  ;;  %v2576_v21 = vadd.f32 %v2575_v9, %v6648_v16  ;;  %v2945_v29 = vmax.f32 %v2858_v4, 0.0 }
 0x674   : > { %2884 = vmatmul.bf16.gmra.mxu2 %v2458_v36  ;;  %2933 = vmatmul.bf16.gmra.mxu0 %v2458_v36  ;;  %v2692_v48 = vpack.c.bf16 %v2662_v30, %v2660_v43  ;;  %v2691_v59 = vpack.c.bf16 %v2661_v42, %v2659_v33  ;;  %v2905_v36 = vadd.f32 %v2904_v57, %v6642_v53  ;;  %v2666_v3 = vmax.f32 %v2627_v52, 0.0  ;;  %v2634_v22 = vpop.f32.mrf.mxu1 }
 0x675   : > { %v2665_v23 = vmax.f32 %v2578_v6, 0.0  ;;  %v2664_v35 = vmax.f32 %v2625_v25, 0.0  ;;  %v2663_v24 = vmax.f32 %v2576_v21, 0.0  ;;  %v2973_v38 = vpack.c.bf16 %v2945_v29, %v2943_v18 }
 0x676   : > { %v2944_v20 = vmax.f32 %v2905_v36, 0.0  ;;  %v2632_v42 = vadd.f32 %v2631_v63, %v6646_v51  ;;  %v2910_v33 = vadd.f32 %v2909_v55, %v6642_v53 }
 0x677   : > { %v2580_v37 = vpop.f32.mrf.mxu3  ;;  %v2693_v30 = vpack.c.bf16 %v2665_v23, %v2663_v24  ;;  %v2694_v1 = vpack.c.bf16 %v2666_v3, %v2664_v35  ;;  %v2635_v24 = vadd.f32 %v2634_v22, %v6646_v51 }
 0x678   : > { %v2862_v26 = vpop.f32.mrf.mxu2  ;;  %v2974_v57 = vpack.c.bf16 %v2946_v45, %v2944_v20  ;;  %v2581_v7 = vadd.f32 %v2580_v37, %v6648_v16  ;;  %v2670_v52 = vmax.f32 %v2632_v42, 0.0  ;;  %v2948_v6 = vmax.f32 %v2910_v33, 0.0 }
 0x679   : > { %v2863_v9 = vadd.f32 %v2862_v26, %v6644_v49 }
 0x67b   : > { %v2911_v12 = vpop.f32.mrf.mxu0 }
 0x67c   : > { %v2912_v46 = vadd.f32 %v2911_v12, %v6642_v53  ;;  %v2949_v12 = vmax.f32 %v2863_v9, 0.0 }
 0x67e   : > { %v2950_v4 = vmax.f32 %v2912_v46, 0.0 }
 0x67f   : > { %v2582_v60 = vpop.f32.mrf.mxu3 }
 0x680   : > { %v2865_v13 = vpop.f32.mrf.mxu2  ;;  %v2583_v31 = vadd.f32 %v2582_v60, %v6648_v16  ;;  %v2667_v60 = vmax.f32 %v2581_v7, 0.0  ;;  %v2976_v25 = vpack.c.bf16 %v2950_v4, %v2948_v6 }
 0x681   : > { %v2866_v35 = vadd.f32 %v2865_v13, %v6644_v49 }
 0x682   : > { %v2669_v26 = vmax.f32 %v2583_v31, 0.0 }
 0x683   : > { %3123 = vmatmul.bf16.vlgmr.msrb.gmra.mxu3 %v2971_v39  ;;  %3172 = vmatmul.bf16.vlgmr.msrb.gmra.mxu1 %v2972_v61  ;;  %v2914_v19 = vpop.f32.mrf.mxu0  ;;  %v2861_v61 = vadd.f32 %v2860_v34, %v6644_v49  ;;  %v2636_v39 = vpop.f32.mrf.mxu1 }
 0x684   : > { %3317 = vmatmul.bf16.vlgmr.msra.gmra.mxu2 %v2691_v59  ;;  %3366 = vmatmul.bf16.vlgmr.msrb.gmra.mxu0 %v2692_v48  ;;  %v2630_v59 = vadd.f32 %v2629_v47, %v6646_v51  ;;  %v2695_v21 = vpack.c.bf16 %v2669_v26, %v2667_v60  ;;  %v2637_v23 = vadd.f32 %v2636_v39, %v6646_v51 }
 0x685   : > { %v2947_v63 = vmax.f32 %v2861_v61, 0.0  ;;  %v2915_v18 = vadd.f32 %v2914_v19, %v6642_v53  ;;  %v2672_v61 = vmax.f32 %v2635_v24, 0.0 }
 0x686   : > { %v2668_v36 = vmax.f32 %v2630_v59, 0.0 }
 0x687   : > { %v2585_v8 = vpop.f32.mrf.mxu3  ;;  %v2975_v44 = vpack.c.bf16 %v2949_v12, %v2947_v63  ;;  %v2952_v31 = vmax.f32 %v2915_v18, 0.0 }
 0x688   : > { %v2867_v43 = vpop.f32.mrf.mxu2  ;;  %v2696_v55 = vpack.c.bf16 %v2670_v52, %v2668_v36 }
 0x689   : > { %v2868_v3 = vadd.f32 %v2867_v43, %v6644_v49 }
 0x68b   : > { %v2916_v11 = vpop.f32.mrf.mxu0  ;;  %v2639_v47 = vpop.f32.mrf.mxu1 }
 0x68c   : > { %v2917_v29 = vadd.f32 %v2916_v11, %v6642_v53  ;;  %v2951_v11 = vmax.f32 %v2866_v35, 0.0  ;;  %v2640_v60 = vadd.f32 %v2639_v47, %v6646_v51 }
 0x68f   : > { %v2587_v48 = vpop.f32.mrf.mxu3 }
 0x690   : > { %v2870_v45 = vpop.f32.mrf.mxu2  ;;  %v2588_v20 = vadd.f32 %v2587_v48, %v6648_v16 }
 0x691   : > { %v2871_v36 = vadd.f32 %v2870_v45, %v6644_v49 }
 0x692   : > { %v2673_v46 = vmax.f32 %v2588_v20, 0.0  ;;  %v2676_v20 = vmax.f32 %v2640_v60, 0.0 }
 0x693   : > { %3128 = vmatmul.bf16.gmra.mxu3 %v2973_v38  ;;  %3177 = vmatmul.bf16.gmra.mxu1 %v2974_v57  ;;  %v2919_v34 = vpop.f32.mrf.mxu0  ;;  %v2586_v38 = vadd.f32 %v2585_v8, %v6648_v16  ;;  %v2954_v57 = vmax.f32 %v2917_v29, 0.0  ;;  %v2641_v43 = vpop.f32.mrf.mxu1 }
 0x694   : > { %3322 = vmatmul.bf16.gmra.mxu2 %v2693_v30  ;;  %3371 = vmatmul.bf16.gmra.mxu0 %v2694_v1  ;;  %v2953_v30 = vmax.f32 %v2868_v3, 0.0  ;;  %v2674_v1 = vmax.f32 %v2637_v23, 0.0  ;;  %v2642_v26 = vadd.f32 %v2641_v43, %v6646_v51  ;;  %v2920_v63 = vadd.f32 %v2919_v34, %v6642_v53 }
 0x695   : > { %v2671_v39 = vmax.f32 %v2586_v38, 0.0  ;;  %v2978_v19 = vpack.c.bf16 %v2954_v57, %v2952_v31  ;;  %v2955_v23 = vmax.f32 %v2871_v36, 0.0 }
 0x696   : > { %v2977_v48 = vpack.c.bf16 %v2953_v30, %v2951_v11  ;;  %v2698_v13 = vpack.c.bf16 %v2674_v1, %v2672_v61  ;;  %v2956_v3 = vmax.f32 %v2920_v63, 0.0 }
 0x697   : > { %v2590_v37 = vpop.f32.mrf.mxu3  ;;  %v2697_v59 = vpack.c.bf16 %v2673_v46, %v2671_v39 }
 0x698   : > { %v2872_v42 = vpop.f32.mrf.mxu2 }
 0x699   : > { %v2873_v4 = vadd.f32 %v2872_v42, %v6644_v49 }
 0x69b   : > { %v2921_v9 = vpop.f32.mrf.mxu0  ;;  %v2644_v12 = vpop.f32.mrf.mxu1 }
 0x69c   : > { %v2922_v7 = vadd.f32 %v2921_v9, %v6642_v53  ;;  %v2645_v11 = vadd.f32 %v2644_v12, %v6646_v51 }
 0x69f   : > { %v2592_v33 = vpop.f32.mrf.mxu3 }
 0x6a0   : > { %v2875_v8 = vpop.f32.mrf.mxu2  ;;  %v2593_v6 = vadd.f32 %v2592_v33, %v6648_v16 }
 0x6a1   : > { %v2876_v31 = vadd.f32 %v2875_v8, %v6644_v49 }
 0x6a2   : > { %v2677_v29 = vmax.f32 %v2593_v6, 0.0  ;;  %v2680_v6 = vmax.f32 %v2645_v11, 0.0 }
 0x6a3   : > { %3133 = vmatmul.bf16.gmra.mxu3 %v2975_v44  ;;  %3182 = vmatmul.bf16.gmra.mxu1 %v2976_v25  ;;  %v2924_v22 = vpop.f32.mrf.mxu0  ;;  %v2591_v44 = vadd.f32 %v2590_v37, %v6648_v16  ;;  %v2958_v25 = vmax.f32 %v2922_v7, 0.0  ;;  %v2646_v1 = vpop.f32.mrf.mxu1 }
 0x6a4   : > { %3327 = vmatmul.bf16.gmra.mxu2 %v2695_v21  ;;  %3376 = vmatmul.bf16.gmra.mxu0 %v2696_v55  ;;  %v2957_v21 = vmax.f32 %v2873_v4, 0.0  ;;  %v2678_v55 = vmax.f32 %v2642_v26, 0.0  ;;  %v2647_v46 = vadd.f32 %v2646_v1, %v6646_v51  ;;  %v2925_v42 = vadd.f32 %v2924_v22, %v6642_v53 }
 0x6a5   : > { %v2675_v18 = vmax.f32 %v2591_v44, 0.0  ;;  %v2980_v35 = vpack.c.bf16 %v2958_v25, %v2956_v3  ;;  %v2959_v26 = vmax.f32 %v2876_v31, 0.0 }
 0x6a6   : > { %v2979_v24 = vpack.c.bf16 %v2957_v21, %v2955_v23  ;;  %v2700_v38 = vpack.c.bf16 %v2678_v55, %v2676_v20  ;;  %v2960_v4 = vmax.f32 %v2925_v42, 0.0 }
 0x6a7   : > { %v2595_v52 = vpop.f32.mrf.mxu3  ;;  %v2699_v57 = vpack.c.bf16 %v2677_v29, %v2675_v18 }
 0x6a8   : > { %v2877_v34 = vpop.f32.mrf.mxu2  ;;  %v2596_v43 = vadd.f32 %v2595_v52, %v6648_v16 }
 0x6a9   : > { %v2878_v37 = vadd.f32 %v2877_v34, %v6644_v49 }
 0x6aa   : > { %v2679_v63 = vmax.f32 %v2596_v43, 0.0 }
 0x6ab   : > { %v2926_v30 = vpop.f32.mrf.mxu0 }
 0x6ac   : > { %v2927_v47 = vadd.f32 %v2926_v30, %v6642_v53 }
 0x6ae   : > { %v2962_v39 = vmax.f32 %v2927_v47, 0.0 }
 0x6af   : > { %v2597_v45 = vpop.f32.mrf.mxu3 }
 0x6b0   : > { %v2598_v9 = vadd.f32 %v2597_v45, %v6648_v16  ;;  %v2880_v61 = vpop.f32.mrf.mxu2  ;;  %v2982_v36 = vpack.c.bf16 %v2962_v39, %v2960_v4 }
 0x6b1   : > { %v2881_v20 = vadd.f32 %v2880_v61, %v6644_v49 }
 0x6b2   : > { %v2681_v7 = vmax.f32 %v2598_v9, 0.0 }
 0x6b3   : > { %3138 = vmatmul.bf16.gmra.mxu3 %v2977_v48  ;;  %3187 = vmatmul.bf16.gmra.mxu1 %v2978_v19  ;;  %v2929_v33 = vpop.f32.mrf.mxu0  ;;  %v2961_v48 = vmax.f32 %v2878_v37, 0.0  ;;  %v2649_v19 = vpop.f32.mrf.mxu1  ;;  %v2963_v1 = vmax.f32 %v2881_v20, 0.0 }
 0x6b4   : > { %3332 = vmatmul.bf16.gmra.mxu2 %v2697_v59  ;;  %3381 = vmatmul.bf16.gmra.mxu0 %v2698_v13  ;;  %v2682_v13 = vmax.f32 %v2647_v46, 0.0  ;;  %v2701_v8 = vpack.c.bf16 %v2681_v7, %v2679_v63  ;;  %v2930_v23 = vadd.f32 %v2929_v33, %v6642_v53  ;;  %v2650_v18 = vadd.f32 %v2649_v19, %v6646_v51 }
 0x6b5   : > { %v2981_v22 = vpack.c.bf16 %v2961_v48, %v2959_v26 }
 0x6b6   : > { %v2702_v60 = vpack.c.bf16 %v2682_v13, %v2680_v6  ;;  %v2964_v34 = vmax.f32 %v2930_v23, 0.0  ;;  %v2684_v45 = vmax.f32 %v2650_v18, 0.0 }
 0x6b7   : > { %v2600_v59 = vpop.f32.mrf.mxu3 }
 0x6b8   : > { %v2882_v52 = vpop.f32.mrf.mxu2 }
 0x6b9   : > { %v2883_v55 = vadd.f32 %v2882_v52, %v6644_v49 }
 0x6bb   : > { %v2931_v12 = vpop.f32.mrf.mxu0  ;;  %v2651_v44 = vpop.f32.mrf.mxu1 }
 0x6bc   : > { %v2932_v21 = vadd.f32 %v2931_v12, %v6642_v53  ;;  %v2652_v29 = vadd.f32 %v2651_v44, %v6646_v51 }
 0x6bf   : > { %v2602_v25 = vpop.f32.mrf.mxu3 }
 0x6c0   : > { %v2603_v3 = vadd.f32 %v2602_v25, %v6648_v16 }
 0x6c2   : > { %v2685_v30 = vmax.f32 %v2603_v3, 0.0 }
 0x6c3   : > { %3143 = vmatmul.bf16.gmra.mxu3 %v2979_v24  ;;  %3192 = vmatmul.bf16.gmra.mxu1 %v2980_v35  ;;  %v2601_v35 = vadd.f32 %v2600_v59, %v6648_v16  ;;  %v2966_v24 = vmax.f32 %v2932_v21, 0.0 }
 0x6c4   : > { %3337 = vmatmul.bf16.gmra.mxu2 %v2699_v57  ;;  %3386 = vmatmul.bf16.gmra.mxu0 %v2700_v38  ;;  %v2965_v38 = vmax.f32 %v2883_v55, 0.0  ;;  %v2686_v57 = vmax.f32 %v2652_v29, 0.0 }
 0x6c5   : > { %v2683_v47 = vmax.f32 %v2601_v35, 0.0  ;;  %v2984_v37 = vpack.c.bf16 %v2966_v24, %v2964_v34 }
 0x6c6   : > { %v2983_v46 = vpack.c.bf16 %v2965_v38, %v2963_v1  ;;  %v2704_v9 = vpack.c.bf16 %v2686_v57, %v2684_v45 }
 0x6c7   : > { %v2703_v42 = vpack.c.bf16 %v2685_v30, %v2683_v47 }
 0x6d3   : > { %3148 = vmatmul.bf16.gmra.mxu3 %v2981_v22  ;;  %3197 = vmatmul.bf16.gmra.mxu1 %v2982_v36 }
 0x6d4   : > { %3342 = vmatmul.bf16.gmra.mxu2 %v2701_v8  ;;  %3391 = vmatmul.bf16.gmra.mxu0 %v2702_v60 }
 0x6e3   : > { %3153 = vmatmul.bf16.gmra.mxu3 %v2983_v46  ;;  %3202 = vmatmul.bf16.gmra.mxu1 %v2984_v37 }
 0x6e4   : > { %3347 = vmatmul.bf16.gmra.mxu2 %v2703_v42  ;;  %3396 = vmatmul.bf16.gmra.mxu0 %v2704_v9 }
 0x6f0   : > { %v2654_v31 = vpop.f32.mrf.mxu1 }
 0x6f1   : > { %v2934_v11 = vpop.f32.mrf.mxu0  ;;  %v2655_v33 = vadd.f32 %v2654_v31, %v6646_v51 }
 0x6f2   : > { %v2935_v39 = vadd.f32 %v2934_v11, %v6642_v53 }
 0x6f3   : > { %v2688_v7 = vmax.f32 %v2655_v33, 0.0 }
 0x6f4   : > { %v2968_v26 = vmax.f32 %v2935_v39, 0.0 }
 0x6f6   : > { %v2605_v43 = vpop.f32.mrf.mxu3 }
 0x6f7   : > { %v2885_v61 = vpop.f32.mrf.mxu2  ;;  %v2606_v63 = vadd.f32 %v2605_v43, %v6648_v16 }
 0x6f8   : > { %v2656_v48 = vpop.f32.mrf.mxu1  ;;  %v2886_v22 = vadd.f32 %v2885_v61, %v6644_v49 }
 0x6f9   : > { %v2657_v19 = vadd.f32 %v2656_v48, %v6646_v51  ;;  %v2936_v59 = vpop.f32.mrf.mxu0 }
 0x6fa   : > { %v2937_v13 = vadd.f32 %v2936_v59, %v6642_v53  ;;  %v2687_v53 = vmax.f32 %v2606_v63, 0.0  ;;  %v2967_v55 = vmax.f32 %v2886_v22, 0.0 }
 0x6fb   : > { %v2690_v4 = vmax.f32 %v2657_v19, 0.0 }
 0x6fc   : > { %v2970_v6 = vmax.f32 %v2937_v13, 0.0 }
 0x6fd   : > { %v2706_v36 = vpack.c.bf16 %v2690_v4, %v2688_v7 }
 0x6fe   : > { %v2986_v60 = vpack.c.bf16 %v2970_v6, %v2968_v26  ;;  %v2607_v8 = vpop.f32.mrf.mxu3 }
 0x6ff   : > { %v2608_v12 = vadd.f32 %v2607_v8, %v6648_v16  ;;  %v2887_v52 = vpop.f32.mrf.mxu2  ;;  %3401 = vmatmul.bf16.gmra.mxu0 %v2706_v36 }
 0x700   : > { %v2888_v51 = vadd.f32 %v2887_v52, %v6644_v49  ;;  %3207 = vmatmul.bf16.gmra.mxu1 %v2986_v60  ;;  %v3173_v44 = vpop.f32.mrf.mxu1  ;;  %v6721_v49 = vld [vmem:[%s7108_s20] ss:$0 sm:$0xff]  ;;  %s3833_s20 = scalar_lea.hbm %s7113_s11, %s4518_s12 }
 0x701   : > { %v2689_v25 = vmax.f32 %v2608_v12, 0.0  ;;  %v3367_v21 = vpop.f32.mrf.mxu0  ;;  %s3836_s27 = sshll.u32 %s3833_s20, 4  ;;  %s3837_s27 = int_to_ptr.hbm [resolvable:$true] %s3836_s27 }
 0x702   : > { %v2969_v29 = vmax.f32 %v2888_v51, 0.0  ;;  %s5475_s8 = sshra.s32 %s3837_s27, 4  ;;  %s5476_s8 = int_to_ptr.hbm [resolvable:$true] %s5475_s8 }
 0x703   : > { %v2705_v3 = vpack.c.bf16 %v2689_v25, %v2687_v53  ;;  %s5477_s21 = scalar_lea.hbm %s5476_s8, 128  ;;  %p5482_p5 = scmp.lt.s32.totalorder %s5476_s8, %s7113_s11 }
 0x704   : > { %v2985_v23 = vpack.c.bf16 %v2969_v29, %v2967_v55  ;;  %p5478_p1 = scmp.ne.s32.totalorder %s5476_s8, %s5477_s21  ;;  %p5483_p9 = scmp.lt.s32.totalorder %s5481_s16, %s5477_s21 }
 0x705   : > { %3352 = vmatmul.bf16.gmra.mxu2 %v2705_v3 }
 0x706   : > { %3158 = vmatmul.bf16.gmra.mxu3 %v2985_v23  ;;  %v3124_v20 = vpop.f32.mrf.mxu3  ;;  %p5479_p13 = pnand %p5478_p1, %p5849_p0  ;;  %p5484_p7 = por %p5483_p9, %p5482_p5 }
 0x707   : > { %v3174_v18 = vadd.f32 %v3173_v44, %v3124_v20  ;;  %v3318_v35 = vpop.f32.mrf.mxu2 }
 0x708   : > { %v3175_v24 = vpop.f32.mrf.mxu1  ;;  %p5480_p4 = pneg %p5479_p13 }
 0x709   : > { %v3319_v16 = vadd.f32 %v3318_v35, %v3174_v18  ;;  %v3369_v38 = vpop.f32.mrf.mxu0 }
 0x70a   : > { %p5485_p10 = pnand %p5484_p7, %p5480_p4 }
 0x70b   : > { %v3368_v57 = vadd.f32 %v3367_v21, %v3319_v16 }
 0x70d   : > { %v3411_v30 = vadd.f32 %v6721_v49, %v3368_v57 }
 0x70e   : > { %v3126_v34 = vpop.f32.mrf.mxu3 }
 0x70f   : > { %v3176_v1 = vadd.f32 %v3175_v24, %v3126_v34  ;;  %v3320_v45 = vpop.f32.mrf.mxu2  ;;  %v6725_v47 = vadd.f32 %v3411_v30, %v6483_v40 }
 0x710   : > { %v3178_v37 = vpop.f32.mrf.mxu1 }
 0x711   : > { %v3321_v46 = vadd.f32 %v3320_v45, %v3176_v1  ;;  %v3372_v9 = vpop.f32.mrf.mxu0  ;;  %3445 = vadd.xlane.f32.xlu1 %v6725_v47 }
 0x713   : > { %v3370_v42 = vadd.f32 %v3369_v38, %v3321_v46 }
 0x715   : > { %v3412_v31 = vadd.f32 %v6721_v49, %v3370_v42 }
 0x716   : > { %v3129_v11 = vpop.f32.mrf.mxu3 }
 0x717   : > { %v3179_v43 = vadd.f32 %v3178_v37, %v3129_v11  ;;  %v3323_v33 = vpop.f32.mrf.mxu2  ;;  %v6730_v61 = vadd.f32 %v3412_v31, %v6486_v58 }
 0x718   : > { %v3180_v39 = vpop.f32.mrf.mxu1 }
 0x719   : > { %v3324_v48 = vadd.f32 %v3323_v33, %v3179_v43  ;;  %v3374_v19 = vpop.f32.mrf.mxu0  ;;  %3447 = vadd.xlane.f32.xlu2 %v6730_v61 }
 0x71b   : > { %v3373_v40 = vadd.f32 %v3372_v9, %v3324_v48 }
 0x71d   : > { %v3413_v59 = vadd.f32 %v6721_v49, %v3373_v40 }
 0x71e   : > { %v3131_v13 = vpop.f32.mrf.mxu3 }
 0x71f   : > { %v3181_v7 = vadd.f32 %v3180_v39, %v3131_v13  ;;  %v3325_v4 = vpop.f32.mrf.mxu2  ;;  %v6735_v26 = vadd.f32 %v3413_v59, %v6508_v41 }
 0x720   : > { %v3183_v6 = vpop.f32.mrf.mxu1 }
 0x721   : > { %v3326_v63 = vadd.f32 %v3325_v4, %v3181_v7  ;;  %v3377_v36 = vpop.f32.mrf.mxu0  ;;  %3449 = vadd.xlane.f32.xlu0 %v6735_v26 }
 0x723   : > { %v3375_v58 = vadd.f32 %v3374_v19, %v3326_v63 }
 0x725   : > { %v3414_v22 = vadd.f32 %v6721_v49, %v3375_v58 }
 0x726   : > { %v3134_v60 = vpop.f32.mrf.mxu3 }
 0x727   : > { %v3184_v8 = vadd.f32 %v3183_v6, %v3134_v60  ;;  %v3328_v12 = vpop.f32.mrf.mxu2  ;;  %v6740_v52 = vadd.f32 %v3414_v22, %v6511_v27 }
 0x728   : > { %v3185_v51 = vpop.f32.mrf.mxu1 }
 0x729   : > { %v3329_v44 = vadd.f32 %v3328_v12, %v3184_v8  ;;  %v3379_v53 = vpop.f32.mrf.mxu0  ;;  %3451 = vadd.xlane.f32.xlu1 %v6740_v52 }
 0x72b   : > { %v3378_v41 = vadd.f32 %v3377_v36, %v3329_v44 }
 0x72d   : > { %v3415_v25 = vadd.f32 %v6721_v49, %v3378_v41 }
 0x72e   : > { %v3136_v21 = vpop.f32.mrf.mxu3 }
 0x72f   : > { %v3186_v55 = vadd.f32 %v3185_v51, %v3136_v21  ;;  %v3330_v29 = vpop.f32.mrf.mxu2  ;;  %v6745_v3 = vadd.f32 %v3415_v25, %v6532_v50 }
 0x730   : > { %v3188_v23 = vpop.f32.mrf.mxu1 }
 0x731   : > { %v3331_v20 = vadd.f32 %v3330_v29, %v3186_v55  ;;  %v3382_v18 = vpop.f32.mrf.mxu0  ;;  %3453 = vadd.xlane.f32.xlu2 %v6745_v3 }
 0x733   : > { %v3380_v27 = vadd.f32 %v3379_v53, %v3331_v20 }
 0x735   : > { %v3416_v35 = vadd.f32 %v6721_v49, %v3380_v27 }
 0x736   : > { %v3139_v24 = vpop.f32.mrf.mxu3 }
 0x737   : > { %v3189_v16 = vadd.f32 %v3188_v23, %v3139_v24  ;;  %v3333_v38 = vpop.f32.mrf.mxu2  ;;  %v6750_v57 = vadd.f32 %v3416_v35, %v6535_v14 }
 0x738   : > { %v3190_v30 = vpop.f32.mrf.mxu1 }
 0x739   : > { %v3334_v34 = vadd.f32 %v3333_v38, %v3189_v16  ;;  %v3384_v1 = vpop.f32.mrf.mxu0  ;;  %3455 = vadd.xlane.f32.xlu0 %v6750_v57 }
 0x73b   : > { %v3383_v50 = vadd.f32 %v3382_v18, %v3334_v34 }
 0x73d   : > { %v3417_v45 = vadd.f32 %v6721_v49, %v3383_v50 }
 0x73e   : > { %v3141_v37 = vpop.f32.mrf.mxu3 }
 0x73f   : > { %v3191_v46 = vadd.f32 %v3190_v30, %v3141_v37  ;;  %v3335_v9 = vpop.f32.mrf.mxu2  ;;  %v6755_v42 = vadd.f32 %v3417_v45, %v6557_v5 }
 0x740   : > { %v3193_v31 = vpop.f32.mrf.mxu1 }
 0x741   : > { %v3336_v11 = vadd.f32 %v3335_v9, %v3191_v46  ;;  %v3387_v43 = vpop.f32.mrf.mxu0  ;;  %3457 = vadd.xlane.f32.xlu1 %v6755_v42 }
 0x743   : > { %v3385_v14 = vadd.f32 %v3384_v1, %v3336_v11 }
 0x745   : > { %v3418_v33 = vadd.f32 %v6721_v49, %v3385_v14 }
 0x746   : > { %v3144_v39 = vpop.f32.mrf.mxu3 }
 0x747   : > { %v3194_v48 = vadd.f32 %v3193_v31, %v3144_v39  ;;  %v3338_v19 = vpop.f32.mrf.mxu2  ;;  %v6760_v40 = vadd.f32 %v3418_v33, %v6560_v15 }
 0x748   : > { %v3195_v59 = vpop.f32.mrf.mxu1 }
 0x749   : > { %v3339_v13 = vadd.f32 %v3338_v19, %v3194_v48  ;;  %3459 = vadd.xlane.f32.xlu2 %v6760_v40  ;;  %v3389_v5 = vpop.f32.mrf.mxu0 }
 0x74b   : > { %v3388_v7 = vadd.f32 %v3387_v43, %v3339_v13 }
 0x74d   : > { %v3419_v4 = vadd.f32 %v6721_v49, %v3388_v7 }
 0x74e   : > { %v3146_v6 = vpop.f32.mrf.mxu3 }
 0x74f   : > { %v3196_v63 = vadd.f32 %v3195_v59, %v3146_v6  ;;  %v3340_v36 = vpop.f32.mrf.mxu2  ;;  %v6765_v58 = vadd.f32 %v3419_v4, %v6576_v32 }
 0x750   : > { %v3198_v22 = vpop.f32.mrf.mxu1 }
 0x751   : > { %v3341_v60 = vadd.f32 %v3340_v36, %v3196_v63  ;;  %3461 = vadd.xlane.f32.xlu0 %v6765_v58  ;;  %v3392_v8 = vpop.f32.mrf.mxu0 }
 0x753   : > { %v3390_v15 = vadd.f32 %v3389_v5, %v3341_v60 }
 0x755   : > { %v3420_v12 = vadd.f32 %v6721_v49, %v3390_v15 }
 0x756   : > { %v3149_v51 = vpop.f32.mrf.mxu3 }
 0x757   : > { %v3199_v44 = vadd.f32 %v3198_v22, %v3149_v51  ;;  %v3343_v53 = vpop.f32.mrf.mxu2  ;;  %v6770_v41 = vadd.f32 %v3420_v12, %v6573_v0 }
 0x758   : > { %v3200_v21 = vpop.f32.mrf.mxu1 }
 0x759   : > { %v3344_v25 = vadd.f32 %v3343_v53, %v3199_v44  ;;  %3463 = vadd.xlane.f32.xlu1 %v6770_v41  ;;  %v3394_v29 = vpop.f32.mrf.mxu0 }
 0x75b   : > { %v3393_v32 = vadd.f32 %v3392_v8, %v3344_v25 }
 0x75d   : > { %v3421_v55 = vadd.f32 %v6721_v49, %v3393_v32 }
 0x75e   : > { %v3151_v23 = vpop.f32.mrf.mxu3 }
 0x75f   : > { %v3201_v20 = vadd.f32 %v3200_v21, %v3151_v23  ;;  %v3345_v18 = vpop.f32.mrf.mxu2  ;;  %v6775_v27 = vadd.f32 %v3421_v55, %v6594_v28 }
 0x760   : > { %v3203_v0 = vpop.f32.mrf.mxu1 }
 0x761   : > { %v3346_v35 = vadd.f32 %v3345_v18, %v3201_v20  ;;  %3465 = vadd.xlane.f32.xlu2 %v6775_v27  ;;  %v3397_v50 = vpop.f32.mrf.mxu0 }
 0x763   : > { %v3395_v24 = vadd.f32 %v3394_v29, %v3346_v35 }
 0x765   : > { %v3422_v16 = vadd.f32 %v6721_v49, %v3395_v24 }
 0x766   : > { %v3154_v38 = vpop.f32.mrf.mxu3 }
 0x767   : > { %v3204_v30 = vadd.f32 %v3203_v0, %v3154_v38  ;;  %v3348_v34 = vpop.f32.mrf.mxu2  ;;  %v6780_v1 = vadd.f32 %v3422_v16, %v6597_v2 }
 0x768   : > { %v3205_v46 = vpop.f32.mrf.mxu1 }
 0x769   : > { %v3349_v45 = vadd.f32 %v3348_v34, %v3204_v30  ;;  %3467 = vadd.xlane.f32.xlu0 %v6780_v1  ;;  %v3399_v33 = vpop.f32.mrf.mxu0 }
 0x76b   : > { %v3398_v37 = vadd.f32 %v3397_v50, %v3349_v45 }
 0x76d   : > { %v3423_v28 = vadd.f32 %v6721_v49, %v3398_v37 }
 0x76e   : > { %v3156_v9 = vpop.f32.mrf.mxu3 }
 0x76f   : > { %v3206_v31 = vadd.f32 %v3205_v46, %v3156_v9  ;;  %v6785_v11 = vadd.f32 %v3423_v28, %v6607_v17  ;;  %v3350_v43 = vpop.f32.mrf.mxu2 }
 0x771   : > { %v3351_v14 = vadd.f32 %v3350_v43, %v3206_v31  ;;  %3469 = vadd.xlane.f32.xlu1 %v6785_v11 }
 0x773   : > { %v3400_v2 = vadd.f32 %v3399_v33, %v3351_v14 }
 0x775   : > { %v3424_v39 = vadd.f32 %v6721_v49, %v3400_v2 }
 0x777   : > { %v6790_v48 = vadd.f32 %v3424_v39, %v6610_v54 }
 0x779   : > { %3471 = vadd.xlane.f32.xlu2 %v6790_v48 }
 0x77c   : > { %v3402_v63 = vpop.f32.mrf.mxu0 }
 0x77d   : > { %v3208_v13 = vpop.f32.mrf.mxu1 }
 0x784   : > { %v3446_v19 = vpop.xlane.xlu1 %3445  ;;  %v3404_v25 = vpop.f32.mrf.mxu0 }
 0x785   : > { %v3477_v59 = vmul.f32 %v3446_v19, %v6364_v62  ;;  %v3210_v15 = vpop.f32.mrf.mxu1 }
 0x787   : > { %v6795_v17 = vsub.f32 %v6725_v47, %v3477_v59 }
 0x788   : > { %v3353_v7 = vpop.f32.mrf.mxu2 }
 0x789   : > { %v3159_v5 = vpop.f32.mrf.mxu3  ;;  %v3509_v4 = vmul.f32 %v6795_v17, %v6795_v17 }
 0x78a   : > { %v3209_v6 = vadd.f32 %v3208_v13, %v3159_v5 }
 0x78b   : > { %3525 = vadd.xlane.f32.xlu2 %v3509_v4 }
 0x78c   : > { %v3354_v36 = vadd.f32 %v3353_v7, %v3209_v6  ;;  %v3448_v22 = vpop.xlane.xlu2 %3447 }
 0x78d   : > { %v3478_v12 = vmul.f32 %v3448_v22, %v6364_v62 }
 0x78e   : > { %v3403_v54 = vadd.f32 %v3402_v63, %v3354_v36 }
 0x78f   : > { %v6806_v21 = vsub.f32 %v6730_v61, %v3478_v12 }
 0x790   : > { %v3425_v60 = vadd.f32 %v6721_v49, %v3403_v54  ;;  %v3355_v44 = vpop.f32.mrf.mxu2 }
 0x791   : > { %v3161_v8 = vpop.f32.mrf.mxu3 }
 0x792   : > { %v3211_v51 = vadd.f32 %v3210_v15, %v3161_v8  ;;  %v6802_v47 = vadd.f32 %v3425_v60, %v6629_v56  ;;  %v3510_v56 = vmul.f32 %v6806_v21, %v6806_v21 }
 0x794   : > { %v3356_v53 = vadd.f32 %v3355_v44, %v3211_v51  ;;  %3473 = vadd.xlane.f32.xlu0 %v6802_v47  ;;  %v3450_v55 = vpop.xlane.xlu0 %3449 }
 0x795   : > { %v3479_v23 = vmul.f32 %v3450_v55, %v6364_v62 }
 0x796   : > { %v3405_v32 = vadd.f32 %v3404_v25, %v3356_v53 }
 0x797   : > { %v6818_v61 = vsub.f32 %v6735_v26, %v3479_v23 }
 0x798   : > { %v3426_v29 = vadd.f32 %v6721_v49, %v3405_v32 }
 0x79a   : > { %v6811_v20 = vadd.f32 %v3426_v29, %v6632_v10  ;;  %v3511_v10 = vmul.f32 %v6818_v61, %v6818_v61 }
 0x79c   : > { %3475 = vadd.xlane.f32.xlu1 %v6811_v20  ;;  %3527 = vadd.xlane.f32.xlu0 %v3510_v56  ;;  %v3452_v18 = vpop.xlane.xlu1 %3451 }
 0x79d   : > { %v3480_v35 = vmul.f32 %v3452_v18, %v6364_v62 }
 0x79f   : > { %v6821_v24 = vsub.f32 %v6740_v52, %v3480_v35 }
 0x7a1   : > { %v3512_v49 = vmul.f32 %v6821_v24, %v6821_v24 }
 0x7a3   : > { %3531 = vadd.xlane.f32.xlu2 %v3512_v49 }
 0x7a4   : > { %3529 = vadd.xlane.f32.xlu1 %v3511_v10  ;;  %v3454_v0 = vpop.xlane.xlu2 %3453 }
 0x7a5   : > { %v3481_v16 = vmul.f32 %v3454_v0, %v6364_v62 }
 0x7a7   : > { %v6829_v38 = vsub.f32 %v6745_v3, %v3481_v16  ;;  %v6902_v16 = vld [vmem:[%s7109_s5] ss:$0 sm:$0xff]  ;;  %s3820_s5 = scalar_lea.sflag [#allocation6], %s5906_s15 }
 0x7a9   : > { %v3513_v26 = vmul.f32 %v6829_v38, %v6829_v38 }
 0x7ab   : > { %3533 = vadd.xlane.f32.xlu0 %v3513_v26 }
 0x7ac   : > { %v3456_v52 = vpop.xlane.xlu0 %3455 }
 0x7ad   : > { %v3482_v30 = vmul.f32 %v3456_v52, %v6364_v62 }
 0x7af   : > { %v6835_v34 = vsub.f32 %v6750_v57, %v3482_v30  ;;  %v6909_v30 = vld [vmem:[%s7110_s4] ss:$0 sm:$0xff] }
 0x7b1   : > { %v3514_v50 = vmul.f32 %v6835_v34, %v6835_v34 }
 0x7b3   : > { %3535 = vadd.xlane.f32.xlu1 %v3514_v50 }
 0x7b4   : > { %v3458_v45 = vpop.xlane.xlu1 %3457 }
 0x7b5   : > { %v3483_v37 = vmul.f32 %v3458_v45, %v6364_v62 }
 0x7b7   : > { %v6841_v3 = vsub.f32 %v6755_v42, %v3483_v37 }
 0x7b9   : > { %v3515_v28 = vmul.f32 %v6841_v3, %v6841_v3 }
 0x7bb   : > { %3537 = vadd.xlane.f32.xlu2 %v3515_v28 }
 0x7bc   : > { %v3460_v46 = vpop.xlane.xlu2 %3459 }
 0x7bd   : > { %v3484_v9 = vmul.f32 %v3460_v46, %v6364_v62 }
 0x7bf   : > { %v6847_v57 = vsub.f32 %v6760_v40, %v3484_v9 }
 0x7c1   : > { %v3516_v31 = vmul.f32 %v6847_v57, %v6847_v57 }
 0x7c3   : > { %3539 = vadd.xlane.f32.xlu0 %v3516_v31 }
 0x7c4   : > { %v3462_v43 = vpop.xlane.xlu0 %3461 }
 0x7c5   : > { %v3485_v14 = vmul.f32 %v3462_v43, %v6364_v62 }
 0x7c7   : > { %v6853_v42 = vsub.f32 %v6765_v58, %v3485_v14 }
 0x7c9   : > { %v3517_v33 = vmul.f32 %v6853_v42, %v6853_v42 }
 0x7cb   : > { %3541 = vadd.xlane.f32.xlu1 %v3517_v33 }
 0x7cc   : > { %v3464_v2 = vpop.xlane.xlu1 %3463 }
 0x7cd   : > { %v3486_v39 = vmul.f32 %v3464_v2, %v6364_v62 }
 0x7cf   : > { %v6859_v40 = vsub.f32 %v6770_v41, %v3486_v39 }
 0x7d1   : > { %v3518_v19 = vmul.f32 %v6859_v40, %v6859_v40 }
 0x7d3   : > { %3543 = vadd.xlane.f32.xlu2 %v3518_v19 }
 0x7d4   : > { %v3466_v59 = vpop.xlane.xlu2 %3465 }
 0x7d5   : > { %v3487_v13 = vmul.f32 %v3466_v59, %v6364_v62 }
 0x7d7   : > { %v6865_v58 = vsub.f32 %v6775_v27, %v3487_v13 }
 0x7d9   : > { %v3519_v5 = vmul.f32 %v6865_v58, %v6865_v58 }
 0x7db   : > { %3545 = vadd.xlane.f32.xlu0 %v3519_v5 }
 0x7dc   : > { %v3468_v7 = vpop.xlane.xlu0 %3467 }
 0x7dd   : > { %v3488_v4 = vmul.f32 %v3468_v7, %v6364_v62 }
 0x7df   : > { %v6871_v41 = vsub.f32 %v6780_v1, %v3488_v4 }
 0x7e1   : > { %v3520_v6 = vmul.f32 %v6871_v41, %v6871_v41 }
 0x7e3   : > { %3547 = vadd.xlane.f32.xlu1 %v3520_v6 }
 0x7e4   : > { %v3470_v63 = vpop.xlane.xlu1 %3469 }
 0x7e5   : > { %v3489_v36 = vmul.f32 %v3470_v63, %v6364_v62 }
 0x7e7   : > { %v6877_v27 = vsub.f32 %v6785_v11, %v3489_v36 }
 0x7e9   : > { %v3521_v54 = vmul.f32 %v6877_v27, %v6877_v27 }
 0x7eb   : > { %3549 = vadd.xlane.f32.xlu2 %v3521_v54 }
 0x7ec   : > { %v3472_v22 = vpop.xlane.xlu2 %3471 }
 0x7ed   : > { %v3490_v60 = vmul.f32 %v3472_v22, %v6364_v62 }
 0x7ef   : > { %v6883_v1 = vsub.f32 %v6790_v48, %v3490_v60 }
 0x7f1   : > { %v3522_v15 = vmul.f32 %v6883_v1, %v6883_v1 }
 0x7f3   : > { %3551 = vadd.xlane.f32.xlu0 %v3522_v15 }
 0x7fe   : > { %v3526_v8 = vpop.xlane.xlu2 %3525 }
 0x7ff   : > { %v3557_v12 = vmul.f32 %v3526_v8, %v6364_v62 }
 0x801   : > { %v3573_v51 = vadd.f32 1e-05, %v3557_v12 }
 0x803   : > { %5179 = vrsqrt.f32 %v3573_v51  ;;  %vm3595_vm2 = vweird.f32 %v3573_v51 }
 0x807   : > { %v3474_v11 = vpop.xlane.xlu0 %3473 }
 0x808   : > { %v3491_v44 = vmul.f32 %v3474_v11, %v6364_v62 }
 0x809   : > { %v5180_v53 = vpop.eup %5179 }
 0x80a   : > { %v3590_v25 = vmul.f32 %v5180_v53, %v3573_v51  ;;  %v6890_v32 = vsub.f32 %v6802_v47, %v3491_v44  ;;  %vm3596_vm1 = vweird.f32 %v5180_v53 }
 0x80b   : > { %vm3597_vm3 = vmor %vm3595_vm2, %vm3596_vm1 }
 0x80c   : > { %v3591_v55 = vmul.f32 %v5180_v53, %v3590_v25  ;;  %v3523_v48 = vmul.f32 %v6890_v32, %v6890_v32 }
 0x80e   : > { %v3592_v29 = vmul.f32 0.5, %v3591_v55  ;;  %3553 = vadd.xlane.f32.xlu1 %v3523_v48 }
 0x80f   : > { %v3476_v23 = vpop.xlane.xlu1 %3475  ;;  %v3528_v56 = vpop.xlane.xlu0 %3527 }
 0x810   : > { %v3593_v18 = vsub.f32 1.5, %v3592_v29  ;;  %v3492_v35 = vmul.f32 %v3476_v23, %v6364_v62  ;;  %v3558_v49 = vmul.f32 %v3528_v56, %v6364_v62 }
 0x812   : > { %v3594_v10 = vmul.f32 %v5180_v53, %v3593_v18  ;;  %v6897_v0 = vsub.f32 %v6811_v20, %v3492_v35  ;;  %v3574_v47 = vadd.f32 1e-05, %v3558_v49 }
 0x814   : > { %v3598_v26 = vsel %vm3597_vm3, %v5180_v53, %v3594_v10  ;;  %5181 = vrsqrt.f32 %v3574_v47  ;;  %v3524_v52 = vmul.f32 %v6897_v0, %v6897_v0  ;;  %vm3605_vm5 = vweird.f32 %v3574_v47 }
 0x815   : > { %v3749_v20 = vmul.f32 %v3598_v26, %v6795_v17 }
 0x816   : > { %3555 = vadd.xlane.f32.xlu2 %v3524_v52  ;;  %v3532_v50 = vpop.xlane.xlu2 %3531 }
 0x817   : > { %v3768_v45 = vmul.f32 %v6902_v16, %v3749_v20  ;;  %v3560_v37 = vmul.f32 %v3532_v50, %v6364_v62  ;;  %v3530_v28 = vpop.xlane.xlu1 %3529 }
 0x818   : > { %v3559_v46 = vmul.f32 %v3530_v28, %v6364_v62 }
 0x819   : > { %v3787_v9 = vadd.f32 %v6909_v30, %v3768_v45  ;;  %v3576_v31 = vadd.f32 1e-05, %v3560_v37 }
 0x81a   : > { %v5182_v43 = vpop.eup %5181  ;;  %v3575_v14 = vadd.f32 1e-05, %v3559_v46 }
 0x81b   : > { %3803 = vst [vmem:[%s5940_s14] sm:$0xff] %v3787_v9  ;;  %v3600_v33 = vmul.f32 %v5182_v43, %v3574_v47  ;;  %5183 = vrsqrt.f32 %v3576_v31  ;;  %vm3606_vm4 = vweird.f32 %v5182_v43  ;;  %vm3625_vm9 = vweird.f32 %v3576_v31 }
 0x81c   : > { %5185 = vrsqrt.f32 %v3575_v14  ;;  %vm3607_vm6 = vmor %vm3605_vm5, %vm3606_vm4  ;;  %vm3615_vm11 = vweird.f32 %v3575_v14 }
 0x81d   : > { %v3601_v2 = vmul.f32 %v5182_v43, %v3600_v33 }
 0x81e   : > { %v3534_v17 = vpop.xlane.xlu0 %3533 }
 0x81f   : > { %v3602_v39 = vmul.f32 0.5, %v3601_v2  ;;  %v3561_v19 = vmul.f32 %v3534_v17, %v6364_v62 }
 0x821   : > { %v5184_v59 = vpop.eup %5183  ;;  %v3603_v13 = vsub.f32 1.5, %v3602_v39  ;;  %v3577_v5 = vadd.f32 1e-05, %v3561_v19 }
 0x822   : > { %v5186_v7 = vpop.eup %5185  ;;  %v3620_v4 = vmul.f32 %v5184_v59, %v3576_v31  ;;  %vm3626_vm7 = vweird.f32 %v5184_v59 }
 0x823   : > { %v3604_v6 = vmul.f32 %v5182_v43, %v3603_v13  ;;  %v3610_v63 = vmul.f32 %v5186_v7, %v3575_v14  ;;  %5187 = vrsqrt.f32 %v3577_v5  ;;  %vm3616_vm8 = vweird.f32 %v5186_v7  ;;  %vm3627_vm10 = vmor %vm3625_vm9, %vm3626_vm7 }
 0x824   : > { %v3621_v36 = vmul.f32 %v5184_v59, %v3620_v4  ;;  %vm3617_vm12 = vmor %vm3615_vm11, %vm3616_vm8  ;;  %vm3635_vm14 = vweird.f32 %v3577_v5 }
 0x825   : > { %v3608_v54 = vsel %vm3607_vm6, %v5182_v43, %v3604_v6  ;;  %v3611_v22 = vmul.f32 %v5186_v7, %v3610_v63 }
 0x826   : > { %v3750_v60 = vmul.f32 %v3608_v54, %v6806_v21  ;;  %v3622_v15 = vmul.f32 0.5, %v3621_v36  ;;  %v3536_v8 = vpop.xlane.xlu1 %3535 }
 0x827   : > { %v3612_v12 = vmul.f32 0.5, %v3611_v22  ;;  %v3562_v51 = vmul.f32 %v3536_v8, %v6364_v62 }
 0x828   : > { %v3769_v11 = vmul.f32 %v6902_v16, %v3750_v60  ;;  %v3623_v44 = vsub.f32 1.5, %v3622_v15 }
 0x829   : > { %v5188_v53 = vpop.eup %5187  ;;  %v3613_v25 = vsub.f32 1.5, %v3612_v12  ;;  %v3578_v55 = vadd.f32 1e-05, %v3562_v51 }
 0x82a   : > { %v3788_v48 = vadd.f32 %v6909_v30, %v3769_v11  ;;  %v3624_v29 = vmul.f32 %v5184_v59, %v3623_v44  ;;  %v3630_v23 = vmul.f32 %v5188_v53, %v3577_v5  ;;  %vm3636_vm13 = vweird.f32 %v5188_v53 }
 0x82b   : > { %v3614_v21 = vmul.f32 %v5186_v7, %v3613_v25  ;;  %5189 = vrsqrt.f32 %v3578_v55  ;;  %vm3637_vm15 = vmor %vm3635_vm14, %vm3636_vm13  ;;  %vm3645_vm1 = vweird.f32 %v3578_v55 }
 0x82c   : > { %3804 = vst [vmem:[%s5940_s14 + $0x8] sm:$0xff] %v3788_v48  ;;  %v3628_v56 = vsel %vm3627_vm10, %v5184_v59, %v3624_v29  ;;  %v3631_v18 = vmul.f32 %v5188_v53, %v3630_v23 }
 0x82d   : > { %v3752_v35 = vmul.f32 %v3628_v56, %v6821_v24  ;;  %v3618_v49 = vsel %vm3617_vm12, %v5186_v7, %v3614_v21 }
 0x82e   : > { %v3751_v10 = vmul.f32 %v3618_v49, %v6818_v61  ;;  %v3632_v47 = vmul.f32 0.5, %v3631_v18  ;;  %v3538_v26 = vpop.xlane.xlu2 %3537 }
 0x82f   : > { %v3771_v52 = vmul.f32 %v6902_v16, %v3752_v35  ;;  %v3563_v20 = vmul.f32 %v3538_v26, %v6364_v62 }
 0x830   : > { %v3770_v50 = vmul.f32 %v6902_v16, %v3751_v10  ;;  %v3633_v45 = vsub.f32 1.5, %v3632_v47 }
 0x831   : > { %v5190_v37 = vpop.eup %5189  ;;  %v3790_v28 = vadd.f32 %v6909_v30, %v3771_v52  ;;  %v3579_v46 = vadd.f32 1e-05, %v3563_v20 }
 0x832   : > { %v3789_v24 = vadd.f32 %v6909_v30, %v3770_v50  ;;  %v3634_v9 = vmul.f32 %v5188_v53, %v3633_v45  ;;  %v3640_v61 = vmul.f32 %v5190_v37, %v3578_v55  ;;  %vm3646_vm0 = vweird.f32 %v5190_v37 }
 0x833   : > { %3806 = vst [vmem:[%s5940_s14 + $0x18] sm:$0xff] %v3790_v28  ;;  %5191 = vrsqrt.f32 %v3579_v46  ;;  %vm3647_vm2 = vmor %vm3645_vm1, %vm3646_vm0  ;;  %vm3655_vm4 = vweird.f32 %v3579_v46 }
 0x834   : > { %3805 = vst [vmem:[%s5940_s14 + $0x10] sm:$0xff] %v3789_v24  ;;  %v3638_v31 = vsel %vm3637_vm15, %v5188_v53, %v3634_v9  ;;  %v3641_v43 = vmul.f32 %v5190_v37, %v3640_v61 }
 0x835   : > { %v3753_v14 = vmul.f32 %v3638_v31, %v6829_v38 }
 0x836   : > { %v3642_v33 = vmul.f32 0.5, %v3641_v43  ;;  %v3540_v2 = vpop.xlane.xlu0 %3539 }
 0x837   : > { %v3772_v17 = vmul.f32 %v6902_v16, %v3753_v14  ;;  %v3564_v39 = vmul.f32 %v3540_v2, %v6364_v62 }
 0x838   : > { %v3643_v19 = vsub.f32 1.5, %v3642_v33 }
 0x839   : > { %v5192_v59 = vpop.eup %5191  ;;  %v3791_v13 = vadd.f32 %v6909_v30, %v3772_v17  ;;  %v3580_v5 = vadd.f32 1e-05, %v3564_v39 }
 0x83a   : > { %v3644_v7 = vmul.f32 %v5190_v37, %v3643_v19  ;;  %v3650_v4 = vmul.f32 %v5192_v59, %v3579_v46  ;;  %vm3656_vm3 = vweird.f32 %v5192_v59 }
 0x83b   : > { %3807 = vst [vmem:[%s5940_s14 + $0x20] sm:$0xff] %v3791_v13  ;;  %5193 = vrsqrt.f32 %v3580_v5  ;;  %vm3657_vm5 = vmor %vm3655_vm4, %vm3656_vm3  ;;  %vm3665_vm7 = vweird.f32 %v3580_v5 }
 0x83c   : > { %v3648_v38 = vsel %vm3647_vm2, %v5190_v37, %v3644_v7  ;;  %v3651_v6 = vmul.f32 %v5192_v59, %v3650_v4 }
 0x83d   : > { %v3754_v63 = vmul.f32 %v3648_v38, %v6835_v34 }
 0x83e   : > { %v3652_v36 = vmul.f32 0.5, %v3651_v6  ;;  %v3542_v54 = vpop.xlane.xlu1 %3541 }
 0x83f   : > { %v3773_v22 = vmul.f32 %v6902_v16, %v3754_v63  ;;  %v3565_v60 = vmul.f32 %v3542_v54, %v6364_v62 }
 0x840   : > { %v3653_v15 = vsub.f32 1.5, %v3652_v36 }
 0x841   : > { %v5194_v8 = vpop.eup %5193  ;;  %v3792_v12 = vadd.f32 %v6909_v30, %v3773_v22  ;;  %v3581_v51 = vadd.f32 1e-05, %v3565_v60 }
 0x842   : > { %v3654_v11 = vmul.f32 %v5192_v59, %v3653_v15  ;;  %v3660_v44 = vmul.f32 %v5194_v8, %v3580_v5  ;;  %vm3666_vm6 = vweird.f32 %v5194_v8 }
 0x843   : > { %3808 = vst [vmem:[%s5940_s14 + $0x28] sm:$0xff] %v3792_v12  ;;  %5195 = vrsqrt.f32 %v3581_v51  ;;  %vm3667_vm8 = vmor %vm3665_vm7, %vm3666_vm6  ;;  %vm3675_vm10 = vweird.f32 %v3581_v51 }
 0x844   : > { %v3658_v34 = vsel %vm3657_vm5, %v5192_v59, %v3654_v11  ;;  %v3661_v53 = vmul.f32 %v5194_v8, %v3660_v44 }
 0x845   : > { %v3755_v25 = vmul.f32 %v3658_v34, %v6841_v3 }
 0x846   : > { %v3662_v55 = vmul.f32 0.5, %v3661_v53  ;;  %v3544_v48 = vpop.xlane.xlu2 %3543 }
 0x847   : > { %v3774_v29 = vmul.f32 %v6902_v16, %v3755_v25  ;;  %v3566_v23 = vmul.f32 %v3544_v48, %v6364_v62 }
 0x848   : > { %v3663_v21 = vsub.f32 1.5, %v3662_v55 }
 0x849   : > { %v5196_v56 = vpop.eup %5195  ;;  %v3793_v18 = vadd.f32 %v6909_v30, %v3774_v29  ;;  %v3582_v35 = vadd.f32 1e-05, %v3566_v23 }
 0x84a   : > { %v3664_v49 = vmul.f32 %v5194_v8, %v3663_v21  ;;  %v3670_v10 = vmul.f32 %v5196_v56, %v3581_v51  ;;  %vm3676_vm9 = vweird.f32 %v5196_v56 }
 0x84b   : > { %3809 = vst [vmem:[%s5940_s14 + $0x30] sm:$0xff] %v3793_v18  ;;  %5197 = vrsqrt.f32 %v3582_v35  ;;  %vm3677_vm11 = vmor %vm3675_vm10, %vm3676_vm9  ;;  %vm3685_vm13 = vweird.f32 %v3582_v35 }
 0x84c   : > { %v3668_v3 = vsel %vm3667_vm8, %v5194_v8, %v3664_v49  ;;  %v3671_v47 = vmul.f32 %v5196_v56, %v3670_v10 }
 0x84d   : > { %v3756_v26 = vmul.f32 %v3668_v3, %v6847_v57 }
 0x84e   : > { %v3672_v52 = vmul.f32 0.5, %v3671_v47  ;;  %v3546_v20 = vpop.xlane.xlu0 %3545 }
 0x84f   : > { %v3775_v50 = vmul.f32 %v6902_v16, %v3756_v26  ;;  %v3567_v45 = vmul.f32 %v3546_v20, %v6364_v62 }
 0x850   : > { %v3673_v37 = vsub.f32 1.5, %v3672_v52 }
 0x851   : > { %v5198_v28 = vpop.eup %5197  ;;  %v3794_v46 = vadd.f32 %v6909_v30, %v3775_v50  ;;  %v3583_v24 = vadd.f32 1e-05, %v3567_v45 }
 0x852   : > { %v3674_v9 = vmul.f32 %v5196_v56, %v3673_v37  ;;  %v3680_v61 = vmul.f32 %v5198_v28, %v3582_v35  ;;  %vm3686_vm12 = vweird.f32 %v5198_v28 }
 0x853   : > { %3810 = vst [vmem:[%s5940_s14 + $0x38] sm:$0xff] %v3794_v46  ;;  %5199 = vrsqrt.f32 %v3583_v24  ;;  %vm3687_vm14 = vmor %vm3685_vm13, %vm3686_vm12  ;;  %vm3695_vm0 = vweird.f32 %v3583_v24 }
 0x854   : > { %v3678_v57 = vsel %vm3677_vm11, %v5196_v56, %v3674_v9  ;;  %v3681_v31 = vmul.f32 %v5198_v28, %v3680_v61 }
 0x855   : > { %v3757_v43 = vmul.f32 %v3678_v57, %v6853_v42 }
 0x856   : > { %v3682_v14 = vmul.f32 0.5, %v3681_v31  ;;  %v3548_v33 = vpop.xlane.xlu1 %3547 }
 0x857   : > { %v3776_v2 = vmul.f32 %v6902_v16, %v3757_v43  ;;  %v3568_v17 = vmul.f32 %v3548_v33, %v6364_v62 }
 0x858   : > { %v3683_v39 = vsub.f32 1.5, %v3682_v14 }
 0x859   : > { %v5200_v19 = vpop.eup %5199  ;;  %v3795_v59 = vadd.f32 %v6909_v30, %v3776_v2  ;;  %v3584_v13 = vadd.f32 1e-05, %v3568_v17 }
 0x85a   : > { %v3684_v5 = vmul.f32 %v5198_v28, %v3683_v39  ;;  %v3690_v7 = vmul.f32 %v5200_v19, %v3583_v24  ;;  %vm3696_vm15 = vweird.f32 %v5200_v19 }
 0x85b   : > { %3811 = vst [vmem:[%s5940_s14 + $0x40] sm:$0xff] %v3795_v59  ;;  %5201 = vrsqrt.f32 %v3584_v13  ;;  %vm3697_vm1 = vmor %vm3695_vm0, %vm3696_vm15  ;;  %vm3705_vm3 = vweird.f32 %v3584_v13 }
 0x85c   : > { %v3688_v42 = vsel %vm3687_vm14, %v5198_v28, %v3684_v5  ;;  %v3691_v4 = vmul.f32 %v5200_v19, %v3690_v7 }
 0x85d   : > { %v3758_v38 = vmul.f32 %v3688_v42, %v6859_v40 }
 0x85e   : > { %v3692_v6 = vmul.f32 0.5, %v3691_v4  ;;  %v3550_v63 = vpop.xlane.xlu2 %3549 }
 0x85f   : > { %v3777_v36 = vmul.f32 %v6902_v16, %v3758_v38  ;;  %v3569_v54 = vmul.f32 %v3550_v63, %v6364_v62 }
 0x860   : > { %v3693_v22 = vsub.f32 1.5, %v3692_v6 }
 0x861   : > { %v5202_v60 = vpop.eup %5201  ;;  %v3796_v15 = vadd.f32 %v6909_v30, %v3777_v36  ;;  %v3585_v8 = vadd.f32 1e-05, %v3569_v54 }
 0x862   : > { %v3694_v12 = vmul.f32 %v5200_v19, %v3693_v22  ;;  %v3700_v51 = vmul.f32 %v5202_v60, %v3584_v13  ;;  %vm3706_vm2 = vweird.f32 %v5202_v60 }
 0x863   : > { %3812 = vst [vmem:[%s5940_s14 + $0x48] sm:$0xff] %v3796_v15  ;;  %5203 = vrsqrt.f32 %v3585_v8  ;;  %vm3707_vm4 = vmor %vm3705_vm3, %vm3706_vm2  ;;  %vm3715_vm6 = vweird.f32 %v3585_v8 }
 0x864   : > { %v3698_v40 = vsel %vm3697_vm1, %v5200_v19, %v3694_v12  ;;  %v3701_v11 = vmul.f32 %v5202_v60, %v3700_v51 }
 0x865   : > { %v3759_v44 = vmul.f32 %v3698_v40, %v6865_v58 }
 0x866   : > { %v3702_v34 = vmul.f32 0.5, %v3701_v11  ;;  %v3552_v53 = vpop.xlane.xlu0 %3551 }
 0x867   : > { %v3778_v25 = vmul.f32 %v6902_v16, %v3759_v44  ;;  %v3570_v55 = vmul.f32 %v3552_v53, %v6364_v62 }
 0x868   : > { %v3703_v48 = vsub.f32 1.5, %v3702_v34 }
 0x869   : > { %v5204_v29 = vpop.eup %5203  ;;  %v3797_v23 = vadd.f32 %v6909_v30, %v3778_v25  ;;  %v3586_v21 = vadd.f32 1e-05, %v3570_v55 }
 0x86a   : > { %v3704_v56 = vmul.f32 %v5202_v60, %v3703_v48  ;;  %v3710_v18 = vmul.f32 %v5204_v29, %v3585_v8  ;;  %vm3716_vm5 = vweird.f32 %v5204_v29 }
 0x86b   : > { %3813 = vst [vmem:[%s5940_s14 + $0x50] sm:$0xff] %v3797_v23  ;;  %5205 = vrsqrt.f32 %v3586_v21  ;;  %vm3717_vm7 = vmor %vm3715_vm6, %vm3716_vm5  ;;  %vm3725_vm9 = vweird.f32 %v3586_v21 }
 0x86c   : > { %v3708_v58 = vsel %vm3707_vm4, %v5202_v60, %v3704_v56  ;;  %v3711_v35 = vmul.f32 %v5204_v29, %v3710_v18 }
 0x86d   : > { %v3760_v49 = vmul.f32 %v3708_v58, %v6871_v41 }
 0x86e   : > { %v3712_v10 = vmul.f32 0.5, %v3711_v35 }
 0x86f   : > { %v3779_v3 = vmul.f32 %v6902_v16, %v3760_v49 }
 0x870   : > { %v3713_v47 = vsub.f32 1.5, %v3712_v10 }
 0x871   : > { %v5206_v26 = vpop.eup %5205  ;;  %v3798_v52 = vadd.f32 %v6909_v30, %v3779_v3 }
 0x872   : > { %v3714_v20 = vmul.f32 %v5204_v29, %v3713_v47  ;;  %v3720_v50 = vmul.f32 %v5206_v26, %v3586_v21  ;;  %vm3726_vm8 = vweird.f32 %v5206_v26 }
 0x873   : > { %3814 = vst [vmem:[%s5940_s14 + $0x58] sm:$0xff] %v3798_v52  ;;  %vm3727_vm10 = vmor %vm3725_vm9, %vm3726_vm8 }
 0x874   : > { %v3718_v45 = vsel %vm3717_vm7, %v5204_v29, %v3714_v20  ;;  %v3721_v37 = vmul.f32 %v5206_v26, %v3720_v50 }
 0x875   : > { %v3761_v28 = vmul.f32 %v3718_v45, %v6877_v27 }
 0x876   : > { %v3722_v41 = vmul.f32 0.5, %v3721_v37 }
 0x877   : > { %v3780_v46 = vmul.f32 %v6902_v16, %v3761_v28 }
 0x878   : > { %v3723_v24 = vsub.f32 1.5, %v3722_v41 }
 0x879   : > { %v3799_v9 = vadd.f32 %v6909_v30, %v3780_v46 }
 0x87a   : > { %v3724_v61 = vmul.f32 %v5206_v26, %v3723_v24 }
 0x87b   : > { %3815 = vst [vmem:[%s5940_s14 + $0x60] sm:$0xff] %v3799_v9 }
 0x87c   : > { %v3728_v57 = vsel %vm3727_vm10, %v5206_v26, %v3724_v61 }
 0x87d   : > { %v3762_v31 = vmul.f32 %v3728_v57, %v6883_v1 }
 0x87f   : > { %v3781_v43 = vmul.f32 %v6902_v16, %v3762_v31 }
 0x881   : > { %v3800_v14 = vadd.f32 %v6909_v30, %v3781_v43  ;;  %v3554_v27 = vpop.xlane.xlu1 %3553 }
 0x882   : > { %v3571_v33 = vmul.f32 %v3554_v27, %v6364_v62 }
 0x883   : > { %3816 = vst [vmem:[%s5940_s14 + $0x68] sm:$0xff] %v3800_v14 }
 0x884   : > { %v3587_v2 = vadd.f32 1e-05, %v3571_v33 }
 0x886   : > { %5207 = vrsqrt.f32 %v3587_v2  ;;  %vm3735_vm12 = vweird.f32 %v3587_v2 }
 0x889   : > { %v3556_v17 = vpop.xlane.xlu2 %3555 }
 0x88a   : > { %v3572_v39 = vmul.f32 %v3556_v17, %v6364_v62 }
 0x88c   : > { %v5208_v19 = vpop.eup %5207  ;;  %v3588_v59 = vadd.f32 1e-05, %v3572_v39 }
 0x88d   : > { %v3730_v13 = vmul.f32 %v5208_v19, %v3587_v2  ;;  %vm3736_vm11 = vweird.f32 %v5208_v19 }
 0x88e   : > { %5209 = vrsqrt.f32 %v3588_v59  ;;  %vm3737_vm13 = vmor %vm3735_vm12, %vm3736_vm11  ;;  %vm3745_vm15 = vweird.f32 %v3588_v59 }
 0x88f   : > { %v3731_v1 = vmul.f32 %v5208_v19, %v3730_v13 }
 0x891   : > { %v3732_v5 = vmul.f32 0.5, %v3731_v1 }
 0x893   : > { %v3733_v7 = vsub.f32 1.5, %v3732_v5 }
 0x894   : > { %v5210_v42 = vpop.eup %5209 }
 0x895   : > { %v3734_v4 = vmul.f32 %v5208_v19, %v3733_v7  ;;  %v3740_v38 = vmul.f32 %v5210_v42, %v3588_v59  ;;  %vm3746_vm14 = vweird.f32 %v5210_v42 }
 0x896   : > { %vm3747_vm0 = vmor %vm3745_vm15, %vm3746_vm14 }
 0x897   : > { %v3738_v6 = vsel %vm3737_vm13, %v5208_v19, %v3734_v4  ;;  %v3741_v63 = vmul.f32 %v5210_v42, %v3740_v38 }
 0x898   : > { %v3763_v62 = vmul.f32 %v3738_v6, %v6890_v32 }
 0x899   : > { %v3742_v36 = vmul.f32 0.5, %v3741_v63 }
 0x89a   : > { %v3782_v54 = vmul.f32 %v6902_v16, %v3763_v62 }
 0x89b   : > { %v3743_v22 = vsub.f32 1.5, %v3742_v36 }
 0x89c   : > { %v3801_v60 = vadd.f32 %v6909_v30, %v3782_v54 }
 0x89d   : > { %v3744_v15 = vmul.f32 %v5210_v42, %v3743_v22 }
 0x89e   : > { %3817 = vst [vmem:[%s5940_s14 + $0x70] sm:$0xff] %v3801_v60 }
 0x89f   : > { %v3748_v32 = vsel %vm3747_vm0, %v5210_v42, %v3744_v15 }
 0x8a0   : > { %v3764_v8 = vmul.f32 %v3748_v32, %v6897_v0 }
 0x8a2   : > { %v3783_v12 = vmul.f32 %v6902_v16, %v3764_v8 }
 0x8a4   : > { %v3802_v51 = vadd.f32 %v6909_v30, %v3783_v12 }
 0x8a6   : > { %3818 = vst [vmem:[%s5940_s14 + $0x78] sm:$0xff] %v3802_v51 }
 0x8a7   : > { %5488 = shalt.err (!%p5485_p10)
}
 0x8a8   : > { %s5618_s15 = smov 128   ;;  %s5619_s14 = smov 8  }
 0x8a9   : > { %4892 = dma.vmem_to_hbm [thread:$0]  (%p5849_p0), %s3835_s9, 2048, %s3837_s27, %s3820_s5, %s5618_s15, %s5618_s15, %s5619_s14  }
 0x8aa PF: > { %p4937_p12 = scmp.ge.s32.totalorder %s5603_s0, 2  ;;  %s3851_s7 = sand.u32 1, %s5575_s24  }
 0x8ab   : > { %s3852_s12 = scalar_lea.sflag [#allocation6], %s3851_s7 }
 0x8ac   : > { %p4921_p11 = pnand %p4937_p12, %p5859_p6 }
 0x8ae   : > { %p4922_p2 = pneg %p4921_p11 }
 0x8b0   : > { %5558 = dma.done.wait (%p4922_p2), %s3852_s12, 2048  }
 0x8b1   : > { %5560 = vsyncadd (%p4922_p2), %s3852_s12, 4294965248  ;;  %s38_s0 = sadd.s32 1, %s5603_s0   ;;  %s7114_s27 = sld [smem:[#allocation28_spill]] }
 0x8b2   : > { %p35_p8 = scmp.ge.s32.totalorder %s38_s0, 6   ;;  %s7115_s29 = sld [smem:[#allocation29_spill]] }
 0x8b3   : > { %s7116_s19 = sld [smem:[#allocation30_spill]]  ;;  %s7117_s21 = smov %s5567_s22 }
 0x8b4   : > { %s7118_s22 = smov %s5571_s23  ;;  %s7119_s23 = smov %s5883_s3 }
 0x8b5   : > { %s7120_s24 = smov %s5579_s25  ;;  %s7121_s25 = smov %s5583_s26 }
 0x8b6   : > { %s7122_s26 = smov %s5866_s13  ;;  %s7123_s28 = smov %s5599_s30 }
 0x8b7   :  { %37 = sbr.rel (!%p35_p8) target bundleno = 31 (0x1f), region = 170 }
 0x8b9   : > { %s7124_s30 = smov %s7116_s19 }
 0x8bc   :  { %3858 = vsyncpa [#allocation5], 1 }
 0x8bd   :  { %3860 = vsyncpa [#allocation5 + $0x1], 1 }
 0x8be   :  { %3861 = vsyncpa [#allocation8], 1 }
 0x8bf   :  { %3863 = vsyncpa [#allocation8 + $0x1], 1 }
 0x8c0   :  { %3864 = vsyncpa [#allocation11], 1 }
 0x8c1   :  { %3865 = vsyncpa [#allocation14], 1 }
 0x8c2   :  { %3866 = vsyncpa [#allocation17], 1 }
 0x8c3   :  { %3867 = vsyncpa [#allocation6], 1 }
 0x8c4   :  { %3869 = vsyncpa [#allocation6 + $0x1], 1 }

</bundles_post_ra>
